<compile_context>
chip_gen: v7x
topology: tpu7x:2x2x1
jax: 0.10.0
libtpu: 0.0.40
codegen_flags: <defaults>
</compile_context>

<pallas_src>
import numpy as np
import jax
import jax.numpy as jnp
from jax import lax
from jax.experimental import pallas as pl
from jax.experimental.pallas import tpu as pltpu


def _sigmoid(x):
    return 1.0 / (1.0 + jnp.exp(-x))


# ----------------------------------------------------------------------------
# Fused kernel: attention MLP (batched over all timesteps) + AUGRU recurrence
# ----------------------------------------------------------------------------
def _make_augru_kernel(T, B, H, E, A, inv_count):
    """Builds the fused AUGRU kernel; shapes and 1/count are compile-time constants."""
    TB = T * B
    EA = E * A
    H2 = 2 * H
    # column offsets inside the x row-block of w_all
    C_GX = EA                 # x-side gate logits (pre-broadcast to 2H lanes)
    C_CX = EA + H2            # x @ wcx
    C_ZX = EA + H2 + H        # x @ w1x
    # row offsets inside w_all
    R_Q = H                   # q-side weights (R | w1q)
    R_GH = H + E              # Wgh (column-replicated wuh | wrh)
    R_CH = H + E + H          # wch
    R_AUX = H + E + 2 * H     # small vectors: b1, [bu|br], alpha, w2, bc, b2

    f32 = jnp.float32
    HIGH = lax.Precision.HIGHEST

    def kernel(xm_ref, w_ref, s_ref, q_ref, out_ref, hfin_ref, gx_s, cx_s, att_s):
        # ---------------- pass 1: hidden-state independent work ----------------
        b1 = w_ref[R_AUX + 0:R_AUX + 1, 0:A]          # (1, A)
        bvec = w_ref[R_AUX + 1:R_AUX + 2, 0:H2]        # (1, 2H) = [bu..bu, br..br]
        alpha = w_ref[R_AUX + 2:R_AUX + 3, 0:A]        # (1, A)
        w2 = w_ref[R_AUX + 3:R_AUX + 4, 0:A]           # (1, A)
        bc = w_ref[R_AUX + 4:R_AUX + 5, 0:H]           # (1, H)
        b2 = w_ref[R_AUX + 5:R_AUX + 6, 0:1]           # (1, 1)

        # ONE shared-weight MXU matmul for all x-side linear work (attention W1p / W1x,
        # x-side gate logits pre-broadcast to H lanes each, and x @ wcx).
        xf = xm_ref[0]                                                     # (TB, H)
        xw = jnp.dot(xf, w_ref[0:H, :], preferred_element_type=f32,
                     precision=HIGH)                                        # (TB, 368)
        y = xw[:, 0:EA]                                                     # (TB, E*A)
        gx_s[...] = xw[:, C_GX:C_GX + H2] + bvec                            # (TB, 2H)
        cx_s[...] = xw[:, C_CX:C_CX + H] + bc                               # (TB, H)
        zx = xw[:, C_ZX:C_ZX + A]                                           # (TB, A)

        # q-side shared-weight matmul, then replicate over the T timesteps (sublane tile).
        qw = jnp.dot(q_ref[...], w_ref[R_Q:R_Q + E, :],
                     preferred_element_type=f32, precision=HIGH)            # (B, 368)
        qb = jnp.concatenate([qw[:, 0:EA]] * T, axis=0)                     # (TB, E*A)
        qz = jnp.concatenate([qw[:, EA:EA + A] + b1] * T, axis=0)           # (TB, A)

        # Outer-product feature contribution: (x @ W1p) * q, grouped-summed on the MXU via S.
        zp = jnp.dot(y * qb, s_ref[...], preferred_element_type=f32,
                     precision=HIGH)                                        # (TB, A)
        z1 = zx + zp + qz                                                   # (TB, A)

        # Dice: masked batch statistics over the packed rows (1/count baked in).
        mval = xm_ref[1, :, 0:A]                                            # (TB, A) mask
        zm = z1 * mval
        s1 = jnp.sum(zm, axis=0, keepdims=True)
        s2 = jnp.sum(zm * zm, axis=0, keepdims=True)
        mean = s1 * inv_count
        var = jnp.maximum(s2 * inv_count - mean * mean, 0.0)                # clamp -> no NaN
        pg = jax.nn.sigmoid((z1 - mean) * lax.rsqrt(var + 1e-8))
        dz = pg * z1 + (1.0 - pg) * alpha * z1
        att = jnp.sum(dz * w2, axis=-1, keepdims=True) + b2                 # (TB, 1)
        att_s[...] = jnp.broadcast_to(att, (TB, H))                         # pre-broadcast

        # ---------------- pass 2: serial AUGRU recurrence ----------------
        wgh = w_ref[R_GH:R_GH + H, 0:H2]                                    # (H, 2H)
        wch = w_ref[R_CH:R_CH + H, 0:H]                                     # (H, H)

        def step(t, h):
            lo = pl.multiple_of(t * B, B)
            rows = pl.ds(lo, B)
            # gate logits: pre-broadcast x-side slab + one MXU matmul for the h-side
            logits = gx_s[rows, :] + jnp.dot(h, wgh, preferred_element_type=f32,
                                             precision=HIGH)               # (B, 2H)
            g = jax.nn.sigmoid(logits)
            u = att_s[rows, :] * g[:, 0:H]                                  # (B, H)
            r = g[:, H:H2]                                                  # (B, H)
            cand = jnp.tanh(cx_s[rows, :] + jnp.dot(h * r, wch,
                                                    preferred_element_type=f32,
                                                    precision=HIGH))        # (B, H)
            m = xm_ref[1, rows, :]                                          # (B, H) mask
            h_new = h + (m * u) * (cand - h)   # valid rows: (1-u)h+u*cand ; invalid: keep h
            out_ref[rows, :] = h_new
            return h_new

        h_last = lax.fori_loop(0, T, step, jnp.zeros((B, H), f32), unroll=True)
        hfin_ref[...] = h_last

    return kernel


# ----------------------------------------------------------------------------
# Host-side parameter packing (done ONCE, outside the jitted forward)
# ----------------------------------------------------------------------------
def pack_params(params, H, E, A):
    EA = E * A
    H2 = 2 * H
    COLS = EA + H2 + H + A
    R_Q = H
    R_GH = H + E
    R_CH = H + E + H
    R_AUX = H + E + 2 * H
    ROWS = R_AUX + 8

    p = {k: np.asarray(v, np.float32) for k, v in params.items()}
    w1 = p["w1"]
    w1x = w1[:H]                                  # (H, A)
    w1p2d = w1[H:H + H * E].reshape(H, EA)        # row h*E+e ordering -> [h, e*A+a]
    w1q = w1[H + H * E:]                          # (E, A)

    w_all = np.zeros((ROWS, COLS), np.float32)
    # x row-block
    w_all[0:H, 0:EA] = w1p2d
    w_all[0:H, EA:EA + H] = np.tile(p["wux"][:, None], (1, H))
    w_all[0:H, EA + H:EA + H2] = np.tile(p["wrx"][:, None], (1, H))
    w_all[0:H, EA + H2:EA + H2 + H] = p["wcx"]
    w_all[0:H, EA + H2 + H:EA + H2 + H + A] = w1x
    # q row-block: R[j, j*A+a] = 1 (lane-replication of q_j), then w1q
    w_all[R_Q:R_Q + E, 0:EA] = np.kron(np.eye(E, dtype=np.float32),
                                       np.ones((1, A), np.float32))
    w_all[R_Q:R_Q + E, EA:EA + A] = w1q
    # h-side gate weights, column-replicated so h @ Wgh gives pre-broadcast slabs
    w_all[R_GH:R_GH + H, 0:H] = np.tile(p["wuh"][:, None], (1, H))
    w_all[R_GH:R_GH + H, H:H2] = np.tile(p["wrh"][:, None], (1, H))
    # candidate h-side
    w_all[R_CH:R_CH + H, 0:H] = p["wch"]
    # small vectors
    w_all[R_AUX + 0, 0:A] = p["b1"]
    w_all[R_AUX + 1, 0:H] = float(p["bu"])
    w_all[R_AUX + 1, H:H2] = float(p["br"])
    w_all[R_AUX + 2, 0:A] = p["alpha"]
    w_all[R_AUX + 3, 0:A] = p["w2"]
    w_all[R_AUX + 4, 0:H] = p["bc"]
    w_all[R_AUX + 5, 0] = float(p["b2"])

    # grouped lane-sum selection: S[j*A + a, a'] = (a == a')
    w_s = np.tile(np.eye(A, dtype=np.float32), (E, 1))                      # (E*A, A)
    return jnp.asarray(w_all), jnp.asarray(w_s)


def _packed_indices(batch_sizes):
    t_idx, b_idx = [], []
    for t, bsz in enumerate(batch_sizes):
        t_idx.extend([t] * bsz)
        b_idx.extend(range(bsz))
    return np.asarray(t_idx, np.int32), np.asarray(b_idx, np.int32)


# ----------------------------------------------------------------------------
# Forward builder (batch_sizes / shapes are static -> baked into the kernel)
# ----------------------------------------------------------------------------
def build_augru_forward(batch_sizes, H, E, A):
    bs = np.asarray(batch_sizes, np.int64)
    T = len(batch_sizes)
    B = int(bs[0])
    TB = T * B
    inv_count = 1.0 / float(bs.sum())

    mask_np = (np.arange(B)[None, :] < bs[:, None]).astype(np.float32)      # (T, B)
    mask_b = np.repeat(mask_np.reshape(TB, 1), H, axis=1)                   # (T*B, H)
    t_idx, b_idx = _packed_indices(batch_sizes)
    rows_np = t_idx * B + b_idx

    mask_c = jnp.asarray(mask_b)
    rows_c = jnp.asarray(rows_np)

    kernel = _make_augru_kernel(T, B, H, E, A, inv_count)
    vmem = pltpu.MemorySpace.VMEM
    call = pl.pallas_call(
        kernel,
        out_shape=(jax.ShapeDtypeStruct((TB, H), jnp.float32),
                   jax.ShapeDtypeStruct((B, H), jnp.float32)),
        in_specs=[pl.BlockSpec(memory_space=vmem)] * 4,
        out_specs=(pl.BlockSpec(memory_space=vmem),
                   pl.BlockSpec(memory_space=vmem)),
        scratch_shapes=[pltpu.VMEM((TB, 2 * H), jnp.float32),   # x-side gate logit slabs
                        pltpu.VMEM((TB, H), jnp.float32),       # x @ wcx + bc
                        pltpu.VMEM((TB, H), jnp.float32)],      # attention, pre-broadcast
    )

    @jax.jit
    def forward(x_pad, query, sorted_indices, unsorted_indices, w_all, w_s):
        q_s = query[sorted_indices].astype(jnp.float32)          # (B, E)
        xf = x_pad.astype(jnp.float32).reshape(TB, H)            # time-major flat
        xm = jnp.stack([xf, mask_c], axis=0)                     # (2, TB, H)
        out_flat, h_fin = call(xm, w_all, w_s, q_s)
        # Re-pack outputs (PackedSequence.data layout) — gather-only glue.
        return out_flat[rows_c], h_fin[unsorted_indices]

    return forward


# ----------------------------------------------------------------------------
# Pure-JAX reference (literal translation of the PyTorch packed-sequence loop)
# ----------------------------------------------------------------------------
def augru_reference(x_packed, batch_sizes, query, sorted_indices, unsorted_indices, params):
    H = x_packed.shape[1]
    hp = jax.lax.Precision.HIGHEST

    q_s = query[sorted_indices]
    idx = jnp.asarray(np.concatenate([np.arange(bs) for bs in batch_sizes]).astype(np.int32))
    qe = q_s[idx]
    N = x_packed.shape[0]
    E = query.shape[1]
    p = (x_packed[:, :, None] * qe[:, None, :]).reshape(N, H * E)
    feat = jnp.concatenate([x_packed, p, qe], axis=1)
    z1 = jnp.dot(feat, params["w1"], precision=hp) + params["b1"]
    mean = jnp.mean(z1, axis=0)
    var = jnp.mean(z1 * z1, axis=0) - mean * mean
    pg = _sigmoid((z1 - mean) * jax.lax.rsqrt(var + 1e-8))
    dz = pg * z1 + (1.0 - pg) * params["alpha"] * z1
    att = jnp.sum(dz * params["w2"], axis=1, keepdims=True) + params["b2"]

    B = batch_sizes[0]
    h = jnp.zeros((B, H), jnp.float32)
    out_h = jnp.zeros((B, H), jnp.float32)
    outs = []
    start = 0
    for bs in batch_sizes:
        _x = x_packed[start:start + bs]
        _att = att[start:start + bs]
        _h = h[:bs]
        u = _sigmoid(jnp.sum(_x * params["wux"], axis=1, keepdims=True)
                     + jnp.sum(_h * params["wuh"], axis=1, keepdims=True) + params["bu"])
        u = _att * u
        r = _sigmoid(jnp.sum(_x * params["wrx"], axis=1, keepdims=True)
                     + jnp.sum(_h * params["wrh"], axis=1, keepdims=True) + params["br"])
        tilde = jnp.tanh(jnp.dot(_x, params["wcx"], precision=hp)
                         + jnp.dot(_h * r, params["wch"], precision=hp) + params["bc"])
        hn = (1.0 - u) * _h + u * tilde
        outs.append(hn)
        h = h.at[:bs].set(hn)
        out_h = out_h.at[:bs].set(hn)
        start += bs
    return jnp.concatenate(outs, axis=0), out_h[unsorted_indices]


def init_params(key, H, E, A):
    F = H + H * E + E
    ks = jax.random.split(key, 12)
    f32 = jnp.float32
    return dict(
        w1=(jax.random.normal(ks[0], (F, A)) / np.sqrt(F)).astype(f32),
        b1=(jax.random.normal(ks[1], (A,)) * 0.01).astype(f32),
        w2=(jax.random.normal(ks[2], (A,)) / np.sqrt(A)).astype(f32),
        b2=jnp.array(0.05, f32),
        alpha=(jax.random.normal(ks[3], (A,)) * 0.1).astype(f32),
        wux=(jax.random.normal(ks[4], (H,)) / np.sqrt(2 * H)).astype(f32),
        wuh=(jax.random.normal(ks[5], (H,)) / np.sqrt(2 * H)).astype(f32),
        bu=jnp.array(0.0, f32),
        wrx=(jax.random.normal(ks[6], (H,)) / np.sqrt(2 * H)).astype(f32),
        wrh=(jax.random.normal(ks[7], (H,)) / np.sqrt(2 * H)).astype(f32),
        br=jnp.array(0.0, f32),
        wcx=(jax.random.normal(ks[8], (H, H)) / np.sqrt(2 * H)).astype(f32),
        wch=(jax.random.normal(ks[9], (H, H)) / np.sqrt(2 * H)).astype(f32),
        bc=(jax.random.normal(ks[10], (H,)) * 0.01).astype(f32),
    )


if __name__ == "__main__":
    # Small shapes: 8 sequences, max length 8, input_size = hidden_size = 32,
    # embed_dim = 16, attention_dim = 16.
    T, B, H, E, A = 8, 8, 32, 16, 16
    batch_sizes = [8, 8, 7, 6, 5, 4, 3, 2]          # decreasing, as in a PackedSequence

    key = jax.random.PRNGKey(0)
    k_x, k_q, k_p = jax.random.split(key, 3)
    x_pad = (jax.random.normal(k_x, (T, B, H)) * 0.5).astype(jnp.float32)
    query = (jax.random.normal(k_q, (B, E)) * 0.5).astype(jnp.float32)
    sorted_indices = jnp.array([3, 1, 7, 0, 5, 2, 6, 4], jnp.int32)
    unsorted_indices = jnp.argsort(sorted_indices)
    params = init_params(k_p, H, E, A)

    # Packed view of the same data (for the reference).
    t_idx, b_idx = _packed_indices(batch_sizes)
    x_packed = x_pad[t_idx, b_idx]

    # Pack parameters once; build & run the fused kernel.
    w_all, w_s = pack_params(params, H, E, A)
    forward = build_augru_forward(batch_sizes, H, E, A)
    out_k, h_k = forward(x_pad, query, sorted_indices, unsorted_indices, w_all, w_s)
    jax.block_until_ready(out_k)
    jax.block_until_ready(h_k)

    out_r, h_r = augru_reference(x_packed, batch_sizes, query, sorted_indices,
                                 unsorted_indices, params)

    np.testing.assert_allclose(np.asarray(out_k), np.asarray(out_r), rtol=2e-3, atol=2e-3)
    np.testing.assert_allclose(np.asarray(h_k), np.asarray(h_r), rtol=2e-3, atol=2e-3)

    print("KERNEL_OK")
</pallas_src>

<mosaic_0001>
module attributes {stable_mosaic.version = 11 : i64} {
  func.func @kernel(%arg0: memref<2x64x32xf32, #tpu.memory_space<vmem>>, %arg1: memref<120x368xf32, #tpu.memory_space<vmem>>, %arg2: memref<256x16xf32, #tpu.memory_space<vmem>>, %arg3: memref<8x16xf32, #tpu.memory_space<vmem>>, %arg4: memref<64x32xf32, #tpu.memory_space<vmem>>, %arg5: memref<8x32xf32, #tpu.memory_space<vmem>>, %arg6: memref<64x64xf32, #tpu.memory_space<vmem>>, %arg7: memref<64x32xf32, #tpu.memory_space<vmem>>, %arg8: memref<64x32xf32, #tpu.memory_space<vmem>>) attributes {dimension_semantics = [], scalar_prefetch = 0 : i64, scratch_operands = 3 : i64, tpu.core_type = #tpu.core_type<tc>} {
    %c112 = arith.constant 112 : index
    %c0 = arith.constant 0 : index
    %0 = vector.load %arg1[%c112, %c0] : memref<120x368xf32, #tpu.memory_space<vmem>>, vector<1x16xf32>
    %c113 = arith.constant 113 : index
    %c0_0 = arith.constant 0 : index
    %1 = vector.load %arg1[%c113, %c0_0] : memref<120x368xf32, #tpu.memory_space<vmem>>, vector<1x64xf32>
    %c114 = arith.constant 114 : index
    %c0_1 = arith.constant 0 : index
    %2 = vector.load %arg1[%c114, %c0_1] : memref<120x368xf32, #tpu.memory_space<vmem>>, vector<1x16xf32>
    %c115 = arith.constant 115 : index
    %c0_2 = arith.constant 0 : index
    %3 = vector.load %arg1[%c115, %c0_2] : memref<120x368xf32, #tpu.memory_space<vmem>>, vector<1x16xf32>
    %c116 = arith.constant 116 : index
    %c0_3 = arith.constant 0 : index
    %4 = vector.load %arg1[%c116, %c0_3] : memref<120x368xf32, #tpu.memory_space<vmem>>, vector<1x32xf32>
    %c117 = arith.constant 117 : index
    %c0_4 = arith.constant 0 : index
    %5 = vector.load %arg1[%c117, %c0_4] : memref<120x368xf32, #tpu.memory_space<vmem>>, vector<1x1xf32>
    %c0_5 = arith.constant 0 : index
    %c0_6 = arith.constant 0 : index
    %c0_7 = arith.constant 0 : index
    %6 = vector.load %arg0[%c0_5, %c0_6, %c0_7] : memref<2x64x32xf32, #tpu.memory_space<vmem>>, vector<1x64x32xf32>
    %7 = vector.shape_cast %6 : vector<1x64x32xf32> to vector<64x32xf32>
    %c0_8 = arith.constant 0 : index
    %c0_9 = arith.constant 0 : index
    %8 = vector.load %arg1[%c0_8, %c0_9] : memref<120x368xf32, #tpu.memory_space<vmem>>, vector<32x368xf32>
    %cst = arith.constant dense<0.000000e+00> : vector<64x368xf32>
    %9 = tpu.matmul %7, %8, %cst {dimension_numbers = #tpu.dot_dimension_numbers<[1], [0], [0], [1], [0, 0, 1, 1], [], []>, precision = #tpu.contract_precision<fp32>} : vector<64x32xf32>, vector<32x368xf32>, vector<64x368xf32> -> vector<64x368xf32>
    %10 = vector.extract_strided_slice %9 {offsets = [0, 0], sizes = [64, 256], strides = [1, 1]} : vector<64x368xf32> to vector<64x256xf32>
    %11 = vector.extract_strided_slice %9 {offsets = [0, 256], sizes = [64, 64], strides = [1, 1]} : vector<64x368xf32> to vector<64x64xf32>
    %12 = vector.broadcast %1 : vector<1x64xf32> to vector<64x64xf32>
    %13 = arith.addf %11, %12 : vector<64x64xf32>
    %c0_10 = arith.constant 0 : index
    %c0_11 = arith.constant 0 : index
    %14 = vector.load %arg6[%c0_10, %c0_11] : memref<64x64xf32, #tpu.memory_space<vmem>>, vector<64x64xf32>
    tpu.vector_store %arg6[%c0_10, %c0_11], %13 {strides = array<i32>} : memref<64x64xf32, #tpu.memory_space<vmem>>, vector<64x64xf32>,
    %15 = vector.extract_strided_slice %9 {offsets = [0, 320], sizes = [64, 32], strides = [1, 1]} : vector<64x368xf32> to vector<64x32xf32>
    %16 = vector.broadcast %4 : vector<1x32xf32> to vector<64x32xf32>
    %17 = arith.addf %15, %16 : vector<64x32xf32>
    %c0_12 = arith.constant 0 : index
    %c0_13 = arith.constant 0 : index
    %18 = vector.load %arg7[%c0_12, %c0_13] : memref<64x32xf32, #tpu.memory_space<vmem>>, vector<64x32xf32>
    tpu.vector_store %arg7[%c0_12, %c0_13], %17 {strides = array<i32>} : memref<64x32xf32, #tpu.memory_space<vmem>>, vector<64x32xf32>,
    %19 = vector.extract_strided_slice %9 {offsets = [0, 352], sizes = [64, 16], strides = [1, 1]} : vector<64x368xf32> to vector<64x16xf32>
    %c0_14 = arith.constant 0 : index
    %c0_15 = arith.constant 0 : index
    %20 = vector.load %arg3[%c0_14, %c0_15] : memref<8x16xf32, #tpu.memory_space<vmem>>, vector<8x16xf32>
    %c32 = arith.constant 32 : index
    %c0_16 = arith.constant 0 : index
    %21 = vector.load %arg1[%c32, %c0_16] : memref<120x368xf32, #tpu.memory_space<vmem>>, vector<16x368xf32>
    %cst_17 = arith.constant dense<0.000000e+00> : vector<8x368xf32>
    %22 = tpu.matmul %20, %21, %cst_17 {dimension_numbers = #tpu.dot_dimension_numbers<[1], [0], [0], [1], [0, 0, 1, 1], [], []>, precision = #tpu.contract_precision<fp32>} : vector<8x16xf32>, vector<16x368xf32>, vector<8x368xf32> -> vector<8x368xf32>
    %23 = vector.extract_strided_slice %22 {offsets = [0, 0], sizes = [8, 256], strides = [1, 1]} : vector<8x368xf32> to vector<8x256xf32>
    %24 = tpu.concatenate %23, %23, %23, %23, %23, %23, %23, %23 in 0 : vector<8x256xf32>, vector<8x256xf32>, vector<8x256xf32>, vector<8x256xf32>, vector<8x256xf32>, vector<8x256xf32>, vector<8x256xf32>, vector<8x256xf32> -> vector<64x256xf32>
    %25 = vector.extract_strided_slice %22 {offsets = [0, 256], sizes = [8, 16], strides = [1, 1]} : vector<8x368xf32> to vector<8x16xf32>
    %26 = vector.broadcast %0 : vector<1x16xf32> to vector<8x16xf32>
    %27 = arith.addf %25, %26 : vector<8x16xf32>
    %28 = tpu.concatenate %27, %27, %27, %27, %27, %27, %27, %27 in 0 : vector<8x16xf32>, vector<8x16xf32>, vector<8x16xf32>, vector<8x16xf32>, vector<8x16xf32>, vector<8x16xf32>, vector<8x16xf32>, vector<8x16xf32> -> vector<64x16xf32>
    %29 = arith.mulf %10, %24 : vector<64x256xf32>
    %c0_18 = arith.constant 0 : index
    %c0_19 = arith.constant 0 : index
    %30 = vector.load %arg2[%c0_18, %c0_19] : memref<256x16xf32, #tpu.memory_space<vmem>>, vector<256x16xf32>
    %cst_20 = arith.constant dense<0.000000e+00> : vector<64x16xf32>
    %31 = tpu.matmul %29, %30, %cst_20 {dimension_numbers = #tpu.dot_dimension_numbers<[1], [0], [0], [1], [0, 0, 1, 1], [], []>, precision = #tpu.contract_precision<fp32>} : vector<64x256xf32>, vector<256x16xf32>, vector<64x16xf32> -> vector<64x16xf32>
    %32 = arith.addf %19, %31 : vector<64x16xf32>
    %33 = arith.addf %32, %28 : vector<64x16xf32>
    %c1 = arith.constant 1 : index
    %c0_21 = arith.constant 0 : index
    %c0_22 = arith.constant 0 : index
    %34 = vector.load %arg0[%c1, %c0_21, %c0_22] : memref<2x64x32xf32, #tpu.memory_space<vmem>>, vector<1x64x16xf32>
    %35 = vector.shape_cast %34 : vector<1x64x16xf32> to vector<64x16xf32>
    %36 = arith.mulf %33, %35 : vector<64x16xf32>
    %cst_23 = arith.constant dense<0.000000e+00> : vector<16xf32>
    %37 = vector.multi_reduction <add>, %36, %cst_23 [0] : vector<64x16xf32> to vector<16xf32>
    %38 = vector.shape_cast %37 : vector<16xf32> to vector<1x16xf32>
    %39 = arith.mulf %36, %36 : vector<64x16xf32>
    %cst_24 = arith.constant dense<0.000000e+00> : vector<16xf32>
    %40 = vector.multi_reduction <add>, %39, %cst_24 [0] : vector<64x16xf32> to vector<16xf32>
    %41 = vector.shape_cast %40 : vector<16xf32> to vector<1x16xf32>
    %cst_25 = arith.constant 0.0232558139 : f32
    %42 = vector.broadcast %cst_25 : f32 to vector<1x16xf32>
    %43 = arith.mulf %38, %42 : vector<1x16xf32>
    %cst_26 = arith.constant 0.0232558139 : f32
    %44 = vector.broadcast %cst_26 : f32 to vector<1x16xf32>
    %45 = arith.mulf %41, %44 : vector<1x16xf32>
    %46 = arith.mulf %43, %43 : vector<1x16xf32>
    %47 = arith.subf %45, %46 : vector<1x16xf32>
    %cst_27 = arith.constant 0.000000e+00 : f32
    %48 = vector.broadcast %cst_27 : f32 to vector<1x16xf32>
    %49 = arith.maximumf %47, %48 : vector<1x16xf32>
    %50 = vector.broadcast %43 : vector<1x16xf32> to vector<64x16xf32>
    %51 = arith.subf %33, %50 : vector<64x16xf32>
    %cst_28 = arith.constant 9.99999993E-9 : f32
    %52 = vector.broadcast %cst_28 : f32 to vector<1x16xf32>
    %53 = arith.addf %49, %52 : vector<1x16xf32>
    %54 = math.rsqrt %53 : vector<1x16xf32>
    %55 = vector.broadcast %54 : vector<1x16xf32> to vector<64x16xf32>
    %56 = arith.mulf %51, %55 : vector<64x16xf32>
    %57 = arith.negf %56 : vector<64x16xf32>
    %58 = math.exp %57 : vector<64x16xf32>
    %cst_29 = arith.constant 1.000000e+00 : f32
    %59 = vector.broadcast %cst_29 : f32 to vector<64x16xf32>
    %60 = arith.addf %59, %58 : vector<64x16xf32>
    %61 = arith.divf %59, %60 : vector<64x16xf32>
    %62 = arith.mulf %61, %33 : vector<64x16xf32>
    %cst_30 = arith.constant 1.000000e+00 : f32
    %63 = vector.broadcast %cst_30 : f32 to vector<64x16xf32>
    %64 = arith.subf %63, %61 : vector<64x16xf32>
    %65 = vector.broadcast %2 : vector<1x16xf32> to vector<64x16xf32>
    %66 = arith.mulf %64, %65 : vector<64x16xf32>
    %67 = arith.mulf %66, %33 : vector<64x16xf32>
    %68 = arith.addf %62, %67 : vector<64x16xf32>
    %69 = vector.broadcast %3 : vector<1x16xf32> to vector<64x16xf32>
    %70 = arith.mulf %68, %69 : vector<64x16xf32>
    %cst_31 = arith.constant dense<0.000000e+00> : vector<64xf32>
    %71 = vector.multi_reduction <add>, %70, %cst_31 [1] : vector<64x16xf32> to vector<64xf32>
    %72 = vector.shape_cast %71 : vector<64xf32> to vector<64x1xf32>
    %73 = vector.broadcast %5 : vector<1x1xf32> to vector<64x1xf32>
    %74 = arith.addf %72, %73 : vector<64x1xf32>
    %75 = vector.shape_cast %74 : vector<64x1xf32> to vector<64x1xf32>
    %76 = vector.broadcast %75 : vector<64x1xf32> to vector<64x32xf32>
    %c0_32 = arith.constant 0 : index
    %c0_33 = arith.constant 0 : index
    %77 = vector.load %arg8[%c0_32, %c0_33] : memref<64x32xf32, #tpu.memory_space<vmem>>, vector<64x32xf32>
    tpu.vector_store %arg8[%c0_32, %c0_33], %76 {strides = array<i32>} : memref<64x32xf32, #tpu.memory_space<vmem>>, vector<64x32xf32>,
    %c48 = arith.constant 48 : index
    %c0_34 = arith.constant 0 : index
    %78 = vector.load %arg1[%c48, %c0_34] : memref<120x368xf32, #tpu.memory_space<vmem>>, vector<32x64xf32>
    %c80 = arith.constant 80 : index
    %c0_35 = arith.constant 0 : index
    %79 = vector.load %arg1[%c80, %c0_35] : memref<120x368xf32, #tpu.memory_space<vmem>>, vector<32x32xf32>
    %cst_36 = arith.constant 0.000000e+00 : f32
    %80 = vector.broadcast %cst_36 : f32 to vector<8x32xf32>
    %c0_i32 = arith.constant 0 : i32
    %c8_i32 = arith.constant 8 : i32
    %81 = arith.muli %c0_i32, %c8_i32 : i32
    %82 = tpu.assume_multiple %81, 8 : i32
    %83 = arith.index_cast %82 : i32 to index
    %c0_37 = arith.constant 0 : index
    %84 = vector.load %arg6[%83, %c0_37] : memref<64x64xf32, #tpu.memory_space<vmem>>, vector<8x64xf32>
    %cst_38 = arith.constant dense<0.000000e+00> : vector<8x64xf32>
    %85 = tpu.matmul %80, %78, %cst_38 {dimension_numbers = #tpu.dot_dimension_numbers<[1], [0], [0], [1], [0, 0, 1, 1], [], []>, precision = #tpu.contract_precision<fp32>} : vector<8x32xf32>, vector<32x64xf32>, vector<8x64xf32> -> vector<8x64xf32>
    %86 = arith.addf %84, %85 : vector<8x64xf32>
    %87 = arith.negf %86 : vector<8x64xf32>
    %88 = math.exp %87 : vector<8x64xf32>
    %cst_39 = arith.constant 1.000000e+00 : f32
    %89 = vector.broadcast %cst_39 : f32 to vector<8x64xf32>
    %90 = arith.addf %89, %88 : vector<8x64xf32>
    %91 = arith.divf %89, %90 : vector<8x64xf32>
    %92 = arith.index_cast %82 : i32 to index
    %c0_40 = arith.constant 0 : index
    %93 = vector.load %arg8[%92, %c0_40] : memref<64x32xf32, #tpu.memory_space<vmem>>, vector<8x32xf32>
    %94 = vector.extract_strided_slice %91 {offsets = [0, 0], sizes = [8, 32], strides = [1, 1]} : vector<8x64xf32> to vector<8x32xf32>
    %95 = arith.mulf %93, %94 : vector<8x32xf32>
    %96 = vector.extract_strided_slice %91 {offsets = [0, 32], sizes = [8, 32], strides = [1, 1]} : vector<8x64xf32> to vector<8x32xf32>
    %97 = arith.index_cast %82 : i32 to index
    %c0_41 = arith.constant 0 : index
    %98 = vector.load %arg7[%97, %c0_41] : memref<64x32xf32, #tpu.memory_space<vmem>>, vector<8x32xf32>
    %99 = arith.mulf %80, %96 : vector<8x32xf32>
    %cst_42 = arith.constant dense<0.000000e+00> : vector<8x32xf32>
    %100 = tpu.matmul %99, %79, %cst_42 {dimension_numbers = #tpu.dot_dimension_numbers<[1], [0], [0], [1], [0, 0, 1, 1], [], []>, precision = #tpu.contract_precision<fp32>} : vector<8x32xf32>, vector<32x32xf32>, vector<8x32xf32> -> vector<8x32xf32>
    %101 = arith.addf %98, %100 : vector<8x32xf32>
    %102 = math.tanh %101 : vector<8x32xf32>
    %c1_43 = arith.constant 1 : index
    %103 = arith.index_cast %82 : i32 to index
    %c0_44 = arith.constant 0 : index
    %104 = vector.load %arg0[%c1_43, %103, %c0_44] : memref<2x64x32xf32, #tpu.memory_space<vmem>>, vector<1x8x32xf32>
    %105 = vector.shape_cast %104 : vector<1x8x32xf32> to vector<8x32xf32>
    %106 = arith.mulf %105, %95 : vector<8x32xf32>
    %107 = arith.subf %102, %80 : vector<8x32xf32>
    %108 = arith.mulf %106, %107 : vector<8x32xf32>
    %109 = arith.addf %80, %108 : vector<8x32xf32>
    %110 = arith.index_cast %82 : i32 to index
    %c0_45 = arith.constant 0 : index
    %111 = vector.load %arg4[%110, %c0_45] : memref<64x32xf32, #tpu.memory_space<vmem>>, vector<8x32xf32>
    tpu.vector_store %arg4[%110, %c0_45], %109 {strides = array<i32>} : memref<64x32xf32, #tpu.memory_space<vmem>>, vector<8x32xf32>,
    %c1_i32 = arith.constant 1 : i32
    %c8_i32_46 = arith.constant 8 : i32
    %112 = arith.muli %c1_i32, %c8_i32_46 : i32
    %113 = tpu.assume_multiple %112, 8 : i32
    %114 = arith.index_cast %113 : i32 to index
    %c0_47 = arith.constant 0 : index
    %115 = vector.load %arg6[%114, %c0_47] : memref<64x64xf32, #tpu.memory_space<vmem>>, vector<8x64xf32>
    %cst_48 = arith.constant dense<0.000000e+00> : vector<8x64xf32>
    %116 = tpu.matmul %109, %78, %cst_48 {dimension_numbers = #tpu.dot_dimension_numbers<[1], [0], [0], [1], [0, 0, 1, 1], [], []>, precision = #tpu.contract_precision<fp32>} : vector<8x32xf32>, vector<32x64xf32>, vector<8x64xf32> -> vector<8x64xf32>
    %117 = arith.addf %115, %116 : vector<8x64xf32>
    %118 = arith.negf %117 : vector<8x64xf32>
    %119 = math.exp %118 : vector<8x64xf32>
    %cst_49 = arith.constant 1.000000e+00 : f32
    %120 = vector.broadcast %cst_49 : f32 to vector<8x64xf32>
    %121 = arith.addf %120, %119 : vector<8x64xf32>
    %122 = arith.divf %120, %121 : vector<8x64xf32>
    %123 = arith.index_cast %113 : i32 to index
    %c0_50 = arith.constant 0 : index
    %124 = vector.load %arg8[%123, %c0_50] : memref<64x32xf32, #tpu.memory_space<vmem>>, vector<8x32xf32>
    %125 = vector.extract_strided_slice %122 {offsets = [0, 0], sizes = [8, 32], strides = [1, 1]} : vector<8x64xf32> to vector<8x32xf32>
    %126 = arith.mulf %124, %125 : vector<8x32xf32>
    %127 = vector.extract_strided_slice %122 {offsets = [0, 32], sizes = [8, 32], strides = [1, 1]} : vector<8x64xf32> to vector<8x32xf32>
    %128 = arith.index_cast %113 : i32 to index
    %c0_51 = arith.constant 0 : index
    %129 = vector.load %arg7[%128, %c0_51] : memref<64x32xf32, #tpu.memory_space<vmem>>, vector<8x32xf32>
    %130 = arith.mulf %109, %127 : vector<8x32xf32>
    %cst_52 = arith.constant dense<0.000000e+00> : vector<8x32xf32>
    %131 = tpu.matmul %130, %79, %cst_52 {dimension_numbers = #tpu.dot_dimension_numbers<[1], [0], [0], [1], [0, 0, 1, 1], [], []>, precision = #tpu.contract_precision<fp32>} : vector<8x32xf32>, vector<32x32xf32>, vector<8x32xf32> -> vector<8x32xf32>
    %132 = arith.addf %129, %131 : vector<8x32xf32>
    %133 = math.tanh %132 : vector<8x32xf32>
    %c1_53 = arith.constant 1 : index
    %134 = arith.index_cast %113 : i32 to index
    %c0_54 = arith.constant 0 : index
    %135 = vector.load %arg0[%c1_53, %134, %c0_54] : memref<2x64x32xf32, #tpu.memory_space<vmem>>, vector<1x8x32xf32>
    %136 = vector.shape_cast %135 : vector<1x8x32xf32> to vector<8x32xf32>
    %137 = arith.mulf %136, %126 : vector<8x32xf32>
    %138 = arith.subf %133, %109 : vector<8x32xf32>
    %139 = arith.mulf %137, %138 : vector<8x32xf32>
    %140 = arith.addf %109, %139 : vector<8x32xf32>
    %141 = arith.index_cast %113 : i32 to index
    %c0_55 = arith.constant 0 : index
    %142 = vector.load %arg4[%141, %c0_55] : memref<64x32xf32, #tpu.memory_space<vmem>>, vector<8x32xf32>
    tpu.vector_store %arg4[%141, %c0_55], %140 {strides = array<i32>} : memref<64x32xf32, #tpu.memory_space<vmem>>, vector<8x32xf32>,
    %c2_i32 = arith.constant 2 : i32
    %c8_i32_56 = arith.constant 8 : i32
    %143 = arith.muli %c2_i32, %c8_i32_56 : i32
    %144 = tpu.assume_multiple %143, 8 : i32
    %145 = arith.index_cast %144 : i32 to index
    %c0_57 = arith.constant 0 : index
    %146 = vector.load %arg6[%145, %c0_57] : memref<64x64xf32, #tpu.memory_space<vmem>>, vector<8x64xf32>
    %cst_58 = arith.constant dense<0.000000e+00> : vector<8x64xf32>
    %147 = tpu.matmul %140, %78, %cst_58 {dimension_numbers = #tpu.dot_dimension_numbers<[1], [0], [0], [1], [0, 0, 1, 1], [], []>, precision = #tpu.contract_precision<fp32>} : vector<8x32xf32>, vector<32x64xf32>, vector<8x64xf32> -> vector<8x64xf32>
    %148 = arith.addf %146, %147 : vector<8x64xf32>
    %149 = arith.negf %148 : vector<8x64xf32>
    %150 = math.exp %149 : vector<8x64xf32>
    %cst_59 = arith.constant 1.000000e+00 : f32
    %151 = vector.broadcast %cst_59 : f32 to vector<8x64xf32>
    %152 = arith.addf %151, %150 : vector<8x64xf32>
    %153 = arith.divf %151, %152 : vector<8x64xf32>
    %154 = arith.index_cast %144 : i32 to index
    %c0_60 = arith.constant 0 : index
    %155 = vector.load %arg8[%154, %c0_60] : memref<64x32xf32, #tpu.memory_space<vmem>>, vector<8x32xf32>
    %156 = vector.extract_strided_slice %153 {offsets = [0, 0], sizes = [8, 32], strides = [1, 1]} : vector<8x64xf32> to vector<8x32xf32>
    %157 = arith.mulf %155, %156 : vector<8x32xf32>
    %158 = vector.extract_strided_slice %153 {offsets = [0, 32], sizes = [8, 32], strides = [1, 1]} : vector<8x64xf32> to vector<8x32xf32>
    %159 = arith.index_cast %144 : i32 to index
    %c0_61 = arith.constant 0 : index
    %160 = vector.load %arg7[%159, %c0_61] : memref<64x32xf32, #tpu.memory_space<vmem>>, vector<8x32xf32>
    %161 = arith.mulf %140, %158 : vector<8x32xf32>
    %cst_62 = arith.constant dense<0.000000e+00> : vector<8x32xf32>
    %162 = tpu.matmul %161, %79, %cst_62 {dimension_numbers = #tpu.dot_dimension_numbers<[1], [0], [0], [1], [0, 0, 1, 1], [], []>, precision = #tpu.contract_precision<fp32>} : vector<8x32xf32>, vector<32x32xf32>, vector<8x32xf32> -> vector<8x32xf32>
    %163 = arith.addf %160, %162 : vector<8x32xf32>
    %164 = math.tanh %163 : vector<8x32xf32>
    %c1_63 = arith.constant 1 : index
    %165 = arith.index_cast %144 : i32 to index
    %c0_64 = arith.constant 0 : index
    %166 = vector.load %arg0[%c1_63, %165, %c0_64] : memref<2x64x32xf32, #tpu.memory_space<vmem>>, vector<1x8x32xf32>
    %167 = vector.shape_cast %166 : vector<1x8x32xf32> to vector<8x32xf32>
    %168 = arith.mulf %167, %157 : vector<8x32xf32>
    %169 = arith.subf %164, %140 : vector<8x32xf32>
    %170 = arith.mulf %168, %169 : vector<8x32xf32>
    %171 = arith.addf %140, %170 : vector<8x32xf32>
    %172 = arith.index_cast %144 : i32 to index
    %c0_65 = arith.constant 0 : index
    %173 = vector.load %arg4[%172, %c0_65] : memref<64x32xf32, #tpu.memory_space<vmem>>, vector<8x32xf32>
    tpu.vector_store %arg4[%172, %c0_65], %171 {strides = array<i32>} : memref<64x32xf32, #tpu.memory_space<vmem>>, vector<8x32xf32>,
    %c3_i32 = arith.constant 3 : i32
    %c8_i32_66 = arith.constant 8 : i32
    %174 = arith.muli %c3_i32, %c8_i32_66 : i32
    %175 = tpu.assume_multiple %174, 8 : i32
    %176 = arith.index_cast %175 : i32 to index
    %c0_67 = arith.constant 0 : index
    %177 = vector.load %arg6[%176, %c0_67] : memref<64x64xf32, #tpu.memory_space<vmem>>, vector<8x64xf32>
    %cst_68 = arith.constant dense<0.000000e+00> : vector<8x64xf32>
    %178 = tpu.matmul %171, %78, %cst_68 {dimension_numbers = #tpu.dot_dimension_numbers<[1], [0], [0], [1], [0, 0, 1, 1], [], []>, precision = #tpu.contract_precision<fp32>} : vector<8x32xf32>, vector<32x64xf32>, vector<8x64xf32> -> vector<8x64xf32>
    %179 = arith.addf %177, %178 : vector<8x64xf32>
    %180 = arith.negf %179 : vector<8x64xf32>
    %181 = math.exp %180 : vector<8x64xf32>
    %cst_69 = arith.constant 1.000000e+00 : f32
    %182 = vector.broadcast %cst_69 : f32 to vector<8x64xf32>
    %183 = arith.addf %182, %181 : vector<8x64xf32>
    %184 = arith.divf %182, %183 : vector<8x64xf32>
    %185 = arith.index_cast %175 : i32 to index
    %c0_70 = arith.constant 0 : index
    %186 = vector.load %arg8[%185, %c0_70] : memref<64x32xf32, #tpu.memory_space<vmem>>, vector<8x32xf32>
    %187 = vector.extract_strided_slice %184 {offsets = [0, 0], sizes = [8, 32], strides = [1, 1]} : vector<8x64xf32> to vector<8x32xf32>
    %188 = arith.mulf %186, %187 : vector<8x32xf32>
    %189 = vector.extract_strided_slice %184 {offsets = [0, 32], sizes = [8, 32], strides = [1, 1]} : vector<8x64xf32> to vector<8x32xf32>
    %190 = arith.index_cast %175 : i32 to index
    %c0_71 = arith.constant 0 : index
    %191 = vector.load %arg7[%190, %c0_71] : memref<64x32xf32, #tpu.memory_space<vmem>>, vector<8x32xf32>
    %192 = arith.mulf %171, %189 : vector<8x32xf32>
    %cst_72 = arith.constant dense<0.000000e+00> : vector<8x32xf32>
    %193 = tpu.matmul %192, %79, %cst_72 {dimension_numbers = #tpu.dot_dimension_numbers<[1], [0], [0], [1], [0, 0, 1, 1], [], []>, precision = #tpu.contract_precision<fp32>} : vector<8x32xf32>, vector<32x32xf32>, vector<8x32xf32> -> vector<8x32xf32>
    %194 = arith.addf %191, %193 : vector<8x32xf32>
    %195 = math.tanh %194 : vector<8x32xf32>
    %c1_73 = arith.constant 1 : index
    %196 = arith.index_cast %175 : i32 to index
    %c0_74 = arith.constant 0 : index
    %197 = vector.load %arg0[%c1_73, %196, %c0_74] : memref<2x64x32xf32, #tpu.memory_space<vmem>>, vector<1x8x32xf32>
    %198 = vector.shape_cast %197 : vector<1x8x32xf32> to vector<8x32xf32>
    %199 = arith.mulf %198, %188 : vector<8x32xf32>
    %200 = arith.subf %195, %171 : vector<8x32xf32>
    %201 = arith.mulf %199, %200 : vector<8x32xf32>
    %202 = arith.addf %171, %201 : vector<8x32xf32>
    %203 = arith.index_cast %175 : i32 to index
    %c0_75 = arith.constant 0 : index
    %204 = vector.load %arg4[%203, %c0_75] : memref<64x32xf32, #tpu.memory_space<vmem>>, vector<8x32xf32>
    tpu.vector_store %arg4[%203, %c0_75], %202 {strides = array<i32>} : memref<64x32xf32, #tpu.memory_space<vmem>>, vector<8x32xf32>,
    %c4_i32 = arith.constant 4 : i32
    %c8_i32_76 = arith.constant 8 : i32
    %205 = arith.muli %c4_i32, %c8_i32_76 : i32
    %206 = tpu.assume_multiple %205, 8 : i32
    %207 = arith.index_cast %206 : i32 to index
    %c0_77 = arith.constant 0 : index
    %208 = vector.load %arg6[%207, %c0_77] : memref<64x64xf32, #tpu.memory_space<vmem>>, vector<8x64xf32>
    %cst_78 = arith.constant dense<0.000000e+00> : vector<8x64xf32>
    %209 = tpu.matmul %202, %78, %cst_78 {dimension_numbers = #tpu.dot_dimension_numbers<[1], [0], [0], [1], [0, 0, 1, 1], [], []>, precision = #tpu.contract_precision<fp32>} : vector<8x32xf32>, vector<32x64xf32>, vector<8x64xf32> -> vector<8x64xf32>
    %210 = arith.addf %208, %209 : vector<8x64xf32>
    %211 = arith.negf %210 : vector<8x64xf32>
    %212 = math.exp %211 : vector<8x64xf32>
    %cst_79 = arith.constant 1.000000e+00 : f32
    %213 = vector.broadcast %cst_79 : f32 to vector<8x64xf32>
    %214 = arith.addf %213, %212 : vector<8x64xf32>
    %215 = arith.divf %213, %214 : vector<8x64xf32>
    %216 = arith.index_cast %206 : i32 to index
    %c0_80 = arith.constant 0 : index
    %217 = vector.load %arg8[%216, %c0_80] : memref<64x32xf32, #tpu.memory_space<vmem>>, vector<8x32xf32>
    %218 = vector.extract_strided_slice %215 {offsets = [0, 0], sizes = [8, 32], strides = [1, 1]} : vector<8x64xf32> to vector<8x32xf32>
    %219 = arith.mulf %217, %218 : vector<8x32xf32>
    %220 = vector.extract_strided_slice %215 {offsets = [0, 32], sizes = [8, 32], strides = [1, 1]} : vector<8x64xf32> to vector<8x32xf32>
    %221 = arith.index_cast %206 : i32 to index
    %c0_81 = arith.constant 0 : index
    %222 = vector.load %arg7[%221, %c0_81] : memref<64x32xf32, #tpu.memory_space<vmem>>, vector<8x32xf32>
    %223 = arith.mulf %202, %220 : vector<8x32xf32>
    %cst_82 = arith.constant dense<0.000000e+00> : vector<8x32xf32>
    %224 = tpu.matmul %223, %79, %cst_82 {dimension_numbers = #tpu.dot_dimension_numbers<[1], [0], [0], [1], [0, 0, 1, 1], [], []>, precision = #tpu.contract_precision<fp32>} : vector<8x32xf32>, vector<32x32xf32>, vector<8x32xf32> -> vector<8x32xf32>
    %225 = arith.addf %222, %224 : vector<8x32xf32>
    %226 = math.tanh %225 : vector<8x32xf32>
    %c1_83 = arith.constant 1 : index
    %227 = arith.index_cast %206 : i32 to index
    %c0_84 = arith.constant 0 : index
    %228 = vector.load %arg0[%c1_83, %227, %c0_84] : memref<2x64x32xf32, #tpu.memory_space<vmem>>, vector<1x8x32xf32>
    %229 = vector.shape_cast %228 : vector<1x8x32xf32> to vector<8x32xf32>
    %230 = arith.mulf %229, %219 : vector<8x32xf32>
    %231 = arith.subf %226, %202 : vector<8x32xf32>
    %232 = arith.mulf %230, %231 : vector<8x32xf32>
    %233 = arith.addf %202, %232 : vector<8x32xf32>
    %234 = arith.index_cast %206 : i32 to index
    %c0_85 = arith.constant 0 : index
    %235 = vector.load %arg4[%234, %c0_85] : memref<64x32xf32, #tpu.memory_space<vmem>>, vector<8x32xf32>
    tpu.vector_store %arg4[%234, %c0_85], %233 {strides = array<i32>} : memref<64x32xf32, #tpu.memory_space<vmem>>, vector<8x32xf32>,
    %c5_i32 = arith.constant 5 : i32
    %c8_i32_86 = arith.constant 8 : i32
    %236 = arith.muli %c5_i32, %c8_i32_86 : i32
    %237 = tpu.assume_multiple %236, 8 : i32
    %238 = arith.index_cast %237 : i32 to index
    %c0_87 = arith.constant 0 : index
    %239 = vector.load %arg6[%238, %c0_87] : memref<64x64xf32, #tpu.memory_space<vmem>>, vector<8x64xf32>
    %cst_88 = arith.constant dense<0.000000e+00> : vector<8x64xf32>
    %240 = tpu.matmul %233, %78, %cst_88 {dimension_numbers = #tpu.dot_dimension_numbers<[1], [0], [0], [1], [0, 0, 1, 1], [], []>, precision = #tpu.contract_precision<fp32>} : vector<8x32xf32>, vector<32x64xf32>, vector<8x64xf32> -> vector<8x64xf32>
    %241 = arith.addf %239, %240 : vector<8x64xf32>
    %242 = arith.negf %241 : vector<8x64xf32>
    %243 = math.exp %242 : vector<8x64xf32>
    %cst_89 = arith.constant 1.000000e+00 : f32
    %244 = vector.broadcast %cst_89 : f32 to vector<8x64xf32>
    %245 = arith.addf %244, %243 : vector<8x64xf32>
    %246 = arith.divf %244, %245 : vector<8x64xf32>
    %247 = arith.index_cast %237 : i32 to index
    %c0_90 = arith.constant 0 : index
    %248 = vector.load %arg8[%247, %c0_90] : memref<64x32xf32, #tpu.memory_space<vmem>>, vector<8x32xf32>
    %249 = vector.extract_strided_slice %246 {offsets = [0, 0], sizes = [8, 32], strides = [1, 1]} : vector<8x64xf32> to vector<8x32xf32>
    %250 = arith.mulf %248, %249 : vector<8x32xf32>
    %251 = vector.extract_strided_slice %246 {offsets = [0, 32], sizes = [8, 32], strides = [1, 1]} : vector<8x64xf32> to vector<8x32xf32>
    %252 = arith.index_cast %237 : i32 to index
    %c0_91 = arith.constant 0 : index
    %253 = vector.load %arg7[%252, %c0_91] : memref<64x32xf32, #tpu.memory_space<vmem>>, vector<8x32xf32>
    %254 = arith.mulf %233, %251 : vector<8x32xf32>
    %cst_92 = arith.constant dense<0.000000e+00> : vector<8x32xf32>
    %255 = tpu.matmul %254, %79, %cst_92 {dimension_numbers = #tpu.dot_dimension_numbers<[1], [0], [0], [1], [0, 0, 1, 1], [], []>, precision = #tpu.contract_precision<fp32>} : vector<8x32xf32>, vector<32x32xf32>, vector<8x32xf32> -> vector<8x32xf32>
    %256 = arith.addf %253, %255 : vector<8x32xf32>
    %257 = math.tanh %256 : vector<8x32xf32>
    %c1_93 = arith.constant 1 : index
    %258 = arith.index_cast %237 : i32 to index
    %c0_94 = arith.constant 0 : index
    %259 = vector.load %arg0[%c1_93, %258, %c0_94] : memref<2x64x32xf32, #tpu.memory_space<vmem>>, vector<1x8x32xf32>
    %260 = vector.shape_cast %259 : vector<1x8x32xf32> to vector<8x32xf32>
    %261 = arith.mulf %260, %250 : vector<8x32xf32>
    %262 = arith.subf %257, %233 : vector<8x32xf32>
    %263 = arith.mulf %261, %262 : vector<8x32xf32>
    %264 = arith.addf %233, %263 : vector<8x32xf32>
    %265 = arith.index_cast %237 : i32 to index
    %c0_95 = arith.constant 0 : index
    %266 = vector.load %arg4[%265, %c0_95] : memref<64x32xf32, #tpu.memory_space<vmem>>, vector<8x32xf32>
    tpu.vector_store %arg4[%265, %c0_95], %264 {strides = array<i32>} : memref<64x32xf32, #tpu.memory_space<vmem>>, vector<8x32xf32>,
    %c6_i32 = arith.constant 6 : i32
    %c8_i32_96 = arith.constant 8 : i32
    %267 = arith.muli %c6_i32, %c8_i32_96 : i32
    %268 = tpu.assume_multiple %267, 8 : i32
    %269 = arith.index_cast %268 : i32 to index
    %c0_97 = arith.constant 0 : index
    %270 = vector.load %arg6[%269, %c0_97] : memref<64x64xf32, #tpu.memory_space<vmem>>, vector<8x64xf32>
    %cst_98 = arith.constant dense<0.000000e+00> : vector<8x64xf32>
    %271 = tpu.matmul %264, %78, %cst_98 {dimension_numbers = #tpu.dot_dimension_numbers<[1], [0], [0], [1], [0, 0, 1, 1], [], []>, precision = #tpu.contract_precision<fp32>} : vector<8x32xf32>, vector<32x64xf32>, vector<8x64xf32> -> vector<8x64xf32>
    %272 = arith.addf %270, %271 : vector<8x64xf32>
    %273 = arith.negf %272 : vector<8x64xf32>
    %274 = math.exp %273 : vector<8x64xf32>
    %cst_99 = arith.constant 1.000000e+00 : f32
    %275 = vector.broadcast %cst_99 : f32 to vector<8x64xf32>
    %276 = arith.addf %275, %274 : vector<8x64xf32>
    %277 = arith.divf %275, %276 : vector<8x64xf32>
    %278 = arith.index_cast %268 : i32 to index
    %c0_100 = arith.constant 0 : index
    %279 = vector.load %arg8[%278, %c0_100] : memref<64x32xf32, #tpu.memory_space<vmem>>, vector<8x32xf32>
    %280 = vector.extract_strided_slice %277 {offsets = [0, 0], sizes = [8, 32], strides = [1, 1]} : vector<8x64xf32> to vector<8x32xf32>
    %281 = arith.mulf %279, %280 : vector<8x32xf32>
    %282 = vector.extract_strided_slice %277 {offsets = [0, 32], sizes = [8, 32], strides = [1, 1]} : vector<8x64xf32> to vector<8x32xf32>
    %283 = arith.index_cast %268 : i32 to index
    %c0_101 = arith.constant 0 : index
    %284 = vector.load %arg7[%283, %c0_101] : memref<64x32xf32, #tpu.memory_space<vmem>>, vector<8x32xf32>
    %285 = arith.mulf %264, %282 : vector<8x32xf32>
    %cst_102 = arith.constant dense<0.000000e+00> : vector<8x32xf32>
    %286 = tpu.matmul %285, %79, %cst_102 {dimension_numbers = #tpu.dot_dimension_numbers<[1], [0], [0], [1], [0, 0, 1, 1], [], []>, precision = #tpu.contract_precision<fp32>} : vector<8x32xf32>, vector<32x32xf32>, vector<8x32xf32> -> vector<8x32xf32>
    %287 = arith.addf %284, %286 : vector<8x32xf32>
    %288 = math.tanh %287 : vector<8x32xf32>
    %c1_103 = arith.constant 1 : index
    %289 = arith.index_cast %268 : i32 to index
    %c0_104 = arith.constant 0 : index
    %290 = vector.load %arg0[%c1_103, %289, %c0_104] : memref<2x64x32xf32, #tpu.memory_space<vmem>>, vector<1x8x32xf32>
    %291 = vector.shape_cast %290 : vector<1x8x32xf32> to vector<8x32xf32>
    %292 = arith.mulf %291, %281 : vector<8x32xf32>
    %293 = arith.subf %288, %264 : vector<8x32xf32>
    %294 = arith.mulf %292, %293 : vector<8x32xf32>
    %295 = arith.addf %264, %294 : vector<8x32xf32>
    %296 = arith.index_cast %268 : i32 to index
    %c0_105 = arith.constant 0 : index
    %297 = vector.load %arg4[%296, %c0_105] : memref<64x32xf32, #tpu.memory_space<vmem>>, vector<8x32xf32>
    tpu.vector_store %arg4[%296, %c0_105], %295 {strides = array<i32>} : memref<64x32xf32, #tpu.memory_space<vmem>>, vector<8x32xf32>,
    %c7_i32 = arith.constant 7 : i32
    %c8_i32_106 = arith.constant 8 : i32
    %298 = arith.muli %c7_i32, %c8_i32_106 : i32
    %299 = tpu.assume_multiple %298, 8 : i32
    %300 = arith.index_cast %299 : i32 to index
    %c0_107 = arith.constant 0 : index
    %301 = vector.load %arg6[%300, %c0_107] : memref<64x64xf32, #tpu.memory_space<vmem>>, vector<8x64xf32>
    %cst_108 = arith.constant dense<0.000000e+00> : vector<8x64xf32>
    %302 = tpu.matmul %295, %78, %cst_108 {dimension_numbers = #tpu.dot_dimension_numbers<[1], [0], [0], [1], [0, 0, 1, 1], [], []>, precision = #tpu.contract_precision<fp32>} : vector<8x32xf32>, vector<32x64xf32>, vector<8x64xf32> -> vector<8x64xf32>
    %303 = arith.addf %301, %302 : vector<8x64xf32>
    %304 = arith.negf %303 : vector<8x64xf32>
    %305 = math.exp %304 : vector<8x64xf32>
    %cst_109 = arith.constant 1.000000e+00 : f32
    %306 = vector.broadcast %cst_109 : f32 to vector<8x64xf32>
    %307 = arith.addf %306, %305 : vector<8x64xf32>
    %308 = arith.divf %306, %307 : vector<8x64xf32>
    %309 = arith.index_cast %299 : i32 to index
    %c0_110 = arith.constant 0 : index
    %310 = vector.load %arg8[%309, %c0_110] : memref<64x32xf32, #tpu.memory_space<vmem>>, vector<8x32xf32>
    %311 = vector.extract_strided_slice %308 {offsets = [0, 0], sizes = [8, 32], strides = [1, 1]} : vector<8x64xf32> to vector<8x32xf32>
    %312 = arith.mulf %310, %311 : vector<8x32xf32>
    %313 = vector.extract_strided_slice %308 {offsets = [0, 32], sizes = [8, 32], strides = [1, 1]} : vector<8x64xf32> to vector<8x32xf32>
    %314 = arith.index_cast %299 : i32 to index
    %c0_111 = arith.constant 0 : index
    %315 = vector.load %arg7[%314, %c0_111] : memref<64x32xf32, #tpu.memory_space<vmem>>, vector<8x32xf32>
    %316 = arith.mulf %295, %313 : vector<8x32xf32>
    %cst_112 = arith.constant dense<0.000000e+00> : vector<8x32xf32>
    %317 = tpu.matmul %316, %79, %cst_112 {dimension_numbers = #tpu.dot_dimension_numbers<[1], [0], [0], [1], [0, 0, 1, 1], [], []>, precision = #tpu.contract_precision<fp32>} : vector<8x32xf32>, vector<32x32xf32>, vector<8x32xf32> -> vector<8x32xf32>
    %318 = arith.addf %315, %317 : vector<8x32xf32>
    %319 = math.tanh %318 : vector<8x32xf32>
    %c1_113 = arith.constant 1 : index
    %320 = arith.index_cast %299 : i32 to index
    %c0_114 = arith.constant 0 : index
    %321 = vector.load %arg0[%c1_113, %320, %c0_114] : memref<2x64x32xf32, #tpu.memory_space<vmem>>, vector<1x8x32xf32>
    %322 = vector.shape_cast %321 : vector<1x8x32xf32> to vector<8x32xf32>
    %323 = arith.mulf %322, %312 : vector<8x32xf32>
    %324 = arith.subf %319, %295 : vector<8x32xf32>
    %325 = arith.mulf %323, %324 : vector<8x32xf32>
    %326 = arith.addf %295, %325 : vector<8x32xf32>
    %327 = arith.index_cast %299 : i32 to index
    %c0_115 = arith.constant 0 : index
    %328 = vector.load %arg4[%327, %c0_115] : memref<64x32xf32, #tpu.memory_space<vmem>>, vector<8x32xf32>
    tpu.vector_store %arg4[%327, %c0_115], %326 {strides = array<i32>} : memref<64x32xf32, #tpu.memory_space<vmem>>, vector<8x32xf32>,
    %c8_i32_116 = arith.constant 8 : i32
    %c0_117 = arith.constant 0 : index
    %c0_118 = arith.constant 0 : index
    %329 = vector.load %arg5[%c0_117, %c0_118] : memref<8x32xf32, #tpu.memory_space<vmem>>, vector<8x32xf32>
    tpu.vector_store %arg5[%c0_117, %c0_118], %326 {strides = array<i32>} : memref<8x32xf32, #tpu.memory_space<vmem>>, vector<8x32xf32>,
    return
  }
}

</mosaic_0001>

<bundles_post_ra>
// kernel: forward.1
= control target key start
LH: loop header
LB: loop body
LE: loop exit
PB: predicated region body
PF: predicated region fallthrough
CT: control target
= control target key end

     0   :  { %v18419_v3 = vmov 0.0   ;;  %vm45_vm0 = vcmask 261120   ;;  %vm1818_vm1 = vcmask 130048   ;;  %vm15826_vm2 = vmmov 0   ;;  %s15827_s11 = smov 96   ;;  %s15828_s21 = smov 32   ;;  %s18406_s1 = inlined_call_operand.vmem [shape: f32[120,368], index: 1, kind: input, shape index: {}]   ;;  %s18407_s0 = inlined_call_operand.vmem [shape: f32[2,64,32], index: 0, kind: input, shape index: {}]   ;;  %s18408_s3 = inlined_call_operand.vmem [shape: f32[8,16], index: 3, kind: input, shape index: {}]   ;;  %s18409_s2 = inlined_call_operand.vmem [shape: f32[256,16], index: 2, kind: input, shape index: {}]   ;;  %s18410_s4 = inlined_call_operand.vmem [shape: f32[64,32], index: 4, kind: output, shape index: {0}]   ;;  %s18411_s5 = inlined_call_operand.vmem [shape: f32[8,32], index: 5, kind: output, shape index: {1}]  }
   0x1   :  { %v34_v0 = vld [vmem:[%s18406_s1 + $0x8] sm:$0xff]  ;;  %v37_v1 = vld [vmem:[%s18406_s1 + $0x20] sm:$0xff]  ;;  %v15870_v2 = vld [vmem:[%s18406_s1 + $0x10] sm:$0xff]  ;;  %142 = vmatprep.mubr.f32.mxu0 %v18419_v3  ;;  %vm1750_vm3 = vcmask 523264   ;;  %vm4176_vm4 = vcmask 917248   ;;  %s15829_s24 = smov 64  }
   0x2   :  { %v70_v4 = vand.u32 4294901760, %v34_v0  ;;  %v74_v5 = vand.u32 4294901760, %v37_v1  ;;  %v15876_v6 = vld [vmem:[%s18406_s1 + $0x28] sm:$0xff]  ;;  %v957_v7 = vand.u32 4294901760, %v15870_v2  ;;  %v33_v8 = vld [vmem:[%s18406_s1] sm:$0xff]  ;;  %v36_v9 = vld [vmem:[%s18406_s1 + $0x18] sm:$0xff] }
   0x3   :  { %v960_v10 = vand.u32 4294901760, %v15876_v6  ;;  %v72_v11 = vand.u32 4294901760, %v33_v8  ;;  %v76_v12 = vand.u32 4294901760, %v36_v9  ;;  %v40_v13 = vld [vmem:[%s18406_s1 + $0x38] sm:$0xff]  ;;  %v43_v14 = vld [vmem:[%s18406_s1 + $0x50] sm:$0xff]  ;;  %v15895_v15 = vld [vmem:[%s18406_s1 + $0x40] sm:$0xff] }
   0x4   :  { %v15897_v16 = vpack.c.bf16 %v74_v5, %v70_v4  ;;  %v15899_v17 = vsub.f32 %v34_v0, %v70_v4  ;;  %v15901_v18 = vsub.f32 %v37_v1, %v74_v5  ;;  %v78_v19 = vand.u32 4294901760, %v40_v13  ;;  %v15906_v20 = vld [vmem:[%s18406_s1 + $0x58] sm:$0xff]  ;;  %v39_v21 = vld [vmem:[%s18406_s1 + $0x30] sm:$0xff]  ;;  %v42_v22 = vld [vmem:[%s18406_s1 + $0x48] sm:$0xff] }
   0x5   :  { %v15918_v23 = vpack.c.bf16 %v960_v10, %v957_v7  ;;  %v15920_v24 = vpack.c.bf16 %v76_v12, %v72_v11  ;;  %v15922_v25 = vsub.f32 %v33_v8, %v72_v11  ;;  %v15924_v26 = vsub.f32 %v36_v9, %v76_v12  ;;  %v25_v27 = vld [vmem:[%s18407_s0] sm:$0xff]  ;;  %v26_v36 = vld [vmem:[%s18407_s0 + $0x8] sm:$0xff]  ;;  %v27_v41 = vld [vmem:[%s18407_s0 + $0x10] sm:$0xff] }
   0x6   :  { %14696 = vmatprep.subr.bf16.mxu0 %v15897_v16  ;;  %v82_v28 = vand.u32 4294901760, %v43_v14  ;;  %v15930_v29 = vsub.f32 %v40_v13, %v78_v19  ;;  %v963_v30 = vand.u32 4294901760, %v15895_v15  ;;  %v966_v31 = vand.u32 4294901760, %v15906_v20  ;;  %v28_v50 = vld [vmem:[%s18407_s0 + $0x18] sm:$0xff]  ;;  %v29_v51 = vld [vmem:[%s18407_s0 + $0x20] sm:$0xff]  ;;  %v30_v0 = vld [vmem:[%s18407_s0 + $0x28] sm:$0xff] }
   0x7   :  { %18531 = vst [vmem:[#allocation5_spill] sm:$0xff] %v15920_v24  ;;  %14744 = vmatprep.subr.bf16.mxu1 %v15918_v23  ;;  %14698 = vmatpush1.bf16.msra.mxu0 %v15920_v24  ;;  %v80_v32 = vand.u32 4294901760, %v39_v21  ;;  %v84_v33 = vand.u32 4294901760, %v42_v22  ;;  %v47_v34 = vsel %vm45_vm0, %v25_v27, 0  ;;  %v18418_v35 = vand.u32 4294901760, %v15899_v17  ;;  %v31_v27 = vld [vmem:[%s18407_s0 + $0x30] sm:$0xff] }
   0x8   :  { %14746 = vmatpush3.bf16.msra.mxu1 %v15918_v23  ;;  %v15942_v37 = vpack.c.bf16 %v82_v28, %v78_v19  ;;  %v15944_v38 = vsub.f32 %v43_v14, %v82_v28  ;;  %v15950_v39 = vpack.c.bf16 %v966_v31, %v963_v30  ;;  %v15952_v40 = vand.u32 4294901760, %v47_v34 }
   0x9   :  { %v15957_v42 = vpack.c.bf16 %v84_v33, %v80_v32  ;;  %v15959_v43 = vsub.f32 %v39_v21, %v80_v32  ;;  %v15961_v44 = vsub.f32 %v42_v22, %v84_v33  ;;  %v234_v45 = vsub.f32 %v15899_v17, %v18418_v35 }
   0xa   :  { %18532 = vst [vmem:[#allocation6_spill] sm:$0xff] %v15942_v37  ;;  %14700 = vmatprep.subr.bf16.mxu0 %v15942_v37  ;;  %14748 = vmatprep.subr.bf16.mxu1 %v15950_v39  ;;  %v15969_v46 = vsub.f32 %v47_v34, %v15952_v40  ;;  %v18417_v47 = vand.u32 4294901760, %v15901_v18  ;;  %v50_v48 = vsel %vm45_vm0, %v26_v36, 0  ;;  %v18416_v49 = vand.u32 4294901760, %v15922_v25 }
   0xb   :  { %18533 = vst [vmem:[#allocation7_spill] sm:$0xff] %v15957_v42  ;;  %14702 = vmatpush1.bf16.msra.mxu0 %v15957_v42  ;;  %v235_v52 = vand.u32 4294901760, %v234_v45  ;;  %v15981_v53 = vand.u32 4294901760, %v50_v48  ;;  %v18415_v54 = vand.u32 4294901760, %v15924_v26  ;;  %v53_v55 = vsel %vm45_vm0, %v27_v41, 0 }
   0xc   :  { %14750 = vmatpush3.bf16.msra.mxu1 %v15950_v39  ;;  %v15987_v56 = vand.u32 4294901760, %v15969_v46  ;;  %v246_v57 = vsub.f32 %v15901_v18, %v18417_v47  ;;  %v240_v58 = vsub.f32 %v15922_v25, %v18416_v49  ;;  %v15995_v59 = vand.u32 4294901760, %v53_v55 }
   0xd   :  { %v15998_v60 = vsub.f32 %v50_v48, %v15981_v53  ;;  %v252_v61 = vsub.f32 %v15924_v26, %v18415_v54  ;;  %v56_v62 = vsel %vm45_vm0, %v28_v50, 0  ;;  %v59_v63 = vsel %vm45_vm0, %v29_v51, 0  ;;  %v32_v50 = vld [vmem:[%s18407_s0 + $0x38] sm:$0xff] }
   0xe   :  { %v146_v1 = vsub.f32 %v15969_v46, %v15987_v56  ;;  %v247_v4 = vand.u32 4294901760, %v246_v57  ;;  %v241_v5 = vand.u32 4294901760, %v240_v58  ;;  %v16011_v8 = vsub.f32 %v53_v55, %v15995_v59 }
   0xf   :  { %v16014_v9 = vand.u32 4294901760, %v15998_v60  ;;  %v253_v11 = vand.u32 4294901760, %v252_v61  ;;  %v16016_v12 = vand.u32 4294901760, %v56_v62  ;;  %v16018_v13 = vand.u32 4294901760, %v59_v63 }
  0x10   :  { %v147_v14 = vand.u32 4294901760, %v146_v1  ;;  %v14703_v19 = vpack.c.bf16 %v247_v4, %v235_v52  ;;  %v16021_v21 = vand.u32 4294901760, %v16011_v8  ;;  %v62_v22 = vsel %vm45_vm0, %v30_v0, 0 }
  0x11   :  { %v157_v28 = vsub.f32 %v15998_v60, %v16014_v9  ;;  %v14705_v32 = vpack.c.bf16 %v253_v11, %v241_v5  ;;  %v16030_v33 = vsub.f32 %v56_v62, %v16016_v12  ;;  %v16033_v34 = vsub.f32 %v59_v63, %v16018_v13 }
  0x12   :  { %13485 = vmatprep.mubr.f32.mxu1 %v147_v14  ;;  %148 = vmatmul.mubr.f32.vlgmr.msra.gmra.mrb[0].mxu0 %v147_v14  ;;  %v168_v36 = vsub.f32 %v16011_v8, %v16021_v21  ;;  %v16037_v41 = vand.u32 4294901760, %v62_v22  ;;  %v16042_v45 = vsub.f32 %v15870_v2, %v957_v7  ;;  %v16047_v48 = vsub.f32 %v15876_v6, %v960_v10 }
  0x13   :  { %14704 = vmatprep.subr.bf16.mxu0 %v14703_v19  ;;  %v158_v51 = vand.u32 4294901760, %v157_v28  ;;  %153 = vmatprep.mubr.f32.mxu0 %v18419_v3  ;;  %v16054_v52 = vand.u32 4294901760, %v16030_v33  ;;  %v16057_v55 = vand.u32 4294901760, %v16033_v34  ;;  %v65_v2 = vsel %vm45_vm0, %v31_v27, 0 }
  0x14   :  { %14706 = vmatpush1.bf16.msra.mxu0 %v14705_v32  ;;  %v169_v7 = vand.u32 4294901760, %v168_v36  ;;  %v16061_v6 = vsub.f32 %v62_v22, %v16037_v41  ;;  %v18413_v10 = vand.u32 4294901760, %v16042_v45  ;;  %v18412_v57 = vand.u32 4294901760, %v16047_v48 }
  0x15   :  { %13486 = vmatmul.mubr.f32.vlgmr.msra.gmra.mrb[0].mxu1 %v158_v51  ;;  %v179_v58 = vsub.f32 %v16030_v33, %v16054_v52  ;;  %v190_v61 = vsub.f32 %v16033_v34, %v16057_v55  ;;  %v16069_v62 = vand.u32 4294901760, %v65_v2  ;;  %v68_v63 = vsel %vm45_vm0, %v32_v50, 0 }
  0x16   :  { %13488 = vmatprep.mubr.f32.mxu1 %v169_v7  ;;  %159 = vmatmul.mubr.f32.gmra.mrb[2].mxu0 %v158_v51  ;;  %v16073_v0 = vand.u32 4294901760, %v16061_v6  ;;  %v1109_v1 = vsub.f32 %v16042_v45, %v18413_v10  ;;  %v1116_v4 = vsub.f32 %v16047_v48, %v18412_v57  ;;  %v16081_v5 = vand.u32 4294901760, %v68_v63 }
  0x17   :  { %v180_v11 = vand.u32 4294901760, %v179_v58  ;;  %164 = vmatprep.mubr.f32.mxu0 %v18419_v3  ;;  %v191_v14 = vand.u32 4294901760, %v190_v61  ;;  %v16085_v19 = vsub.f32 %v65_v2, %v16069_v62  ;;  %v16090_v22 = vsub.f32 %v15895_v15, %v963_v30 }
  0x18   :  { %v201_v27 = vsub.f32 %v16061_v6, %v16073_v0  ;;  %v1110_v28 = vand.u32 4294901760, %v1109_v1  ;;  %v1117_v32 = vand.u32 4294901760, %v1116_v4  ;;  %v16095_v36 = vsub.f32 %v68_v63, %v16081_v5 }
  0x19   :  { %13489 = vmatmul.mubr.f32.gmra.mrb[2].mxu1 %v180_v11  ;;  %v16098_v50 = vand.u32 4294901760, %v16085_v19  ;;  %v18414_v51 = vand.u32 4294901760, %v16090_v22  ;;  %v16104_v2 = vsub.f32 %v15906_v20, %v966_v31  ;;  %v257_v15 = vand.u32 4294901760, %v15930_v29 }
  0x1a   :  { %13491 = vmatprep.mubr.f32.mxu1 %v191_v14  ;;  %170 = vmatmul.mubr.f32.gmra.mrb[4].mxu0 %v169_v7  ;;  %v202_v30 = vand.u32 4294901760, %v201_v27  ;;  %v14751_v58 = vpack.c.bf16 %v1117_v32, %v1110_v28  ;;  %v16108_v61 = vand.u32 4294901760, %v16095_v36  ;;  %v269_v63 = vand.u32 4294901760, %v15944_v38 }
  0x1b   :  { %175 = vmatprep.mubr.f32.mxu0 %v18419_v3  ;;  %v212_v1 = vsub.f32 %v16085_v19, %v16098_v50  ;;  %v1123_v20 = vsub.f32 %v16090_v22, %v18414_v51  ;;  %v1129_v31 = vand.u32 4294901760, %v16104_v2  ;;  %v258_v7 = vsub.f32 %v15930_v29, %v257_v15 }
  0x1c   :  { %18534 = vst [vmem:[#allocation8_spill] sm:$0xff] %v16108_v61  ;;  %14752 = vmatprep.subr.bf16.mxu1 %v14751_v58  ;;  %v223_v4 = vsub.f32 %v16095_v36, %v16108_v61  ;;  %v270_v27 = vsub.f32 %v15944_v38, %v269_v63  ;;  %v263_v28 = vand.u32 4294901760, %v15959_v43  ;;  %v275_v32 = vand.u32 4294901760, %v15961_v44 }
  0x1d   :  { %13492 = vmatmul.mubr.f32.gmra.mrb[4].mxu1 %v202_v30  ;;  %v213_v57 = vand.u32 4294901760, %v212_v1  ;;  %v1124_v10 = vand.u32 4294901760, %v1123_v20  ;;  %v1130_v51 = vsub.f32 %v16104_v2, %v1129_v31  ;;  %v259_v54 = vand.u32 4294901760, %v258_v7 }
  0x1e   :  { %14754 = vmatpush3.bf16.msra.mxu1 %v14751_v58  ;;  %181 = vmatmul.mubr.f32.gmra.mrb[6].mxu0 %v180_v11  ;;  %v224_v49 = vand.u32 4294901760, %v223_v4  ;;  %v271_v47 = vand.u32 4294901760, %v270_v27  ;;  %v264_v35 = vsub.f32 %v15959_v43, %v263_v28  ;;  %v276_v3 = vsub.f32 %v15961_v44, %v275_v32 }
  0x1f   :  { %13494 = vmatprep.mubr.f32.mxu1 %v213_v57  ;;  %v1131_v42 = vand.u32 4294901760, %v1130_v51  ;;  %v18535_v37 = vmov 0.0   ;;  %v14759_v7 = vpack.c.bf16 %v16047_v48, %v16042_v45  ;;  %v14711_v58 = vpack.c.bf16 %v15901_v18, %v15899_v17 }
  0x20   :  { %186 = vmatprep.mubr.f32.mxu0 %v18535_v37  ;;  %v14707_v24 = vpack.c.bf16 %v271_v47, %v259_v54  ;;  %v265_v1 = vand.u32 4294901760, %v264_v35  ;;  %v277_v20 = vand.u32 4294901760, %v276_v3  ;;  %v18536_v51 = vand.u32 4294901760, %v15899_v17 }
  0x21   :  { %13495 = vmatmul.mubr.f32.gmra.mrb[6].mxu1 %v224_v49  ;;  %v14755_v61 = vpack.c.bf16 %v1131_v42, %v1124_v10  ;;  %v18537_v47 = vand.u32 4294901760, %v15901_v18  ;;  %v14763_v3 = vpack.c.bf16 %v16104_v2, %v16090_v22  ;;  %v18538_v42 = vand.u32 4294901760, %v15922_v25  ;;  %v18544_v2 = vld [vmem:[#allocation5_spill] sm:$0xff] }
  0x22   :  { %13505 = vmatprep.mubr.f32.mxu1 %v15952_v40  ;;  %192 = vmatmul.mubr.f32.gmra.mrb[8].mxu0 %v191_v14  ;;  %v14709_v11 = vpack.c.bf16 %v277_v20, %v265_v1  ;;  %v16153_v17 = vpack.c.bf16 %v269_v63, %v257_v15  ;;  %v16155_v18 = vpack.c.bf16 %v275_v32, %v263_v28  ;;  %v18545_v15 = vld [vmem:[#allocation6_spill] sm:$0xff] }
  0x23   :  { %14756 = vmatprep.subr.bf16.mxu1 %v14755_v61  ;;  %14708 = vmatprep.subr.bf16.mxu0 %v14707_v24  ;;  %v16139_v35 = vpack.c.bf16 %v18537_v47, %v18536_v51  ;;  %v18539_v24 = vand.u32 4294901760, %v15924_v26  ;;  %v14713_v10 = vpack.c.bf16 %v15924_v26, %v15922_v25  ;;  %v18540_v25 = vand.u32 4294901760, %v16042_v45  ;;  %v1816_v45 = vld [vmem:[%s18406_s1 + $0x80] sm:$0xff] }
  0x24   :  { %14758 = vmatpush3.bf16.msra.mxu1 %v14755_v61  ;;  %14710 = vmatpush1.bf16.msra.mxu0 %v14709_v11  ;;  %v18541_v26 = vand.u32 4294901760, %v16047_v48  ;;  %v1826_v14 = vand.u32 4294901760, %v1816_v45 }
  0x25   :  { %197 = vmatprep.mubr.f32.mxu0 %v18535_v37  ;;  %14760 = vmatprep.subr.bf16.mxu1 %v14759_v7  ;;  %v16148_v54 = vpack.c.bf16 %v18539_v24, %v18538_v42 }
  0x26   :  { %203 = vmatmul.mubr.f32.gmra.mrb[10].mxu0 %v202_v30  ;;  %14712 = vmatprep.subr.bf16.mxu0 %v14711_v58  ;;  %v16229_v61 = vsub.f32 %v1816_v45, %v1826_v14 }
  0x27   :  { %13506 = vmatmul.mubr.f32.vlgmr.msra.gmra.mrb[0].mxu1 %v15981_v53  ;;  %208 = vmatprep.mubr.f32.mxu0 %v18535_v37 }
  0x28   :  { %13508 = vmatprep.mubr.f32.mxu1 %v15995_v59  ;;  %14762 = vmatpush3.bf16.msra.mxu1 %v14759_v7  ;;  %v1916_v4 = vand.u32 4294901760, %v16229_v61 }
  0x29   :  { %14764 = vmatprep.subr.bf16.mxu1 %v14763_v3 }
  0x2a   :  { %214 = vmatmul.mubr.f32.gmra.mrb[12].mxu0 %v213_v57  ;;  %v14715_v57 = vpack.c.bf16 %v15944_v38, %v15930_v29  ;;  %v14775_v29 = vpack.c.bf16 %v18541_v26, %v18540_v25  ;;  %v18542_v38 = vand.u32 4294901760, %v16090_v22  ;;  %v18543_v22 = vld [vmem:[#allocation8_spill] sm:$0xff] }
  0x2b   :  { %13509 = vmatmul.mubr.f32.gmra.mrb[2].mxu1 %v16016_v12  ;;  %219 = vmatprep.mubr.f32.mxu0 %v18535_v37 }
  0x2c   :  { %13511 = vmatprep.mubr.f32.mxu1 %v16018_v13  ;;  %14766 = vmatpush3.bf16.msra.mxu1 %v14763_v3 }
  0x2d   :  { %14768 = vmatprep.subr.bf16.mxu1 %v15918_v23 }
  0x2e   :  { %225 = vmatmul.mubr.f32.gmra.mrb[14].mxu0 %v224_v49  ;;  %v14717_v49 = vpack.c.bf16 %v15961_v44, %v15959_v43  ;;  %v14779_v43 = vpack.c.bf16 %v1129_v31, %v18542_v38  ;;  %v1813_v44 = vld [vmem:[%s18406_s1 + $0x68] sm:$0xff] }
  0x2f   :  { %13512 = vmatmul.mubr.f32.gmra.mrb[4].mxu1 %v16037_v41  ;;  %335 = vmatprep.mubr.f32.mxu0 %v18535_v37  ;;  %v1822_v48 = vand.u32 4294901760, %v1813_v44 }
  0x30   :  { %13514 = vmatprep.mubr.f32.mxu1 %v16069_v62 }
  0x31   :  { %v16227_v30 = vsub.f32 %v1813_v44, %v1822_v48  ;;  %v16238_v63 = vpack.c.bf16 %v1826_v14, %v1822_v48 }
  0x32   :  { %337 = vmatmul.mubr.f32.vlgmr.msra.gmra.mrb[0].mxu0 %v15952_v40 }
  0x33   :  { %13515 = vmatmul.mubr.f32.gmra.mrb[6].mxu1 %v16081_v5  ;;  %14714 = vmatpush1.bf16.msra.mxu0 %v14713_v10  ;;  %v1904_v31 = vand.u32 4294901760, %v16227_v30  ;;  %v14799_v25 = vpack.c.bf16 %v16229_v61, %v16227_v30 }
  0x34   :  { %13525 = vmatprep.mubr.f32.mxu1 %v15969_v46  ;;  %342 = vmatprep.mubr.f32.mxu0 %v18535_v37 }
  0x35   :  { %14716 = vmatprep.subr.bf16.mxu0 %v14715_v57  ;;  %v1905_v27 = vsub.f32 %v16227_v30, %v1904_v31 }
  0x36   :  { %344 = vmatmul.mubr.f32.gmra.mrb[2].mxu0 %v15981_v53 }
  0x37   :  { %13526 = vmatmul.mubr.f32.vlgmr.msra.gmra.mrb[0].mxu1 %v15998_v60  ;;  %349 = vmatprep.mubr.f32.mxu0 %v18535_v37  ;;  %v1906_v20 = vand.u32 4294901760, %v1905_v27  ;;  %v16463_v27 = vld [vmem:[%s18409_s2 + $0x90] sm:$0xff] }
  0x38   :  { %13528 = vmatprep.mubr.f32.mxu1 %v16011_v8  ;;  %14770 = vmatpush3.bf16.msra.mxu1 %v15918_v23 }
  0x39   :  { %14772 = vmatprep.subr.bf16.mxu1 %v15950_v39  ;;  %14718 = vmatpush1.bf16.msra.mxu0 %v14717_v49 }
  0x3a   :  { %351 = vmatmul.mubr.f32.gmra.mrb[4].mxu0 %v15995_v59  ;;  %14720 = vmatprep.subr.bf16.mxu0 %v15897_v16 }
  0x3b   :  { %13529 = vmatmul.mubr.f32.gmra.mrb[2].mxu1 %v16030_v33  ;;  %356 = vmatprep.mubr.f32.mxu0 %v18535_v37 }
  0x3c   :  { %13531 = vmatprep.mubr.f32.mxu1 %v16033_v34  ;;  %14774 = vmatpush3.bf16.msra.mxu1 %v15950_v39 }
  0x3d   :  { %14776 = vmatprep.subr.bf16.mxu1 %v14775_v29 }
  0x3e   :  { %358 = vmatmul.mubr.f32.gmra.mrb[6].mxu0 %v16016_v12 }
  0x3f   :  { %13532 = vmatmul.mubr.f32.gmra.mrb[4].mxu1 %v16061_v6  ;;  %363 = vmatprep.mubr.f32.mxu0 %v18535_v37 }
  0x40   :  { %13534 = vmatprep.mubr.f32.mxu1 %v16085_v19 }
  0x42   :  { %365 = vmatmul.mubr.f32.gmra.mrb[8].mxu0 %v16018_v13 }
  0x43   :  { %13535 = vmatmul.mubr.f32.gmra.mrb[6].mxu1 %v16095_v36  ;;  %370 = vmatprep.mubr.f32.mxu0 %v18535_v37 }
  0x44   :  { %13545 = vmatprep.mubr.f32.mxu1 %v15987_v56 }
  0x46   :  { %372 = vmatmul.mubr.f32.gmra.mrb[10].mxu0 %v16037_v41 }
  0x47   :  { %13546 = vmatmul.mubr.f32.vlgmr.msra.gmra.mrb[0].mxu1 %v16014_v9  ;;  %377 = vmatprep.mubr.f32.mxu0 %v18535_v37 }
  0x48   :  { %13548 = vmatprep.mubr.f32.mxu1 %v16021_v21  ;;  %14778 = vmatpush3.bf16.msra.mxu1 %v14775_v29 }
  0x49   :  { %14780 = vmatprep.subr.bf16.mxu1 %v14779_v43 }
  0x4a   :  { %379 = vmatmul.mubr.f32.gmra.mrb[12].mxu0 %v16069_v62 }
  0x4b   :  { %13549 = vmatmul.mubr.f32.gmra.mrb[2].mxu1 %v16054_v52  ;;  %384 = vmatprep.mubr.f32.mxu0 %v18535_v37 }
  0x4c   :  { %13551 = vmatprep.mubr.f32.mxu1 %v16057_v55  ;;  %14782 = vmatpush3.bf16.msra.mxu1 %v14779_v43 }
  0x4d   :  { %14784 = vmatprep.subr.bf16.mxu1 %v15918_v23 }
  0x4e   :  { %386 = vmatmul.mubr.f32.gmra.mrb[14].mxu0 %v16081_v5 }
  0x4f   :  { %13552 = vmatmul.mubr.f32.gmra.mrb[4].mxu1 %v16073_v0  ;;  %472 = vmatprep.mubr.f32.mxu0 %v18535_v37 }
  0x50   :  { %13554 = vmatprep.mubr.f32.mxu1 %v16098_v50 }
  0x52   :  { %475 = vmatmul.mubr.f32.vlgmr.msra.gmra.mrb[0].mxu0 %v15969_v46  ;;  %v18546_v46 = vld [vmem:[#allocation7_spill] sm:$0xff] }
  0x53   :  { %13555 = vmatmul.mubr.f32.gmra.mrb[6].mxu1 %v18543_v22  ;;  %14722 = vmatpush1.bf16.msra.mxu0 %v18544_v2 }
  0x54   :  { %13565 = vmatprep.mubr.f32.mxu1 %v15952_v40  ;;  %480 = vmatprep.mubr.f32.mxu0 %v18535_v37 }
  0x55   :  { %14724 = vmatprep.subr.bf16.mxu0 %v18545_v15 }
  0x56   :  { %483 = vmatmul.mubr.f32.gmra.mrb[2].mxu0 %v15998_v60  ;;  %v1815_v60 = vld [vmem:[%s18406_s1 + $0x78] sm:$0xff] }
  0x57   :  { %13566 = vmatmul.mubr.f32.vlgmr.msra.gmra.mrb[0].mxu1 %v15981_v53  ;;  %488 = vmatprep.mubr.f32.mxu0 %v18535_v37  ;;  %v1828_v32 = vand.u32 4294901760, %v1815_v60 }
  0x58   :  { %13568 = vmatprep.mubr.f32.mxu1 %v15995_v59  ;;  %14786 = vmatpush3.bf16.msra.mxu1 %v15918_v23  ;;  %v1812_v23 = vld [vmem:[%s18406_s1 + $0x60] sm:$0xff] }
  0x59   :  { %14788 = vmatprep.subr.bf16.mxu1 %v15950_v39  ;;  %14726 = vmatpush1.bf16.msra.mxu0 %v18546_v46  ;;  %v1824_v28 = vand.u32 4294901760, %v1812_v23  ;;  %v16279_v51 = vsub.f32 %v1815_v60, %v1828_v32 }
  0x5a   :  { %491 = vmatmul.mubr.f32.gmra.mrb[4].mxu0 %v16011_v8  ;;  %14728 = vmatprep.subr.bf16.mxu0 %v16139_v35  ;;  %v1811_v8 = vld [vmem:[%s18408_s3] sm:$0xff] }
  0x5b   :  { %13569 = vmatmul.mubr.f32.gmra.mrb[2].mxu1 %v16016_v12  ;;  %496 = vmatprep.mubr.f32.mxu0 %v18535_v37  ;;  %v1820_v1 = vsel %vm1818_vm1, %v1811_v8, 0  ;;  %v16277_v58 = vsub.f32 %v1812_v23, %v1824_v28  ;;  %v1922_v3 = vand.u32 4294901760, %v16279_v51 }
  0x5c   :  { %13571 = vmatprep.mubr.f32.mxu1 %v16018_v13  ;;  %14790 = vmatpush3.bf16.msra.mxu1 %v15950_v39  ;;  %v1917_v39 = vsub.f32 %v16229_v61, %v1916_v4  ;;  %v16272_v11 = vand.u32 4294901760, %v1820_v1 }
  0x5d   :  { %14792 = vmatprep.subr.bf16.mxu1 %v16238_v63  ;;  %v1910_v35 = vand.u32 4294901760, %v16277_v58  ;;  %v1923_v24 = vsub.f32 %v16279_v51, %v1922_v3 }
  0x5e   :  { %499 = vmatmul.mubr.f32.gmra.mrb[6].mxu0 %v16030_v33  ;;  %v1918_v7 = vand.u32 4294901760, %v1917_v39  ;;  %v16275_v33 = vpack.c.bf16 %v1828_v32, %v1824_v28  ;;  %v2808_v39 = vld [vmem:[%s18409_s2 + $0x98] sm:$0xff]  ;;  %v2876_v28 = vand.u32 4294901760, %v16463_v27 }
  0x5f   :  { %13572 = vmatmul.mubr.f32.gmra.mrb[4].mxu1 %v16037_v41  ;;  %504 = vmatprep.mubr.f32.mxu0 %v18535_v37  ;;  %v1911_v42 = vsub.f32 %v16277_v58, %v1910_v35  ;;  %v1924_v57 = vand.u32 4294901760, %v1923_v24  ;;  %v2879_v32 = vand.u32 4294901760, %v2808_v39  ;;  %v16509_v24 = vld [vmem:[%s18409_s2 + $0xa8] sm:$0xff] }
  0x60   :  { %13574 = vmatprep.mubr.f32.mxu1 %v16069_v62  ;;  %v14795_v47 = vpack.c.bf16 %v1918_v7, %v1906_v20  ;;  %v16477_v20 = vld [vmem:[%s18409_s2 + $0x18] sm:$0xff] }
  0x61   :  { %v1912_v10 = vand.u32 4294901760, %v1911_v42  ;;  %v16504_v42 = vld [vmem:[%s18409_s2 + $0xa0] sm:$0xff] }
  0x62   :  { %507 = vmatmul.mubr.f32.gmra.mrb[8].mxu0 %v16033_v34  ;;  %v16285_v34 = vsub.f32 %v1820_v1, %v16272_v11  ;;  %v16472_v1 = vld [vmem:[%s18409_s2 + $0x10] sm:$0xff] }
  0x63   :  { %13575 = vmatmul.mubr.f32.gmra.mrb[6].mxu1 %v16081_v5  ;;  %512 = vmatprep.mubr.f32.mxu0 %v18535_v37 }
  0x64   :  { %13585 = vmatprep.mubr.f32.mxu1 %v15952_v40 }
  0x66   :  { %515 = vmatmul.mubr.f32.gmra.mrb[10].mxu0 %v16061_v6  ;;  %v16295_v6 = vand.u32 4294901760, %v16285_v34 }
  0x67   :  { %13586 = vmatmul.mubr.f32.vlgmr.msra.gmra.mrb[0].mxu1 %v15981_v53  ;;  %520 = vmatprep.mubr.f32.mxu0 %v18535_v37 }
  0x68   :  { %13588 = vmatprep.mubr.f32.mxu1 %v15995_v59  ;;  %14794 = vmatpush1.bf16.msra.mxu1 %v16275_v33 }
  0x69   :  { %14796 = vmatprep.subr.bf16.mxu1 %v14795_v47  ;;  %v16485_v47 = vsub.f32 %v16463_v27, %v2876_v28 }
  0x6a   :  { %523 = vmatmul.mubr.f32.gmra.mrb[12].mxu0 %v16085_v19  ;;  %v1894_v19 = vsub.f32 %v16285_v34, %v16295_v6 }
  0x6b   :  { %13589 = vmatmul.mubr.f32.gmra.mrb[2].mxu1 %v16016_v12  ;;  %528 = vmatprep.mubr.f32.mxu0 %v18535_v37 }
  0x6c   :  { %13591 = vmatprep.mubr.f32.mxu1 %v16018_v13  ;;  %v16308_v49 = vand.u32 4294901760, %v1894_v19  ;;  %v18448_v19 = vand.u32 4294901760, %v16485_v47 }
  0x6e   :  { %531 = vmatmul.mubr.f32.gmra.mrb[14].mxu0 %v16095_v36  ;;  %v14797_v36 = vpack.c.bf16 %v1924_v57, %v1912_v10  ;;  %v2882_v57 = vand.u32 4294901760, %v16504_v42 }
  0x6f   :  { %13592 = vmatmul.mubr.f32.gmra.mrb[4].mxu1 %v16037_v41  ;;  %609 = vmatprep.mubr.f32.mxu0 %v18535_v37 }
  0x70   :  { %13594 = vmatprep.mubr.f32.mxu1 %v16069_v62 }
  0x72   :  { %613 = vmatmul.mubr.f32.vlgmr.msra.gmra.mrb[0].mxu0 %v15987_v56  ;;  %v14801_v56 = vpack.c.bf16 %v16279_v51, %v16277_v58  ;;  %v2828_v58 = vand.u32 4294901760, %v16472_v1  ;;  %v2831_v51 = vand.u32 4294901760, %v16477_v20 }
  0x73   :  { %13595 = vmatmul.mubr.f32.gmra.mrb[6].mxu1 %v16081_v5  ;;  %14730 = vmatpush1.bf16.msra.mxu0 %v16148_v54 }
  0x74   :  { %1890 = vmatprep.mubr.f32.mxu1 %v18535_v37  ;;  %618 = vmatprep.mubr.f32.mxu0 %v18535_v37 }
  0x75   :  { %14732 = vmatprep.subr.bf16.mxu0 %v16153_v17 }
  0x76   :  { %622 = vmatmul.mubr.f32.gmra.mrb[2].mxu0 %v16014_v9  ;;  %v14809_v9 = vpack.c.bf16 %v1922_v3, %v1910_v35  ;;  %v16496_v3 = vsub.f32 %v16472_v1, %v2828_v58 }
  0x77   :  { %1896 = vmatmul.mubr.f32.vlgmr.msra.gmra.mrb[8].mxu1 %v16308_v49  ;;  %627 = vmatprep.mubr.f32.mxu0 %v18535_v37 }
  0x78   :  { %14798 = vmatpush1.bf16.msra.mxu1 %v14797_v36  ;;  %1986 = vmatprep.mubr.f32.mxu1 %v18535_v37  ;;  %v16518_v36 = vld [vmem:[%s18409_s2 + $0x20] sm:$0xff] }
  0x79   :  { %14800 = vmatprep.subr.bf16.mxu1 %v14799_v25  ;;  %14734 = vmatpush1.bf16.msra.mxu0 %v16155_v18 }
  0x7a   :  { %631 = vmatmul.mubr.f32.gmra.mrb[4].mxu0 %v16021_v21  ;;  %14736 = vmatprep.subr.bf16.mxu0 %v15897_v16  ;;  %v14807_v16 = vpack.c.bf16 %v1916_v4, %v1904_v31  ;;  %v16396_v21 = vld [vmem:[%s18409_s2 + $0x80] sm:$0xff]  ;;  %v2790_v31 = vld [vmem:[%s18409_s2 + $0x8] sm:$0xff] }
  0x7b   :  { %636 = vmatprep.mubr.f32.mxu0 %v18535_v37  ;;  %v2825_v23 = vand.u32 4294901760, %v2790_v31 }
  0x7d   :  { %v16458_v8 = vsub.f32 %v2790_v31, %v2825_v23  ;;  %v16569_v31 = vld [vmem:[%s18409_s2 + $0xb8] sm:$0xff] }
  0x7e   :  { %640 = vmatmul.mubr.f32.gmra.mrb[6].mxu0 %v16054_v52  ;;  %v2870_v52 = vand.u32 4294901760, %v16396_v21 }
  0x7f   :  { %1988 = vmatmul.mubr.f32.vlgmr.msra.gmra.mrb[8].mxu1 %v16272_v11  ;;  %645 = vmatprep.mubr.f32.mxu0 %v18535_v37 }
  0x80   :  { %14802 = vmatpush1.bf16.msra.mxu1 %v14801_v56  ;;  %2066 = vmatprep.mubr.f32.mxu1 %v18535_v37  ;;  %v16411_v54 = vsub.f32 %v16396_v21, %v2870_v52 }
  0x81   :  { %14804 = vmatprep.subr.bf16.mxu1 %v16238_v63 }
  0x82   :  { %649 = vmatmul.mubr.f32.gmra.mrb[8].mxu0 %v16057_v55  ;;  %18547 = vst [vmem:[#allocation8_spill] sm:$0xff] %v16411_v54  ;;  %v18452_v29 = vand.u32 4294901760, %v16411_v54 }
  0x83   :  { %654 = vmatprep.mubr.f32.mxu0 %v18535_v37 }
  0x84   :  { %v3154_v44 = vsub.f32 %v16411_v54, %v18452_v29 }
  0x86   :  { %658 = vmatmul.mubr.f32.gmra.mrb[10].mxu0 %v16073_v0 }
  0x87   :  { %2069 = vmatmul.mubr.f32.vlgmr.msra.gmra.mrb[8].mxu1 %v16285_v34  ;;  %663 = vmatprep.mubr.f32.mxu0 %v18535_v37 }
  0x88   :  { %14806 = vmatpush1.bf16.msra.mxu1 %v16275_v33  ;;  %2143 = vmatprep.mubr.f32.mxu1 %v18535_v37 }
  0x89   :  { %14808 = vmatprep.subr.bf16.mxu1 %v14807_v16  ;;  %v18444_v16 = vand.u32 4294901760, %v16496_v3 }
  0x8a   :  { %667 = vmatmul.mubr.f32.gmra.mrb[12].mxu0 %v16098_v50 }
  0x8b   :  { %672 = vmatprep.mubr.f32.mxu0 %v18535_v37 }
  0x8e   :  { %676 = vmatmul.mubr.f32.gmra.mrb[14].mxu0 %v18543_v22  ;;  %v3155_v22 = vand.u32 4294901760, %v3154_v44 }
  0x8f   :  { %2147 = vmatmul.mubr.f32.vlgmr.msra.gmra.mrb[8].mxu1 %v16295_v6  ;;  %770 = vmatprep.mubr.f32.mxu0 %v18535_v37 }
  0x90   :  { %14810 = vmatpush1.bf16.msra.mxu1 %v14809_v9  ;;  %2229 = vmatprep.mubr.f32.mxu1 %v18535_v37 }
  0x91   :  { %14812 = vmatprep.subr.bf16.mxu1 %v16238_v63  ;;  %v16446_v63 = vld [vmem:[%s18409_s2] sm:$0xff] }
  0x92   :  { %772 = vmatmul.mubr.f32.vlgmr.msra.gmra.mrb[0].mxu0 %v15952_v40  ;;  %v2822_v4 = vand.u32 4294901760, %v16446_v63 }
  0x93   :  { %14738 = vmatpush1.bf16.msra.mxu0 %v18544_v2  ;;  %777 = vmatprep.mubr.f32.mxu0 %v18535_v37 }
  0x94   :  { %14740 = vmatprep.subr.bf16.mxu0 %v18545_v15  ;;  %v16456_v60 = vsub.f32 %v16446_v63, %v2822_v4 }
  0x96   :  { %779 = vmatmul.mubr.f32.gmra.mrb[2].mxu0 %v15981_v53  ;;  %v18450_v7 = vand.u32 4294901760, %v16456_v60 }
  0x97   :  { %2231 = vmatmul.mubr.f32.vlgmr.msra.gmra.mrb[8].mxu1 %v16272_v11  ;;  %784 = vmatprep.mubr.f32.mxu0 %v18535_v37 }
  0x98   :  { %14814 = vmatpush1.bf16.msra.mxu1 %v16275_v33  ;;  %2305 = vmatprep.mubr.f32.mxu1 %v18535_v37  ;;  %v18449_v33 = vand.u32 4294901760, %v16458_v8  ;;  %v3042_v35 = vsub.f32 %v16456_v60, %v18450_v7 }
  0x99   :  { %14742 = vmatpush1.bf16.msra.mxu0 %v18546_v46 }
  0x9a   :  { %786 = vmatmul.mubr.f32.gmra.mrb[4].mxu0 %v15995_v59  ;;  %v3043_v25 = vand.u32 4294901760, %v3042_v35 }
  0x9b   :  { %791 = vmatprep.mubr.f32.mxu0 %v18535_v37 }
  0x9e   :  { %793 = vmatmul.mubr.f32.gmra.mrb[6].mxu0 %v16016_v12 }
  0x9f   :  { %2307 = vmatmul.mubr.f32.vlgmr.msra.gmra.mrb[8].mxu1 %v16272_v11  ;;  %798 = vmatprep.mubr.f32.mxu0 %v18535_v37 }
  0xa0   :  { %13601 = vmatprep.mubr.msk.f32.mxu1 %vm15826_vm2, %v18535_v37 }
  0xa2   :  { %800 = vmatmul.mubr.f32.gmra.mrb[8].mxu0 %v16018_v13 }
  0xa3   :  { %805 = vmatprep.mubr.f32.mxu0 %v18535_v37 }
  0xa6   :  { %807 = vmatmul.mubr.f32.gmra.mrb[10].mxu0 %v16037_v41 }
  0xa7   :  { %812 = vmatprep.mubr.f32.mxu0 %v18535_v37 }
  0xaa   :  { %814 = vmatmul.mubr.f32.gmra.mrb[12].mxu0 %v16069_v62 }
  0xab   :  { %819 = vmatprep.mubr.f32.mxu0 %v18535_v37 }
  0xae   :  { %821 = vmatmul.mubr.f32.gmra.mrb[14].mxu0 %v16081_v5 }
  0xaf   :  { %899 = vmatprep.mubr.f32.mxu0 %v18535_v37 }
  0xb2   :  { %901 = vmatmul.mubr.f32.vlgmr.msra.gmra.mrb[0].mxu0 %v15952_v40  ;;  %v1814_v40 = vld [vmem:[%s18406_s1 + $0x70] sm:$0xff] }
  0xb3   :  { %906 = vmatprep.mubr.f32.mxu0 %v18535_v37 }
  0xb6   :  { %908 = vmatmul.mubr.f32.gmra.mrb[2].mxu0 %v15981_v53  ;;  %v1817_v53 = vld [vmem:[%s18406_s1 + $0x88] sm:$0xff] }
  0xb7   :  { %913 = vmatprep.mubr.f32.mxu0 %v18535_v37 }
  0xba   :  { %915 = vmatmul.mubr.f32.gmra.mrb[4].mxu0 %v15995_v59  ;;  %v18429_v59 = vmov 0.0|0.0  }
  0xbb   :  { %920 = vmatprep.mubr.f32.mxu0 %v18535_v37  ;;  %14815 = vmatprep.subr.bf16.mxu1 %v18429_v59 }
  0xbe   :  { %922 = vmatmul.mubr.f32.gmra.mrb[6].mxu0 %v16016_v12  ;;  %v2314_v12 = vand.u32 4294901760, %v1814_v40 }
  0xbf   :  { %927 = vmatprep.mubr.f32.mxu0 %v18535_v37 }
  0xc0   :  { %v2392_v0 = vsub.f32 %v1814_v40, %v2314_v12  ;;  %v3168_v40 = vsub.f32 %v16485_v47, %v18448_v19 }
  0xc2   :  { %929 = vmatmul.mubr.f32.gmra.mrb[8].mxu0 %v16018_v13  ;;  %v2317_v13 = vand.u32 4294901760, %v1817_v53  ;;  %v2393_v18 = vand.u32 4294901760, %v2392_v0 }
  0xc3   :  { %934 = vmatprep.mubr.f32.mxu0 %v18535_v37 }
  0xc4   :  { %v2399_v50 = vsub.f32 %v1817_v53, %v2317_v13 }
  0xc6   :  { %936 = vmatmul.mubr.f32.gmra.mrb[10].mxu0 %v16037_v41  ;;  %v16401_v41 = vld [vmem:[%s18409_s2 + $0x88] sm:$0xff]  ;;  %v2400_v26 = vand.u32 4294901760, %v2399_v50  ;;  %v14822_v61 = vpack.c.bf16 %v2399_v50, %v2392_v0 }
  0xc7   :  { %941 = vmatprep.mubr.f32.mxu0 %v18535_v37  ;;  %v2873_v55 = vand.u32 4294901760, %v16401_v41 }
  0xc8   :  { %v2401_v43 = vsub.f32 %v2399_v50, %v2400_v26  ;;  %v14828_v46 = vpack.c.bf16 %v2400_v26, %v2393_v18  ;;  %v3056_v50 = vsub.f32 %v16496_v3, %v18444_v16  ;;  %v2834_v26 = vand.u32 4294901760, %v16518_v36 }
  0xc9   :  { %v16416_v17 = vsub.f32 %v16401_v41, %v2873_v55 }
  0xca   :  { %943 = vmatmul.mubr.f32.gmra.mrb[12].mxu0 %v16069_v62  ;;  %v14816_v62 = vpack.c.bf16 %v2317_v13, %v2314_v12  ;;  %v2402_v14 = vand.u32 4294901760, %v2401_v43  ;;  %v16529_v12 = vsub.f32 %v16504_v42, %v2882_v57  ;;  %v2891_v42 = vand.u32 4294901760, %v16569_v31 }
  0xcb   :  { %948 = vmatprep.mubr.f32.mxu0 %v18535_v37  ;;  %18548 = vst [vmem:[#allocation5_spill] sm:$0xff] %v16416_v17  ;;  %v18451_v38 = vand.u32 4294901760, %v16416_v17 }
  0xcc   :  { %14817 = vmatpush3.bf16.msra.mxu1 %v14816_v62  ;;  %v18441_v44 = vand.u32 4294901760, %v16529_v12 }
  0xcd   :  { %14818 = vmatprep.subr.bf16.mxu1 %v18429_v59  ;;  %v3161_v45 = vsub.f32 %v16416_v17, %v18451_v38 }
  0xce   :  { %950 = vmatmul.mubr.f32.gmra.mrb[14].mxu0 %v16081_v5  ;;  %v2394_v5 = vsub.f32 %v2392_v0, %v2393_v18 }
  0xcf   :  { %13602 = vmatmul.mubr.f32.vlgmr.msra.gmra.mrb[10].mxu1 %v16308_v49  ;;  %v3162_v2 = vand.u32 4294901760, %v3161_v45  ;;  %v2885_v49 = vand.u32 4294901760, %v16509_v24 }
  0xd0   :  { %v2395_v48 = vand.u32 4294901760, %v2394_v5  ;;  %13608 = vmatprep.mubr.msk.f32.mxu1 %vm15826_vm2, %v18535_v37  ;;  %v3169_v5 = vand.u32 4294901760, %v3168_v40 }
  0xd1   :  { %v14865_v30 = vpack.c.bf16 %v3162_v2, %v3155_v22  ;;  %v16532_v13 = vsub.f32 %v16509_v24, %v2885_v49  ;;  %v16547_v2 = vsub.f32 %v16518_v36, %v2834_v26  ;;  %v16596_v24 = vpack.c.bf16 %v2831_v51, %v2828_v58  ;;  %v16612_v58 = vld [vmem:[%s18409_s2 + $0xc8] sm:$0xff] }
  0xd2   :  { %v14819_v15 = vpack.c.bf16 %v2402_v14, %v2395_v48  ;;  %v3057_v48 = vand.u32 4294901760, %v3056_v50 }
  0xd3   :  { %14866 = vmatprep.subr.bf16.mxu0 %v14865_v30  ;;  %v18440_v45 = vand.u32 4294901760, %v16532_v13  ;;  %v18439_v21 = vand.u32 4294901760, %v16547_v2 }
  0xd4   :  { %14820 = vmatpush3.bf16.msra.mxu1 %v14819_v15  ;;  %v16552_v15 = vld [vmem:[%s18409_s2 + $0xb0] sm:$0xff] }
  0xd5   :  { %14821 = vmatprep.subr.bf16.mxu1 %v18429_v59  ;;  %v3189_v63 = vsub.f32 %v16532_v13, %v18440_v45  ;;  %v3070_v35 = vsub.f32 %v16547_v2, %v18439_v21 }
  0xd7   :  { %13609 = vmatmul.mubr.f32.vlgmr.msra.gmra.mrb[12].mxu1 %v16272_v11 }
  0xd8   :  { %14823 = vmatpush3.bf16.msra.mxu1 %v14822_v61  ;;  %13615 = vmatprep.mubr.msk.f32.mxu1 %vm15826_vm2, %v18535_v37  ;;  %v16558_v61 = vpack.c.bf16 %v2873_v55, %v2870_v52  ;;  %v16579_v52 = vld [vmem:[%s18409_s2 + $0x30] sm:$0xff]  ;;  %v16584_v55 = vld [vmem:[%s18409_s2 + $0x38] sm:$0xff] }
  0xd9   :  { %14824 = vmatprep.subr.bf16.mxu1 %v18429_v59 }
  0xdb   :  { %13616 = vmatmul.mubr.f32.vlgmr.msra.gmra.mrb[14].mxu1 %v16285_v34  ;;  %v16487_v34 = vsub.f32 %v2808_v39, %v2879_v32  ;;  %v16571_v39 = vpack.c.bf16 %v2825_v23, %v2822_v4  ;;  %v3190_v4 = vand.u32 4294901760, %v3189_v63  ;;  %v16587_v23 = vpack.c.bf16 %v2879_v32, %v2876_v28  ;;  %v16601_v28 = vld [vmem:[%s18409_s2 + $0xc0] sm:$0xff] }
  0xdc   :  { %14826 = vmatpush3.bf16.msra.mxu1 %v14816_v62  ;;  %13622 = vmatprep.mubr.msk.f32.mxu1 %vm15826_vm2, %v18535_v37 }
  0xdd   :  { %14827 = vmatprep.subr.bf16.mxu1 %v18429_v59  ;;  %v18445_v10 = vand.u32 4294901760, %v16487_v34  ;;  %18549 = vst [vmem:[#allocation6_spill] sm:$0xff] %v16587_v23 }
  0xdf   :  { %13623 = vmatmul.mubr.f32.vlgmr.msra.gmra.mrb[16].mxu1 %v16295_v6  ;;  %v16499_v6 = vsub.f32 %v16477_v20, %v2831_v51  ;;  %v3175_v53 = vsub.f32 %v16487_v34, %v18445_v10  ;;  %v2888_v20 = vand.u32 4294901760, %v16552_v15  ;;  %v3071_v51 = vand.u32 4294901760, %v3070_v35 }
  0xe0   :  { %14829 = vmatpush3.bf16.msra.mxu1 %v14828_v46  ;;  %13629 = vmatprep.mubr.msk.f32.mxu1 %vm15826_vm2, %v18535_v37  ;;  %v3182_v46 = vsub.f32 %v16529_v12, %v18441_v44 }
  0xe1   :  { %14830 = vmatprep.subr.bf16.mxu1 %v18429_v59  ;;  %v18442_v9 = vand.u32 4294901760, %v16499_v6  ;;  %v3176_v43 = vand.u32 4294901760, %v3175_v53  ;;  %v16605_v36 = vsub.f32 %v16552_v15, %v2888_v20  ;;  %v16618_v53 = vsub.f32 %v16569_v31, %v2891_v42  ;;  %v16652_v31 = vld [vmem:[%s18409_s2 + $0x48] sm:$0xff] }
  0xe2   :  { %v3183_v1 = vand.u32 4294901760, %v3182_v46  ;;  %v16689_v59 = vpack.c.bf16 %v2891_v42, %v2888_v20  ;;  %v16706_v20 = vld [vmem:[%s18409_s2 + $0x58] sm:$0xff] }
  0xe3   :  { %13630 = vmatmul.mubr.f32.vlgmr.msra.gmra.mrb[18].mxu1 %v16272_v11  ;;  %v3063_v18 = vsub.f32 %v16499_v6, %v18442_v9  ;;  %v14869_v30 = vpack.c.bf16 %v3176_v43, %v3169_v5  ;;  %v2894_v5 = vand.u32 4294901760, %v16601_v28  ;;  %v16633_v43 = vld [vmem:[%s18409_s2 + $0x40] sm:$0xff] }
  0xe4   :  { %14832 = vmatpush3.bf16.msra.mxu1 %v14816_v62  ;;  %13636 = vmatprep.mubr.msk.f32.mxu1 %vm15826_vm2, %v18535_v37  ;;  %v2794_v62 = vld [vmem:[%s18409_s2 + $0x28] sm:$0xff]  ;;  %v14873_v32 = vpack.c.bf16 %v3190_v4, %v3183_v1  ;;  %18552 = vst [vmem:[#allocation10_spill] sm:$0xff] %v16689_v59 }
  0xe5   :  { %v3064_v14 = vand.u32 4294901760, %v3063_v18  ;;  %v2837_v22 = vand.u32 4294901760, %v2794_v62  ;;  %14834 = vmatprep.subr.bf16.mxu1 %v16558_v61  ;;  %v16647_v63 = vsub.f32 %v16601_v28, %v2894_v5 }
  0xe7   :  { %13637 = vmatmul.mubr.f32.vlgmr.msra.gmra.mrb[20].mxu1 %v16272_v11  ;;  %v3049_v11 = vsub.f32 %v16458_v8, %v18449_v33  ;;  %v14871_v27 = vpack.c.bf16 %v3064_v14, %v3057_v48  ;;  %v16574_v41 = vsub.f32 %v2794_v62, %v2837_v22  ;;  %v16620_v62 = vpack.c.bf16 %v2885_v49, %v2882_v57 }
  0xe8   :  { %14836 = vmatpush3.bf16.msra.mxu1 %v16571_v39  ;;  %v18433_v57 = vand.u32 4294901760, %v16618_v53  ;;  %v2897_v49 = vand.u32 4294901760, %v16612_v58  ;;  %v16638_v14 = vpack.c.bf16 %v2837_v22, %v2834_v26  ;;  %v18436_v35 = vand.u32 4294901760, %v16647_v63 }
  0xe9   :  { %v3050_v56 = vand.u32 4294901760, %v3049_v11  ;;  %v18437_v11 = vand.u32 4294901760, %v16574_v41  ;;  %14838 = vmatprep.subr.bf16.mxu1 %v16587_v23  ;;  %18550 = vst [vmem:[#allocation7_spill] sm:$0xff] %v16620_v62 }
  0xea   :  { %18551 = vst [vmem:[#allocation9_spill] sm:$0xff] %v16638_v14  ;;  %v3203_v22 = vsub.f32 %v16618_v53, %v18433_v57 }
  0xeb   :  { %v14867_v0 = vpack.c.bf16 %v3050_v56, %v3043_v25  ;;  %v2840_v25 = vand.u32 4294901760, %v16579_v52  ;;  %v2843_v56 = vand.u32 4294901760, %v16584_v55  ;;  %v3077_v40 = vsub.f32 %v16574_v41, %v18437_v11 }
  0xec   :  { %14840 = vmatpush3.bf16.msra.mxu1 %v16596_v24  ;;  %v3204_v28 = vand.u32 4294901760, %v3203_v22  ;;  %v3210_v22 = vsub.f32 %v16647_v63, %v18436_v35 }
  0xed   :  { %14868 = vmatpush3.bf16.msra.mxu0 %v14867_v0  ;;  %v18434_v0 = vand.u32 4294901760, %v16605_v36  ;;  %v16624_v50 = vsub.f32 %v16579_v52, %v2840_v25  ;;  %v16627_v18 = vsub.f32 %v16584_v55, %v2843_v56  ;;  %v3078_v48 = vand.u32 4294901760, %v3077_v40  ;;  %14842 = vmatprep.subr.bf16.mxu1 %v16620_v62  ;;  %v16679_v40 = vld [vmem:[%s18409_s2 + $0xd0] sm:$0xff] }
  0xee   :  { %14870 = vmatprep.subr.bf16.mxu0 %v14869_v30  ;;  %v2846_v52 = vand.u32 4294901760, %v16633_v43  ;;  %v16715_v11 = vpack.c.bf16 %v2843_v56, %v2840_v25  ;;  %v16733_v25 = vld [vmem:[%s18409_s2 + $0xe8] sm:$0xff]  ;;  %v16738_v56 = vld [vmem:[%s18409_s2 + $0x60] sm:$0xff] }
  0xef   :  { %v3196_v15 = vsub.f32 %v16605_v36, %v18434_v0  ;;  %v18432_v30 = vand.u32 4294901760, %v16624_v50  ;;  %v18431_v46 = vand.u32 4294901760, %v16627_v18  ;;  %v14875_v26 = vpack.c.bf16 %v3078_v48, %v3071_v51  ;;  %v16684_v48 = vld [vmem:[%s18409_s2 + $0xd8] sm:$0xff] }
  0xf0   :  { %14844 = vmatpush3.bf16.msra.mxu1 %v16638_v14  ;;  %v16674_v51 = vsub.f32 %v16633_v43, %v2846_v52  ;;  %18553 = vst [vmem:[#allocation11_spill] sm:$0xff] %v16715_v11 }
  0xf1   :  { %14872 = vmatpush3.bf16.msra.mxu0 %v14871_v27  ;;  %v16658_v27 = vsub.f32 %v16612_v58, %v2897_v49  ;;  %v3197_v55 = vand.u32 4294901760, %v3196_v15  ;;  %v3084_v1 = vsub.f32 %v16624_v50, %v18432_v30  ;;  %v3091_v4 = vsub.f32 %v16627_v18, %v18431_v46  ;;  %14846 = vmatprep.subr.bf16.mxu1 %v16689_v59 }
  0xf2   :  { %14874 = vmatprep.subr.bf16.mxu0 %v14873_v32  ;;  %v2849_v58 = vand.u32 4294901760, %v16652_v31  ;;  %v18438_v57 = vand.u32 4294901760, %v16674_v51 }
  0xf3   :  { %v18435_v32 = vand.u32 4294901760, %v16658_v27  ;;  %v3085_v15 = vand.u32 4294901760, %v3084_v1  ;;  %v14877_v46 = vpack.c.bf16 %v3204_v28, %v3197_v55  ;;  %v16701_v1 = vld [vmem:[%s18409_s2 + $0x50] sm:$0xff]  ;;  %v3211_v55 = vand.u32 4294901760, %v3210_v22 }
  0xf4   :  { %v16696_v0 = vsub.f32 %v16652_v31, %v2849_v58  ;;  %v2903_v28 = vand.u32 4294901760, %v16684_v48  ;;  %v2852_v22 = vand.u32 4294901760, %v16701_v1  ;;  %14848 = vmatpush3.bf16.msra.mxu1 %v16715_v11 }
  0xf5   :  { %14876 = vmatpush3.bf16.msra.mxu0 %v14875_v26  ;;  %v3092_v26 = vand.u32 4294901760, %v3091_v4  ;;  %v3217_v30 = vsub.f32 %v16658_v27, %v18435_v32  ;;  %v2900_v4 = vand.u32 4294901760, %v16679_v40  ;;  %v3098_v32 = vsub.f32 %v16674_v51, %v18438_v57 }
  0xf6   :  { %14878 = vmatprep.subr.bf16.mxu0 %v14877_v46  ;;  %v18443_v35 = vand.u32 4294901760, %v16696_v0  ;;  %v2855_v46 = vand.u32 4294901760, %v16706_v20  ;;  %v16744_v57 = vpack.c.bf16 %v2897_v49, %v2894_v5  ;;  %v16749_v44 = vsub.f32 %v16701_v1, %v2852_v22 }
  0xf7   :  { %v14879_v42 = vpack.c.bf16 %v3092_v26, %v3085_v15  ;;  %v3218_v31 = vand.u32 4294901760, %v3217_v30  ;;  %v16718_v15 = vsub.f32 %v16679_v40, %v2900_v4  ;;  %v16721_v26 = vsub.f32 %v16684_v48, %v2903_v28  ;;  %v16728_v30 = vld [vmem:[%s18409_s2 + $0xe0] sm:$0xff] }
  0xf8   :  { %v3099_v48 = vand.u32 4294901760, %v3098_v32  ;;  %18554 = vst [vmem:[#allocation12_spill] sm:$0xff] %v16744_v57  ;;  %v16752_v9 = vsub.f32 %v16706_v20, %v2855_v46  ;;  %14850 = vmatprep.subr.bf16.mxu1 %v16744_v57  ;;  %v2858_v5 = vand.u32 4294901760, %v16738_v56  ;;  %v18456_v20 = vand.u32 4294901760, %v16749_v44 }
  0xf9   :  { %14880 = vmatpush3.bf16.msra.mxu0 %v14879_v42  ;;  %v14881_v40 = vpack.c.bf16 %v3218_v31, %v3211_v55  ;;  %v3105_v42 = vsub.f32 %v16696_v0, %v18443_v35  ;;  %v18446_v21 = vand.u32 4294901760, %v16718_v15  ;;  %v18447_v45 = vand.u32 4294901760, %v16721_v26 }
  0xfa   :  { %v2906_v55 = vand.u32 4294901760, %v16728_v30  ;;  %v2909_v31 = vand.u32 4294901760, %v16733_v25  ;;  %v3112_v33 = vsub.f32 %v16749_v44, %v18456_v20  ;;  %v16797_v7 = vpack.c.bf16 %v2903_v28, %v2900_v4 }
  0xfb   :  { %14882 = vmatprep.subr.bf16.mxu0 %v14881_v40  ;;  %v3106_v32 = vand.u32 4294901760, %v3105_v42  ;;  %v3224_v49 = vsub.f32 %v16718_v15, %v18446_v21  ;;  %v3231_v1 = vsub.f32 %v16721_v26, %v18447_v45  ;;  %v18453_v40 = vand.u32 4294901760, %v16752_v9  ;;  %v2802_v42 = vld [vmem:[%s18409_s2 + $0x68] sm:$0xff] }
  0xfc   :  { %v16770_v16 = vsub.f32 %v16728_v30, %v2906_v55  ;;  %v16773_v10 = vsub.f32 %v16733_v25, %v2909_v31  ;;  %v16777_v21 = vpack.c.bf16 %v2849_v58, %v2846_v52  ;;  %v2861_v43 = vand.u32 4294901760, %v2802_v42  ;;  %v2819_v58 = vld [vmem:[%s18409_s2 + $0xf0] sm:$0xff]  ;;  %18556 = vst [vmem:[#allocation14_spill] sm:$0xff] %v16797_v7 }
  0xfd   :  { %v14883_v35 = vpack.c.bf16 %v3106_v32, %v3099_v48  ;;  %v3225_v45 = vand.u32 4294901760, %v3224_v49  ;;  %v3232_v19 = vand.u32 4294901760, %v3231_v1  ;;  %v3119_v48 = vsub.f32 %v16752_v9, %v18453_v40  ;;  %v2820_v32 = vld [vmem:[%s18409_s2 + $0xf8] sm:$0xff] }
  0xfe   :  { %18555 = vst [vmem:[#allocation13_spill] sm:$0xff] %v16777_v21  ;;  %v18455_v30 = vand.u32 4294901760, %v16770_v16  ;;  %v18454_v25 = vand.u32 4294901760, %v16773_v10  ;;  %14852 = vmatpush3.bf16.msra.mxu1 %v16777_v21  ;;  %v16789_v52 = vsub.f32 %v16738_v56, %v2858_v5  ;;  %v16806_v40 = vsub.f32 %v2802_v42, %v2861_v43 }
  0xff   :  { %14884 = vmatpush3.bf16.msra.mxu0 %v14883_v35  ;;  %v14885_v49 = vpack.c.bf16 %v3232_v19, %v3225_v45  ;;  %v3113_v35 = vand.u32 4294901760, %v3112_v33  ;;  %v3120_v1 = vand.u32 4294901760, %v3119_v48  ;;  %v2803_v19 = vld [vmem:[%s18409_s2 + $0x70] sm:$0xff]  ;;  %v2804_v33 = vld [vmem:[%s18409_s2 + $0x78] sm:$0xff]  ;;  %14854 = vmatprep.subr.bf16.mxu1 %v16797_v7  ;;  %v2912_v4 = vand.u32 4294901760, %v2819_v58 }
 0x100   :  { %v3238_v38 = vsub.f32 %v16770_v16, %v18455_v30  ;;  %v3245_v56 = vsub.f32 %v16773_v10, %v18454_v25  ;;  %v18460_v29 = vand.u32 4294901760, %v16789_v52  ;;  %v2915_v28 = vand.u32 4294901760, %v2820_v32 }
 0x101   :  { %14886 = vmatprep.subr.bf16.mxu0 %v14885_v49  ;;  %v14887_v45 = vpack.c.bf16 %v3120_v1, %v3113_v35  ;;  %v16815_v48 = vpack.c.bf16 %v2855_v46, %v2852_v22  ;;  %v18465_v20 = vand.u32 4294901760, %v16806_v40  ;;  %v16821_v37 = vsub.f32 %v2819_v58, %v2912_v4 }
 0x102   :  { %v3239_v25 = vand.u32 4294901760, %v3238_v38  ;;  %v3246_v30 = vand.u32 4294901760, %v3245_v56  ;;  %v3126_v42 = vsub.f32 %v16789_v52, %v18460_v29  ;;  %v16823_v21 = vsub.f32 %v2820_v32, %v2915_v28 }
 0x103   :  { %18557 = vst [vmem:[#allocation15_spill] sm:$0xff] %v16815_v48  ;;  %14888 = vmatpush3.bf16.msra.mxu0 %v14887_v45  ;;  %14856 = vmatpush3.bf16.msra.mxu1 %v16815_v48  ;;  %v2864_v49 = vand.u32 4294901760, %v2803_v19  ;;  %v2867_v35 = vand.u32 4294901760, %v2804_v33  ;;  %v3133_v38 = vsub.f32 %v16806_v40, %v18465_v20  ;;  %v16829_v46 = vpack.c.bf16 %v2909_v31, %v2906_v55 }
 0x104   :  { %v14889_v1 = vpack.c.bf16 %v3246_v30, %v3239_v25  ;;  %v3127_v22 = vand.u32 4294901760, %v3126_v42  ;;  %v18462_v56 = vand.u32 4294901760, %v16821_v37  ;;  %v18461_v45 = vand.u32 4294901760, %v16823_v21 }
 0x105   :  { %v16833_v58 = vsub.f32 %v2803_v19, %v2864_v49  ;;  %v16835_v32 = vsub.f32 %v2804_v33, %v2867_v35  ;;  %v3134_v29 = vand.u32 4294901760, %v3133_v38  ;;  %14858 = vmatprep.subr.bf16.mxu1 %v16829_v46  ;;  %v16838_v30 = vpack.c.bf16 %v2861_v43, %v2858_v5 }
 0x106   :  { %14890 = vmatprep.subr.bf16.mxu0 %v14889_v1  ;;  %v3252_v25 = vsub.f32 %v16821_v37, %v18462_v56  ;;  %v3259_v55 = vsub.f32 %v16823_v21, %v18461_v45  ;;  %v16849_v42 = vpack.c.bf16 %v2915_v28, %v2912_v4  ;;  %v16851_v1 = vpack.c.bf16 %v2867_v35, %v2864_v49 }
 0x107   :  { %18558 = vst [vmem:[#allocation16_spill] sm:$0xff] %v16833_v58  ;;  %18559 = vst [vmem:[#allocation17_spill] sm:$0xff] %v16835_v32  ;;  %v18464_v31 = vand.u32 4294901760, %v16833_v58  ;;  %v18463_v19 = vand.u32 4294901760, %v16835_v32  ;;  %v14891_v33 = vpack.c.bf16 %v3134_v29, %v3127_v22  ;;  %14860 = vmatpush3.bf16.msra.mxu1 %v16838_v30  ;;  %v14897_v4 = vpack.c.bf16 %v16416_v17, %v16411_v54 }
 0x108   :  { %v3253_v5 = vand.u32 4294901760, %v3252_v25  ;;  %v3260_v43 = vand.u32 4294901760, %v3259_v55  ;;  %14862 = vmatprep.subr.bf16.mxu1 %v16849_v42 }
 0x109   :  { %v3140_v38 = vsub.f32 %v16833_v58, %v18464_v31  ;;  %v3147_v45 = vsub.f32 %v16835_v32, %v18463_v19  ;;  %14892 = vmatpush3.bf16.msra.mxu0 %v14891_v33  ;;  %v18569_v19 = vand.u32 4294901760, %v16752_v9 }
 0x10a   :  { %v14893_v29 = vpack.c.bf16 %v3260_v43, %v3253_v5  ;;  %v20_v43 = vld [vmem:[%s18406_s1 + $0x151] ss:$0 sm:$0xff] }
 0x10b   :  { %v3141_v22 = vand.u32 4294901760, %v3140_v38  ;;  %v3148_v56 = vand.u32 4294901760, %v3147_v45  ;;  %14864 = vmatpush3.bf16.msra.mxu1 %v16851_v1 }
 0x10c   :  { %14894 = vmatprep.subr.bf16.mxu0 %v14893_v29  ;;  %14898 = vmatprep.subr.bf16.mxu1 %v14897_v4 }
 0x10d   :  { %v14895_v49 = vpack.c.bf16 %v3148_v56, %v3141_v22 }
 0x10f   :  { %14896 = vmatpush3.bf16.msra.mxu0 %v14895_v49 }
 0x110   :  { %14930 = vmatprep.subr.bf16.mxu0 %v16558_v61 }
 0x13a   :  { %v16897_v38 = vpop.f32.mrb[0].mxu1 }
 0x13b   :  { %18560 = vst [vmem:[#allocation18_spill] sm:$0xff] %v16897_v38  ;;  %v1743_v29 = vadd.f32 %v16897_v38, %v20_v43  ;;  %v16900_v56 = vpop.f32.mrb[1].mxu1 }
 0x13c   :  { %18561 = vst [vmem:[#allocation19_spill] sm:$0xff] %v16900_v56  ;;  %v1742_v22 = vadd.f32 %v16900_v56, %v20_v43 }
 0x13d   :  { %1752 = vst.msk [vmem:[#allocation2 + $0x8] sm:$0xff] %vm1750_vm3, %v1743_v29 }
 0x13e   :  { %1751 = vst.msk [vmem:[#allocation2] sm:$0xff] %vm1750_vm3, %v1742_v22  ;;  %v16905_v49 = vpop.f32.mrb[2].mxu1 }
 0x13f   :  { %18562 = vst [vmem:[#allocation20_spill] sm:$0xff] %v16905_v49  ;;  %v1745_v5 = vadd.f32 %v16905_v49, %v20_v43  ;;  %v16908_v4 = vpop.f32.mrb[3].mxu1 }
 0x140   :  { %18563 = vst [vmem:[#allocation21_spill] sm:$0xff] %v16908_v4  ;;  %v1744_v33 = vadd.f32 %v16908_v4, %v20_v43 }
 0x141   :  { %1754 = vst.msk [vmem:[#allocation2 + $0x18] sm:$0xff] %vm1750_vm3, %v1745_v5  ;;  %v18568_v5 = vand.u32 4294901760, %v16749_v44 }
 0x142   :  { %1753 = vst.msk [vmem:[#allocation2 + $0x10] sm:$0xff] %vm1750_vm3, %v1744_v33  ;;  %v16913_v55 = vpop.f32.mrb[4].mxu1 }
 0x143   :  { %18564 = vst [vmem:[#allocation22_spill] sm:$0xff] %v16913_v55  ;;  %v1747_v25 = vadd.f32 %v16913_v55, %v20_v43  ;;  %v16916_v45 = vpop.f32.mrb[5].mxu1  ;;  %v16932_v31 = vpack.c.bf16 %v18569_v19, %v18568_v5  ;;  %v18578_v55 = vand.u32 4294901760, %v16823_v21  ;;  %v18581_v5 = vand.u32 4294901760, %v16835_v32 }
 0x144   :  { %18565 = vst [vmem:[#allocation23_spill] sm:$0xff] %v16916_v45  ;;  %v1746_v29 = vadd.f32 %v16916_v45, %v20_v43 }
 0x145   :  { %1756 = vst.msk [vmem:[#allocation2 + $0x28] sm:$0xff] %vm1750_vm3, %v1747_v25  ;;  %18570 = vst [vmem:[#allocation26_spill] sm:$0xff] %v16932_v31  ;;  %v18571_v25 = vand.u32 4294901760, %v16770_v16 }
 0x146   :  { %1755 = vst.msk [vmem:[#allocation2 + $0x20] sm:$0xff] %vm1750_vm3, %v1746_v29  ;;  %v16921_v22 = vpop.f32.mrb[6].mxu1  ;;  %v18572_v29 = vand.u32 4294901760, %v16773_v10 }
 0x147   :  { %18566 = vst [vmem:[#allocation24_spill] sm:$0xff] %v16921_v22  ;;  %v1749_v35 = vadd.f32 %v16921_v22, %v20_v43  ;;  %v16924_v28 = vpop.f32.mrb[7].mxu1  ;;  %v18574_v22 = vand.u32 4294901760, %v16789_v52 }
 0x148   :  { %18567 = vst [vmem:[#allocation25_spill] sm:$0xff] %v16924_v28  ;;  %v1748_v33 = vadd.f32 %v16924_v28, %v20_v43  ;;  %v16939_v20 = vpack.c.bf16 %v18572_v29, %v18571_v25  ;;  %v18575_v43 = vand.u32 4294901760, %v16806_v40 }
 0x149   :  { %1758 = vst.msk [vmem:[#allocation2 + $0x38] sm:$0xff] %vm1750_vm3, %v1749_v35  ;;  %v18577_v35 = vand.u32 4294901760, %v16821_v37 }
 0x14a   :  { %1757 = vst.msk [vmem:[#allocation2 + $0x30] sm:$0xff] %vm1750_vm3, %v1748_v33  ;;  %18573 = vst [vmem:[#allocation27_spill] sm:$0xff] %v16939_v20  ;;  %v16945_v28 = vpack.c.bf16 %v18575_v43, %v18574_v22  ;;  %v18580_v33 = vand.u32 4294901760, %v16833_v58 }
 0x14b   :  { %v16951_v19 = vpack.c.bf16 %v18578_v55, %v18577_v35 }
 0x14c   :  { %18576 = vst [vmem:[#allocation28_spill] sm:$0xff] %v16945_v28  ;;  %v16957_v45 = vpack.c.bf16 %v18581_v5, %v18580_v33 }
 0x14d   :  { %18579 = vst [vmem:[#allocation29_spill] sm:$0xff] %v16951_v19 }
 0x14e   :  { %18582 = vst [vmem:[#allocation30_spill] sm:$0xff] %v16957_v45 }
 0x172   :  { %v16959_v25 = vpop.f32.mrb[8].mxu1 }
 0x173   :  { %v16961_v29 = vpop.f32.mrb[9].mxu1 }
 0x185   :  { %v902_v49 = vpop.f32.mrb[0].mxu0 }
 0x186   :  { %v2773_v22 = vmul.f32 %v16959_v25, %v902_v49  ;;  %v904_v43 = vpop.f32.mrb[1].mxu0 }
 0x187   :  { %v2774_v4 = vmul.f32 %v16961_v29, %v904_v43 }
 0x188   :  { %v16965_v56 = vand.u32 4294901760, %v2773_v22 }
 0x189   :  { %v16967_v55 = vand.u32 4294901760, %v2774_v4  ;;  %v909_v35 = vpop.f32.mrb[2].mxu0 }
 0x18a   :  { %18583 = vst [vmem:[#allocation31_spill] sm:$0xff] %v16965_v56  ;;  %v16970_v38 = vsub.f32 %v2773_v22, %v16965_v56  ;;  %v2775_v33 = vmul.f32 %v16959_v25, %v909_v35  ;;  %v911_v5 = vpop.f32.mrb[3].mxu0 }
 0x18b   :  { %18584 = vst [vmem:[#allocation32_spill] sm:$0xff] %v16967_v55  ;;  %v16974_v45 = vsub.f32 %v2774_v4, %v16967_v55  ;;  %v2776_v19 = vmul.f32 %v16961_v29, %v911_v5  ;;  %3263 = vmatprep.mubr.f32.mxu0 %v16967_v55 }
 0x18c   :  { %v18486_v49 = vand.u32 4294901760, %v16970_v38  ;;  %v16979_v43 = vand.u32 4294901760, %v2775_v33  ;;  %3265 = vmatmul.mubr.f32.vlgmr.msra.gmra.mrb[16].mxu0 %v16965_v56  ;;  %v12532_v56 = vld [vmem:[%s18407_s0 + $0x40] sm:$0xff] }
 0x18d   :  { %v16982_v28 = vand.u32 4294901760, %v2776_v19  ;;  %v916_v22 = vpop.f32.mrb[4].mxu0  ;;  %14932 = vmatpush3.bf16.msra.mxu0 %v16571_v39  ;;  %4144 = vrot.lane.b32.xlu1 %v12532_v56, %s15827_s11 }
 0x18e   :  { %18585 = vst [vmem:[#allocation33_spill] sm:$0xff] %v16979_v43  ;;  %v2926_v4 = vsub.f32 %v16970_v38, %v18486_v49  ;;  %v16990_v5 = vsub.f32 %v2775_v33, %v16979_v43  ;;  %v2777_v20 = vmul.f32 %v16959_v25, %v916_v22  ;;  %v918_v31 = vpop.f32.mrb[5].mxu0  ;;  %14934 = vmatprep.subr.bf16.mxu0 %v16587_v23  ;;  %v18587_v49 = vand.u32 4294901760, %v16974_v45 }
 0x18f   :  { %18586 = vst [vmem:[#allocation34_spill] sm:$0xff] %v16982_v28  ;;  %v16998_v55 = vsub.f32 %v2776_v19, %v16982_v28  ;;  %v2778_v35 = vmul.f32 %v16961_v29, %v918_v31  ;;  %3270 = vmatprep.mubr.f32.mxu0 %v16982_v28 }
 0x190   :  { %v2920_v33 = vsub.f32 %v16974_v45, %v18587_v49  ;;  %v17006_v22 = vand.u32 4294901760, %v2777_v20  ;;  %3272 = vmatmul.mubr.f32.gmra.mrb[18].mxu0 %v16979_v43  ;;  %v18496_v58 = vand.u32 4294901760, %v16990_v5  ;;  %v2927_v54 = vand.u32 4294901760, %v2926_v4 }
 0x191   :  { %v17010_v32 = vand.u32 4294901760, %v2778_v35  ;;  %v923_v19 = vpop.f32.mrb[6].mxu0  ;;  %14936 = vmatpush3.bf16.msra.mxu0 %v16596_v24  ;;  %v18499_v28 = vand.u32 4294901760, %v16998_v55  ;;  %v18594_v4 = vpack.c.bf16 %v16487_v34, %v16485_v47 }
 0x192   :  { %18588 = vst [vmem:[#allocation35_spill] sm:$0xff] %v17006_v22  ;;  %v2921_v31 = vand.u32 4294901760, %v2920_v33  ;;  %v17015_v17 = vsub.f32 %v2777_v20, %v17006_v22  ;;  %v2779_v49 = vmul.f32 %v16959_v25, %v923_v19  ;;  %v925_v56 = vpop.f32.mrb[7].mxu0  ;;  %14938 = vmatprep.subr.bf16.mxu0 %v16620_v62  ;;  %v2941_v43 = vsub.f32 %v16990_v5, %v18496_v58 }
 0x193   :  { %18589 = vst [vmem:[#allocation36_spill] sm:$0xff] %v17010_v32  ;;  %v17023_v23 = vsub.f32 %v2778_v35, %v17010_v32  ;;  %v2780_v33 = vmul.f32 %v16961_v29, %v925_v56  ;;  %3277 = vmatprep.mubr.f32.mxu0 %v17010_v32  ;;  %v2935_v20 = vsub.f32 %v16998_v55, %v18499_v28 }
 0x194   :  { %2922 = vmatprep.mubr.f32.mxu1 %v2921_v31  ;;  %v17030_v19 = vand.u32 4294901760, %v2779_v49  ;;  %3279 = vmatmul.mubr.f32.gmra.mrb[20].mxu0 %v17006_v22  ;;  %v18592_v56 = vpack.c.bf16 %v16458_v8, %v16456_v60  ;;  %v2942_v62 = vand.u32 4294901760, %v2941_v43 }
 0x195   :  { %2928 = vmatmul.mubr.f32.vlgmr.msra.gmra.mrb[22].mxu1 %v2927_v54  ;;  %v17034_v58 = vand.u32 4294901760, %v2780_v33  ;;  %v930_v35 = vpop.f32.mrb[8].mxu0  ;;  %14940 = vmatpush3.bf16.msra.mxu0 %v16638_v14  ;;  %v2936_v31 = vand.u32 4294901760, %v2935_v20  ;;  %v18506_v32 = vand.u32 4294901760, %v17023_v23 }
 0x196   :  { %18590 = vst [vmem:[#allocation37_spill] sm:$0xff] %v17030_v19  ;;  %14900 = vmatpush3.bf16.msra.mxu1 %v18592_v56  ;;  %v17042_v28 = vsub.f32 %v2779_v49, %v17030_v19  ;;  %v2781_v54 = vmul.f32 %v16959_v25, %v930_v35  ;;  %v932_v22 = vpop.f32.mrb[9].mxu0  ;;  %14942 = vmatprep.subr.bf16.mxu0 %v16689_v59  ;;  %v18595_v56 = vand.u32 4294901760, %v17015_v17 }
 0x197   :  { %18591 = vst [vmem:[#allocation38_spill] sm:$0xff] %v17034_v58  ;;  %14902 = vmatprep.subr.bf16.mxu1 %v18594_v4  ;;  %v17053_v20 = vsub.f32 %v2780_v33, %v17034_v58  ;;  %v2782_v49 = vmul.f32 %v16961_v29, %v932_v22  ;;  %2937 = vmatprep.mubr.f32.mxu1 %v2936_v31 }
 0x198   :  { %18593 = vst [vmem:[#allocation39_spill] sm:$0xff] %v17042_v28  ;;  %v2956_v14 = vsub.f32 %v17015_v17, %v18595_v56  ;;  %3284 = vmatprep.mubr.f32.mxu0 %v17034_v58  ;;  %v2950_v43 = vsub.f32 %v17023_v23, %v18506_v32  ;;  %v17060_v35 = vand.u32 4294901760, %v2781_v54  ;;  %v18598_v22 = vpack.c.bf16 %v16499_v6, %v16496_v3 }
 0x199   :  { %2943 = vmatmul.mubr.f32.gmra.mrb[24].mxu1 %v2942_v62  ;;  %3286 = vmatmul.mubr.f32.gmra.mrb[22].mxu0 %v17030_v19  ;;  %v17064_v56 = vand.u32 4294901760, %v2782_v49  ;;  %v937_v33 = vpop.f32.mrb[10].mxu0  ;;  %v18514_v58 = vand.u32 4294901760, %v17053_v20  ;;  %v18599_v4 = vpack.c.bf16 %v16532_v13, %v16529_v12 }
 0x19a   :  { %18596 = vst [vmem:[#allocation40_spill] sm:$0xff] %v17060_v35  ;;  %14904 = vmatpush3.bf16.msra.mxu1 %v18598_v22  ;;  %14944 = vmatpush3.bf16.msra.mxu0 %v16715_v11  ;;  %v2951_v31 = vand.u32 4294901760, %v2950_v43  ;;  %v17072_v32 = vsub.f32 %v2781_v54, %v17060_v35  ;;  %v2783_v62 = vmul.f32 %v16959_v25, %v937_v33  ;;  %v939_v19 = vpop.f32.mrb[11].mxu0  ;;  %v2957_v59 = vand.u32 4294901760, %v2956_v14 }
 0x19b   :  { %18597 = vst [vmem:[#allocation41_spill] sm:$0xff] %v17064_v56  ;;  %14906 = vmatprep.subr.bf16.mxu1 %v18599_v4  ;;  %14946 = vmatprep.subr.bf16.mxu0 %v16744_v57  ;;  %v18600_v22 = vand.u32 4294901760, %v17042_v28  ;;  %v17083_v43 = vsub.f32 %v2782_v49, %v17064_v56  ;;  %v2784_v54 = vmul.f32 %v16961_v29, %v939_v19 }
 0x19c   :  { %2952 = vmatprep.mubr.f32.mxu1 %v2951_v31  ;;  %3291 = vmatprep.mubr.f32.mxu0 %v17064_v56  ;;  %v2965_v14 = vsub.f32 %v17053_v20, %v18514_v58  ;;  %v17090_v33 = vand.u32 4294901760, %v2783_v62  ;;  %v18603_v19 = vpack.c.bf16 %v16574_v41, %v16547_v2  ;;  %v18604_v31 = vld [vmem:[#allocation13_spill] sm:$0xff]  ;;  %v18605_v4 = vpack.c.bf16 %v16618_v53, %v16605_v36 }
 0x19d   :  { %v2971_v11 = vsub.f32 %v17042_v28, %v18600_v22  ;;  %2958 = vmatmul.mubr.f32.gmra.mrb[26].mxu1 %v2957_v59  ;;  %3293 = vmatmul.mubr.f32.gmra.mrb[24].mxu0 %v17060_v35  ;;  %v17094_v22 = vand.u32 4294901760, %v2784_v54  ;;  %v944_v49 = vpop.f32.mrb[12].mxu0  ;;  %v18521_v57 = vand.u32 4294901760, %v17083_v43 }
 0x19e   :  { %18601 = vst [vmem:[#allocation42_spill] sm:$0xff] %v17090_v33  ;;  %14908 = vmatpush3.bf16.msra.mxu1 %v18603_v19  ;;  %14948 = vmatpush3.bf16.msra.mxu0 %v18604_v31  ;;  %v2966_v56 = vand.u32 4294901760, %v2965_v14  ;;  %v17102_v58 = vsub.f32 %v2783_v62, %v17090_v33  ;;  %v2785_v59 = vmul.f32 %v16959_v25, %v944_v49  ;;  %v946_v35 = vpop.f32.mrb[13].mxu0  ;;  %v18606_v19 = vand.u32 4294901760, %v17072_v32 }
 0x19f   :  { %18602 = vst [vmem:[#allocation43_spill] sm:$0xff] %v17094_v22  ;;  %v2972_v28 = vand.u32 4294901760, %v2971_v11  ;;  %14910 = vmatprep.subr.bf16.mxu1 %v18605_v4  ;;  %14950 = vmatprep.subr.bf16.mxu0 %v16797_v7  ;;  %v17113_v14 = vsub.f32 %v2784_v54, %v17094_v22  ;;  %v2786_v62 = vmul.f32 %v16961_v29, %v946_v35 }
 0x1a0   :  { %v2986_v31 = vsub.f32 %v17072_v32, %v18606_v19  ;;  %2967 = vmatprep.mubr.f32.mxu1 %v2966_v56  ;;  %3298 = vmatprep.mubr.f32.mxu0 %v17094_v22  ;;  %v2980_v11 = vsub.f32 %v17083_v43, %v18521_v57  ;;  %v17120_v49 = vand.u32 4294901760, %v2785_v59  ;;  %v18608_v35 = vpack.c.bf16 %v16627_v18, %v16624_v50 }
 0x1a1   :  { %2973 = vmatmul.mubr.f32.gmra.mrb[28].mxu1 %v2972_v28  ;;  %3300 = vmatmul.mubr.f32.gmra.mrb[26].mxu0 %v17090_v33  ;;  %v17124_v19 = vand.u32 4294901760, %v2786_v62  ;;  %v951_v54 = vpop.f32.mrb[14].mxu0  ;;  %v18526_v22 = vand.u32 4294901760, %v17113_v14  ;;  %v18609_v4 = vpack.c.bf16 %v16658_v27, %v16647_v63 }
 0x1a2   :  { %18607 = vst [vmem:[#allocation44_spill] sm:$0xff] %v17120_v49  ;;  %14912 = vmatpush3.bf16.msra.mxu1 %v18608_v35  ;;  %14952 = vmatpush3.bf16.msra.mxu0 %v16815_v48  ;;  %v2981_v56 = vand.u32 4294901760, %v2980_v11  ;;  %v17132_v57 = vsub.f32 %v2785_v59, %v17120_v49  ;;  %v2787_v28 = vmul.f32 %v16959_v25, %v951_v54  ;;  %v953_v33 = vpop.f32.mrb[15].mxu0  ;;  %v2987_v7 = vand.u32 4294901760, %v2986_v31 }
 0x1a3   :  { %14914 = vmatprep.subr.bf16.mxu1 %v18609_v4  ;;  %14954 = vmatprep.subr.bf16.mxu0 %v16829_v46  ;;  %v18610_v35 = vand.u32 4294901760, %v17102_v58  ;;  %v17143_v11 = vsub.f32 %v2786_v62, %v17124_v19  ;;  %v2788_v59 = vmul.f32 %v16961_v29, %v953_v33  ;;  %v2995_v25 = vsub.f32 %v17113_v14, %v18526_v22 }
 0x1a4   :  { %2982 = vmatprep.mubr.f32.mxu1 %v2981_v56  ;;  %3305 = vmatprep.mubr.f32.mxu0 %v17124_v19  ;;  %v17150_v31 = vand.u32 4294901760, %v2787_v28  ;;  %v18529_v4 = vand.u32 4294901760, %v17132_v57  ;;  %v18611_v62 = vpack.c.bf16 %v16696_v0, %v16674_v51  ;;  %v2386_v56 = vpop.f32.mrb[10].mxu1  ;;  %v18612_v22 = vpack.c.bf16 %v16721_v26, %v16718_v15 }
 0x1a5   :  { %v3001_v48 = vsub.f32 %v17102_v58, %v18610_v35  ;;  %2988 = vmatmul.mubr.f32.gmra.mrb[30].mxu1 %v2987_v7  ;;  %3307 = vmatmul.mubr.f32.gmra.mrb[28].mxu0 %v17120_v49  ;;  %v17154_v54 = vand.u32 4294901760, %v2788_v59  ;;  %v2996_v29 = vand.u32 4294901760, %v2995_v25  ;;  %v18530_v33 = vand.u32 4294901760, %v17143_v11  ;;  %v13603_v49 = vpop.f32.mrb[11].mxu1 }
 0x1a6   :  { %14916 = vmatpush3.bf16.msra.mxu1 %v18611_v62  ;;  %14956 = vmatpush3.bf16.msra.mxu0 %v16838_v30  ;;  %v17162_v35 = vsub.f32 %v2787_v28, %v17150_v31  ;;  %v3016_v62 = vsub.f32 %v17132_v57, %v18529_v4  ;;  %v18613_v28 = vpack.c.bf16 %v16752_v9, %v16749_v44  ;;  %v18616_v44 = vand.u32 4294901760, %v16970_v38 }
 0x1a7   :  { %v3002_v7 = vand.u32 4294901760, %v3001_v48  ;;  %14918 = vmatprep.subr.bf16.mxu1 %v18612_v22  ;;  %14958 = vmatprep.subr.bf16.mxu0 %v16849_v42  ;;  %v17172_v25 = vsub.f32 %v2788_v59, %v17154_v54  ;;  %v3010_v48 = vsub.f32 %v17143_v11, %v18530_v33 }
 0x1a8   :  { %2997 = vmatprep.mubr.f32.mxu1 %v2996_v29  ;;  %3312 = vmatprep.mubr.f32.mxu0 %v17154_v54  ;;  %v3030_v22 = vand.u32 4294901760, %v17162_v35  ;;  %v18614_v29 = vand.u32 4294901760, %v16974_v45  ;;  %v3017_v4 = vand.u32 4294901760, %v3016_v62  ;;  %v18617_v62 = vpack.c.bf16 %v16806_v40, %v16789_v52  ;;  %v18623_v52 = vld [vmem:[#allocation5_spill] sm:$0xff] }
 0x1a9   :  { %3003 = vmatmul.mubr.f32.gmra.mrb[32].mxu1 %v3002_v7  ;;  %3314 = vmatmul.mubr.f32.gmra.mrb[30].mxu0 %v17150_v31  ;;  %v3011_v49 = vand.u32 4294901760, %v3010_v48  ;;  %v3024_v59 = vand.u32 4294901760, %v17172_v25  ;;  %v18615_v7 = vpack.c.bf16 %v16773_v10, %v16770_v16  ;;  %v18618_v10 = vand.u32 4294901760, %v16998_v55 }
 0x1aa   :  { %14920 = vmatpush3.bf16.msra.mxu1 %v18613_v28  ;;  %14960 = vmatpush3.bf16.msra.mxu0 %v16851_v1  ;;  %v3031_v33 = vsub.f32 %v17162_v35, %v3030_v22  ;;  %v2467_v48 = vpop.f32.mrb[12].mxu1  ;;  %v18619_v28 = vpack.c.bf16 %v16823_v21, %v16821_v37  ;;  %v18629_v21 = vand.u32 4294901760, %v17023_v23 }
 0x1ab   :  { %3619 = vmatprep.mubr.f32.mxu0 %v18614_v29  ;;  %14922 = vmatprep.subr.bf16.mxu1 %v18615_v7  ;;  %v3025_v9 = vsub.f32 %v17172_v25, %v3024_v59  ;;  %v18620_v29 = vld [vmem:[#allocation6_spill] sm:$0xff]  ;;  %v18621_v7 = vld [vmem:[#allocation8_spill] sm:$0xff] }
 0x1ac   :  { %3012 = vmatprep.mubr.f32.mxu1 %v3011_v49  ;;  %14994 = vmatprep.subr.bf16.mxu0 %v16558_v61  ;;  %v3032_v61 = vand.u32 4294901760, %v3031_v33  ;;  %v13610_v49 = vpop.f32.mrb[13].mxu1  ;;  %v18622_v40 = vand.u32 4294901760, %v18621_v7  ;;  %v18627_v33 = vld [vmem:[#allocation16_spill] sm:$0xff] }
 0x1ad   :  { %3018 = vmatmul.mubr.f32.gmra.mrb[34].mxu1 %v3017_v4  ;;  %3623 = vmatmul.mubr.f32.vlgmr.msra.gmra.mrb[32].mxu0 %v18616_v44  ;;  %v3026_v16 = vand.u32 4294901760, %v3025_v9  ;;  %v2468_v4 = vadd.f32 %v2467_v48, %v2386_v56  ;;  %v18624_v44 = vand.u32 4294901760, %v18623_v52  ;;  %v18625_v9 = vand.u32 4294901760, %v16990_v5  ;;  %v18632_v49 = vld [vmem:[#allocation7_spill] sm:$0xff] }
 0x1ae   :  { %14924 = vmatpush3.bf16.msra.mxu1 %v18617_v62  ;;  %3630 = vmatprep.mubr.f32.mxu0 %v18618_v10  ;;  %v2543_v37 = vpop.f32.mrb[14].mxu1  ;;  %v18630_v56 = vand.u32 4294901760, %v16456_v60  ;;  %v18636_v60 = vand.u32 4294901760, %v17053_v20 }
 0x1af   :  { %14996 = vmatpush3.bf16.msra.mxu0 %v16571_v39  ;;  %14926 = vmatprep.subr.bf16.mxu1 %v18619_v28  ;;  %v14961_v62 = vpack.c.bf16 %v18624_v44, %v18622_v40  ;;  %v18626_v39 = vld [vmem:[#allocation17_spill] sm:$0xff]  ;;  %v13617_v28 = vpop.f32.mrb[15].mxu1  ;;  %v18635_v40 = vand.u32 4294901760, %v17015_v17 }
 0x1b0   :  { %3027 = vmatprep.mubr.f32.mxu1 %v3026_v16  ;;  %14998 = vmatprep.subr.bf16.mxu0 %v18620_v29  ;;  %v18628_v10 = vpack.c.bf16 %v18626_v39, %v18627_v33  ;;  %v18631_v16 = vand.u32 4294901760, %v16458_v8  ;;  %v18633_v29 = vand.u32 4294901760, %v16485_v47  ;;  %v18639_v47 = vand.u32 4294901760, %v16499_v6  ;;  %v18643_v39 = vld [vmem:[#allocation39_spill] sm:$0xff]  ;;  %v18654_v28 = vld [vmem:[#allocation13_spill] sm:$0xff] }
 0x1b1   :  { %3033 = vmatmul.mubr.f32.gmra.mrb[36].mxu1 %v3032_v61  ;;  %3634 = vmatmul.mubr.f32.gmra.mrb[34].mxu0 %v18625_v9  ;;  %v2544_v61 = vadd.f32 %v2543_v37, %v2468_v4  ;;  %v18638_v4 = vand.u32 4294901760, %v16496_v3  ;;  %v18644_v33 = vand.u32 4294901760, %v18643_v39  ;;  %v18645_v3 = vand.u32 4294901760, %v17083_v43 }
 0x1b2   :  { %14928 = vmatpush3.bf16.msra.mxu1 %v18628_v10  ;;  %3449 = vmatprep.mubr.f32.mxu1 %v16974_v45  ;;  %v14963_v48 = vpack.c.bf16 %v18631_v16, %v18630_v56  ;;  %v18634_v45 = vand.u32 4294901760, %v16487_v34  ;;  %v2618_v8 = vpop.f32.mrb[16].mxu1  ;;  %v18646_v10 = vld [vmem:[#allocation11_spill] sm:$0xff]  ;;  %v18647_v37 = vand.u32 4294901760, %v16547_v2  ;;  %v18650_v16 = vand.u32 4294901760, %v16605_v36 }
 0x1b3   :  { %3641 = vmatprep.mubr.f32.mxu0 %v18629_v21  ;;  %15000 = vmatpush3.bf16.msra.mxu0 %v16596_v24  ;;  %v18637_v24 = vld [vmem:[#allocation9_spill] sm:$0xff]  ;;  %v14967_v34 = vpack.c.bf16 %v18639_v47, %v18638_v4  ;;  %v2619_v52 = vadd.f32 %v2618_v8, %v2544_v61  ;;  %v13624_v44 = vpop.f32.mrb[17].mxu1  ;;  %v18652_v61 = vand.u32 4294901760, %v17072_v32  ;;  %v18653_v2 = vand.u32 4294901760, %v17113_v14 }
 0x1b4   :  { %14962 = vmatprep.subr.bf16.mxu1 %v14961_v62  ;;  %15002 = vmatprep.subr.bf16.mxu0 %v18632_v49  ;;  %v14965_v7 = vpack.c.bf16 %v18634_v45, %v18633_v29  ;;  %v18641_v62 = vand.u32 4294901760, %v16529_v12  ;;  %v18648_v12 = vand.u32 4294901760, %v16574_v41  ;;  %v18655_v49 = vand.u32 4294901760, %v16624_v50  ;;  %v18673_v44 = vld [vmem:[#allocation28_spill] sm:$0xff] }
 0x1b5   :  { %3452 = vmatmul.mubr.f32.vlgmr.msra.gmra.mrb[38].mxu1 %v16970_v38  ;;  %3645 = vmatmul.mubr.f32.gmra.mrb[36].mxu0 %v18635_v40  ;;  %v18640_v38 = vld [vmem:[#allocation10_spill] sm:$0xff]  ;;  %v18656_v36 = vand.u32 4294901760, %v16627_v18  ;;  %v18661_v50 = vand.u32 4294901760, %v17143_v11  ;;  %v18662_v18 = vld [vmem:[#allocation15_spill] sm:$0xff]  ;;  %v18663_v8 = vand.u32 4294901760, %v16674_v51  ;;  %v18666_v4 = vand.u32 4294901760, %v16721_v26 }
 0x1b6   :  { %3458 = vmatprep.mubr.f32.mxu1 %v16998_v55  ;;  %3652 = vmatprep.mubr.f32.mxu0 %v18636_v60  ;;  %v18642_v55 = vand.u32 4294901760, %v16532_v13  ;;  %v2695_v6 = vpop.f32.mrb[18].mxu1  ;;  %v14971_v13 = vpack.c.bf16 %v18648_v12, %v18647_v37  ;;  %v18660_v60 = vand.u32 4294901760, %v17102_v58  ;;  %v4466_v51 = vld [vmem:[%s18406_s1 + $0x90] sm:$0xff]  ;;  %v18685_v37 = vld [vmem:[#allocation42_spill] sm:$0xff] }
 0x1b7   :  { %14964 = vmatpush3.bf16.msra.mxu1 %v14963_v48  ;;  %15004 = vmatpush3.bf16.msra.mxu0 %v18637_v24  ;;  %v2696_v21 = vadd.f32 %v2695_v6, %v2619_v52  ;;  %v13631_v56 = vpop.f32.mrb[19].mxu1  ;;  %v18683_v6 = vld [vmem:[#allocation40_spill] sm:$0xff] }
 0x1b8   :  { %14966 = vmatprep.subr.bf16.mxu1 %v14965_v7  ;;  %15006 = vmatprep.subr.bf16.mxu0 %v18640_v38  ;;  %v14969_v9 = vpack.c.bf16 %v18642_v55, %v18641_v62  ;;  %v18658_v7 = vand.u32 4294901760, %v16647_v63  ;;  %v18664_v63 = vand.u32 4294901760, %v16696_v0  ;;  %v19_v0 = vld [vmem:[%s18406_s1 + $0x150] ss:$0 sm:$0xff]  ;;  %v18674_v38 = vld [vmem:[#allocation34_spill] sm:$0xff]  ;;  %v18675_v62 = vld [vmem:[#allocation29_spill] sm:$0xff] }
 0x1b9   :  { %3461 = vmatmul.mubr.f32.gmra.mrb[40].mxu1 %v16990_v5  ;;  %3656 = vmatmul.mubr.f32.gmra.mrb[38].mxu0 %v18644_v33  ;;  %v18649_v5 = vld [vmem:[#allocation12_spill] sm:$0xff]  ;;  %v18677_v55 = vld [vmem:[#allocation30_spill] sm:$0xff]  ;;  %v18681_v33 = vld [vmem:[#allocation37_spill] sm:$0xff] }
 0x1ba   :  { %3467 = vmatprep.mubr.f32.mxu1 %v17023_v23  ;;  %3663 = vmatprep.mubr.f32.mxu0 %v18645_v3  ;;  %v18651_v23 = vand.u32 4294901760, %v16618_v53  ;;  %v2768_v41 = vpop.f32.mrb[20].mxu1  ;;  %v14975_v53 = vpack.c.bf16 %v18656_v36, %v18655_v49  ;;  %v14979_v24 = vpack.c.bf16 %v18664_v63, %v18663_v8  ;;  %v18682_v3 = vld [vmem:[#allocation41_spill] sm:$0xff] }
 0x1bb   :  { %14968 = vmatpush3.bf16.msra.mxu1 %v14967_v34  ;;  %15008 = vmatpush3.bf16.msra.mxu0 %v18646_v10  ;;  %v2769_v29 = vadd.f32 %v2768_v41, %v2696_v21  ;;  %v13638_v45 = vpop.f32.mrb[21].mxu1  ;;  %v18684_v10 = vld [vmem:[#allocation43_spill] sm:$0xff]  ;;  %v18686_v21 = vld [vmem:[#allocation44_spill] sm:$0xff] }
 0x1bc   :  { %14970 = vmatprep.subr.bf16.mxu1 %v14969_v9  ;;  %15010 = vmatprep.subr.bf16.mxu0 %v18649_v5  ;;  %v14973_v48 = vpack.c.bf16 %v18651_v23, %v18650_v16  ;;  %v18678_v9 = vld [vmem:[#allocation36_spill] sm:$0xff] }
 0x1bd   :  { %3470 = vmatmul.mubr.f32.gmra.mrb[42].mxu1 %v17015_v17  ;;  %3667 = vmatmul.mubr.f32.gmra.mrb[40].mxu0 %v18652_v61  ;;  %v18657_v17 = vld [vmem:[#allocation14_spill] sm:$0xff]  ;;  %v2772_v26 = vadd.f32 %v2769_v29, %v19_v0 }
 0x1be   :  { %3476 = vmatprep.mubr.f32.mxu1 %v17053_v20  ;;  %3674 = vmatprep.mubr.f32.mxu0 %v18653_v2  ;;  %v18659_v20 = vand.u32 4294901760, %v16658_v27  ;;  %v18665_v27 = vand.u32 4294901760, %v16718_v15  ;;  %v4467_v15 = vld [vmem:[%s18406_s1 + $0xa8] sm:$0xff] }
 0x1bf   :  { %14972 = vmatpush3.bf16.msra.mxu1 %v14971_v13  ;;  %15012 = vmatpush3.bf16.msra.mxu0 %v18654_v28  ;;  %v18687_v28 = vmov 0.0  }
 0x1c0   :  { %14974 = vmatprep.subr.bf16.mxu1 %v14973_v48  ;;  %15014 = vmatprep.subr.bf16.mxu0 %v18657_v17  ;;  %v14977_v40 = vpack.c.bf16 %v18659_v20, %v18658_v7  ;;  %v14981_v47 = vpack.c.bf16 %v18666_v4, %v18665_v27 }
 0x1c1   :  { %3479 = vmatmul.mubr.f32.gmra.mrb[44].mxu1 %v18643_v39  ;;  %3678 = vmatmul.mubr.f32.gmra.mrb[42].mxu0 %v18660_v60  ;;  %v18680_v39 = vld [vmem:[#allocation38_spill] sm:$0xff] }
 0x1c2   :  { %3485 = vmatprep.mubr.f32.mxu1 %v17083_v43  ;;  %3685 = vmatprep.mubr.f32.mxu0 %v18661_v50  ;;  %v18667_v43 = vand.u32 4294901760, %v17132_v57  ;;  %v12533_v60 = vld [vmem:[%s18407_s0 + $0x48] sm:$0xff]  ;;  %v12534_v50 = vld [vmem:[%s18407_s0 + $0x50] sm:$0xff] }
 0x1c3   :  { %14976 = vmatpush3.bf16.msra.mxu1 %v14975_v53  ;;  %15016 = vmatpush3.bf16.msra.mxu0 %v18662_v18  ;;  %v12535_v18 = vld [vmem:[%s18407_s0 + $0x58] sm:$0xff] }
 0x1c4   :  { %14978 = vmatprep.subr.bf16.mxu1 %v14977_v40  ;;  %15018 = vmatprep.subr.bf16.mxu0 %v16829_v46  ;;  %v18668_v46 = vld [vmem:[#allocation32_spill] sm:$0xff] }
 0x1c5   :  { %3488 = vmatmul.mubr.f32.gmra.mrb[46].mxu1 %v17072_v32  ;;  %3689 = vmatmul.mubr.f32.gmra.mrb[44].mxu0 %v18667_v43  ;;  %v4479_v32 = vand.u32 4294901760, %v4466_v51 }
 0x1c6   :  { %3494 = vmatprep.mubr.f32.mxu1 %v17113_v14  ;;  %3696 = vmatprep.mubr.f32.mxu0 %v3024_v59  ;;  %v18669_v14 = vld [vmem:[#allocation26_spill] sm:$0xff]  ;;  %v18671_v59 = vmov 0.0|0.0  }
 0x1c7   :  { %14980 = vmatpush3.bf16.msra.mxu1 %v14979_v24  ;;  %15020 = vmatpush3.bf16.msra.mxu0 %v16838_v30  ;;  %v4482_v30 = vand.u32 4294901760, %v4467_v15  ;;  %v4559_v12 = vsub.f32 %v4466_v51, %v4479_v32 }
 0x1c8   :  { %14982 = vmatprep.subr.bf16.mxu1 %v14981_v47  ;;  %15022 = vmatprep.subr.bf16.mxu0 %v16849_v42  ;;  %v4468_v42 = vld [vmem:[%s18406_s1 + $0xc0] sm:$0xff] }
 0x1c9   :  { %3497 = vmatmul.mubr.f32.gmra.mrb[48].mxu1 %v17102_v58  ;;  %3700 = vmatmul.mubr.f32.gmra.mrb[46].mxu0 %v3030_v22  ;;  %v4469_v58 = vld [vmem:[%s18406_s1 + $0xd8] sm:$0xff]  ;;  %v18670_v22 = vld [vmem:[#allocation27_spill] sm:$0xff]  ;;  %v4485_v34 = vand.u32 4294901760, %v4468_v42  ;;  %v4566_v13 = vsub.f32 %v4467_v15, %v4482_v30  ;;  %v4560_v56 = vand.u32 4294901760, %v4559_v12 }
 0x1ca   :  { %3503 = vmatprep.mubr.f32.mxu1 %v17143_v11  ;;  %4019 = vmatprep.mubr.f32.mxu0 %v18668_v46  ;;  %v18672_v11 = vld [vmem:[#allocation31_spill] sm:$0xff]  ;;  %v4488_v52 = vand.u32 4294901760, %v4469_v58 }
 0x1cb   :  { %14984 = vmatpush3.bf16.msra.mxu1 %v18669_v14  ;;  %15024 = vmatpush3.bf16.msra.mxu0 %v16851_v1  ;;  %v17331_v1 = vpack.c.bf16 %v4482_v30, %v4479_v32  ;;  %v4567_v5 = vand.u32 4294901760, %v4566_v13  ;;  %v4573_v16 = vsub.f32 %v4468_v42, %v4485_v34  ;;  %v4561_v48 = vsub.f32 %v4559_v12, %v4560_v56 }
 0x1cc   :  { %14986 = vmatprep.subr.bf16.mxu1 %v18670_v22  ;;  %15043 = vmatprep.subr.bf16.mxu0 %v18671_v59  ;;  %v4580_v23 = vsub.f32 %v4469_v58, %v4488_v52 }
 0x1cd   :  { %3506 = vmatmul.mubr.f32.gmra.mrb[50].mxu1 %v17132_v57  ;;  %4116 = vrot.lane.b32.xlu1 %v2772_v26, %s15827_s11  ;;  %v18676_v57 = vld [vmem:[#allocation33_spill] sm:$0xff]  ;;  %v4568_v61 = vsub.f32 %v4566_v13, %v4567_v5  ;;  %v4574_v2 = vand.u32 4294901760, %v4573_v16  ;;  %v4562_v49 = vand.u32 4294901760, %v4561_v48  ;;  %v17413_v20 = vpack.c.bf16 %v4567_v5, %v4560_v56 }
 0x1ce   :  { %4021 = vmatmul.mubr.f32.vlgmr.msra.gmra.mrb[48].mxu0 %v18672_v11  ;;  %3512 = vmatprep.mubr.f32.mxu1 %v17172_v25  ;;  %v17341_v25 = vpack.c.bf16 %v4488_v52, %v4485_v34  ;;  %v4581_v41 = vand.u32 4294901760, %v4580_v23  ;;  %v17407_v7 = vpack.c.bf16 %v4580_v23, %v4573_v16 }
 0x1cf   :  { %14988 = vmatpush3.bf16.msra.mxu1 %v18673_v44  ;;  %4026 = vmatprep.mubr.f32.mxu0 %v18674_v38  ;;  %v4569_v36 = vand.u32 4294901760, %v4568_v61  ;;  %v4575_v53 = vsub.f32 %v4573_v16, %v4574_v2 }
 0x1d0   :  { %14990 = vmatprep.subr.bf16.mxu1 %v18675_v62  ;;  %15045 = vmatpush3.bf16.msra.mxu0 %v17331_v1  ;;  %v4582_v29 = vsub.f32 %v4580_v23, %v4581_v41  ;;  %v17418_v40 = vpack.c.bf16 %v4581_v41, %v4574_v2 }
 0x1d1   :  { %3515 = vmatmul.mubr.f32.gmra.mrb[52].mxu1 %v17162_v35  ;;  %15046 = vmatprep.subr.bf16.mxu0 %v18671_v59  ;;  %v18679_v35 = vld [vmem:[#allocation35_spill] sm:$0xff]  ;;  %v4576_v45 = vand.u32 4294901760, %v4575_v53 }
 0x1d2   :  { %4028 = vmatmul.mubr.f32.gmra.mrb[50].mxu0 %v18676_v57  ;;  %3866 = vmatprep.mubr.f32.mxu1 %v18668_v46 }
 0x1d3   :  { %14992 = vmatpush3.bf16.msra.mxu1 %v18677_v55  ;;  %4033 = vmatprep.mubr.f32.mxu0 %v18678_v9 }
 0x1d4   :  { %15025 = vmatprep.subr.bf16.mxu1 %v18671_v59  ;;  %15048 = vmatpush3.bf16.msra.mxu0 %v17341_v25 }
 0x1d5   :  { %15055 = vmatprep.subr.bf16.mxu0 %v18671_v59  ;;  %4146 = vrot.lane.b32.xlu0 %v12533_v60, %s15827_s11 }
 0x1d6   :  { %3868 = vmatmul.mubr.f32.vlgmr.msra.gmra.mrb[54].mxu1 %v18672_v11  ;;  %4035 = vmatmul.mubr.f32.gmra.mrb[52].mxu0 %v18679_v35 }
 0x1d7   :  { %3873 = vmatprep.mubr.f32.mxu1 %v18674_v38  ;;  %4040 = vmatprep.mubr.f32.mxu0 %v18680_v39 }
 0x1d8   :  { %15027 = vmatpush3.bf16.msra.mxu1 %v17331_v1 }
 0x1d9   :  { %15028 = vmatprep.subr.bf16.mxu1 %v18671_v59  ;;  %4148 = vrot.lane.b32.xlu0 %v12534_v50, %s15827_s11 }
 0x1da   :  { %3875 = vmatmul.mubr.f32.gmra.mrb[56].mxu1 %v18676_v57  ;;  %4042 = vmatmul.mubr.f32.gmra.mrb[54].mxu0 %v18681_v33 }
 0x1db   :  { %3880 = vmatprep.mubr.f32.mxu1 %v18678_v9  ;;  %4047 = vmatprep.mubr.f32.mxu0 %v18682_v3 }
 0x1dc   :  { %15030 = vmatpush3.bf16.msra.mxu1 %v17341_v25 }
 0x1dd   :  { %15031 = vmatprep.subr.bf16.mxu1 %v18671_v59  ;;  %4150 = vrot.lane.b32.xlu0 %v12535_v18, %s15827_s11 }
 0x1de   :  { %3882 = vmatmul.mubr.f32.gmra.mrb[58].mxu1 %v18679_v35  ;;  %4049 = vmatmul.mubr.f32.gmra.mrb[56].mxu0 %v18683_v6 }
 0x1df   :  { %3887 = vmatprep.mubr.f32.mxu1 %v18680_v39  ;;  %4054 = vmatprep.mubr.f32.mxu0 %v18684_v10 }
 0x1e2   :  { %3889 = vmatmul.mubr.f32.gmra.mrb[60].mxu1 %v18681_v33  ;;  %4056 = vmatmul.mubr.f32.gmra.mrb[58].mxu0 %v18685_v37 }
 0x1e3   :  { %3894 = vmatprep.mubr.f32.mxu1 %v18682_v3  ;;  %4061 = vmatprep.mubr.f32.mxu0 %v17124_v19 }
 0x1e6   :  { %3896 = vmatmul.mubr.f32.gmra.mrb[62].mxu1 %v18683_v6  ;;  %4063 = vmatmul.mubr.f32.gmra.mrb[60].mxu0 %v18686_v21 }
 0x1e7   :  { %3901 = vmatprep.mubr.f32.mxu1 %v18684_v10  ;;  %4068 = vmatprep.mubr.f32.mxu0 %v17154_v54 }
 0x1ea   :  { %3903 = vmatmul.mubr.f32.gmra.mrb[64].mxu1 %v18685_v37  ;;  %4070 = vmatmul.mubr.f32.gmra.mrb[62].mxu0 %v17150_v31 }
 0x1eb   :  { %3908 = vmatprep.mubr.f32.mxu1 %v17124_v19  ;;  %13680 = vmatprep.mubr.msk.f32.mxu0 %vm15826_vm2, %v18687_v28  ;;  %v17387_v19 = vpack.c.bf16 %v4569_v36, %v4562_v49 }
 0x1ee   :  { %3910 = vmatmul.mubr.f32.gmra.mrb[66].mxu1 %v18686_v21  ;;  %13681 = vmatmul.mubr.f32.vlgmr.msra.gmra.mrb[64].mxu0 %v18687_v28 }
 0x1ef   :  { %3915 = vmatprep.mubr.f32.mxu1 %v17154_v54  ;;  %15057 = vmatpush3.bf16.msra.mxu0 %v17331_v1  ;;  %v4583_v54 = vand.u32 4294901760, %v4582_v29 }
 0x1f0   :  { %15058 = vmatprep.subr.bf16.mxu0 %v18671_v59  ;;  %13702 = vmatprep.mubr.msk.f32.mxu0 %vm15826_vm2, %v18687_v28 }
 0x1f1   :  { %v17394_v17 = vpack.c.bf16 %v4583_v54, %v4576_v45 }
 0x1f2   :  { %3917 = vmatmul.mubr.f32.gmra.mrb[68].mxu1 %v17150_v31  ;;  %v17402_v31 = vpack.c.bf16 %v4566_v13, %v4559_v12 }
 0x1f3   :  { %13647 = vmatprep.mubr.msk.f32.mxu1 %vm15826_vm2, %v18687_v28  ;;  %15060 = vmatpush3.bf16.msra.mxu0 %v17341_v25 }
 0x1f4   :  { %15067 = vmatprep.subr.bf16.mxu0 %v18671_v59 }
 0x1f6   :  { %13648 = vmatmul.mubr.f32.vlgmr.msra.gmra.mrb[70].mxu1 %v18687_v28  ;;  %13703 = vmatmul.mubr.f32.vlgmr.msra.gmra.mrb[66].mxu0 %v18687_v28 }
 0x1f7   :  { %15033 = vmatpush3.bf16.msra.mxu1 %v17387_v19  ;;  %13658 = vmatprep.mubr.msk.f32.mxu1 %vm15826_vm2, %v18687_v28 }
 0x1f8   :  { %15034 = vmatprep.subr.bf16.mxu1 %v18671_v59  ;;  %13724 = vmatprep.mubr.msk.f32.mxu0 %vm15826_vm2, %v18687_v28 }
 0x1fb   :  { %15036 = vmatpush3.bf16.msra.mxu1 %v17394_v17 }
 0x1fc   :  { %15037 = vmatprep.subr.bf16.mxu1 %v18671_v59 }
 0x1fe   :  { %13659 = vmatmul.mubr.f32.vlgmr.msra.gmra.mrb[72].mxu1 %v18687_v28 }
 0x1ff   :  { %15039 = vmatpush3.bf16.msra.mxu1 %v17402_v31  ;;  %13669 = vmatprep.mubr.msk.f32.mxu1 %vm15826_vm2, %v18687_v28 }
 0x200   :  { %15040 = vmatprep.subr.bf16.mxu1 %v18671_v59 }
 0x203   :  { %15042 = vmatpush3.bf16.msra.mxu1 %v17407_v7 }
 0x204   :  { %15049 = vmatprep.subr.bf16.mxu1 %v18671_v59 }
 0x206   :  { %13670 = vmatmul.mubr.f32.vlgmr.msra.gmra.mrb[74].mxu1 %v18687_v28 }
 0x207   :  { %15051 = vmatpush3.bf16.msra.mxu1 %v17413_v20  ;;  %13691 = vmatprep.mubr.msk.f32.mxu1 %vm15826_vm2, %v18687_v28 }
 0x208   :  { %15052 = vmatprep.subr.bf16.mxu1 %v18671_v59 }
 0x20b   :  { %15054 = vmatpush3.bf16.msra.mxu1 %v17418_v40 }
 0x20c   :  { %15061 = vmatprep.subr.bf16.mxu1 %v18671_v59 }
 0x20e   :  { %13692 = vmatmul.mubr.f32.vlgmr.msra.gmra.mrb[76].mxu1 %v18687_v28 }
 0x20f   :  { %13713 = vmatprep.mubr.msk.f32.mxu1 %vm15826_vm2, %v18687_v28 }
 0x25f   :  { %v12749_v8 = vpop.f32.mrb[16].mxu0 }
 0x260   :  { %v12750_v63 = vpop.f32.mrb[17].mxu0 }
 0x261   :  { %v12751_v24 = vadd.f32 %v12750_v63, %v12749_v8 }
 0x263   :  { %v12752_v27 = vpop.f32.mrb[18].mxu0 }
 0x264   :  { %v12753_v4 = vpop.f32.mrb[19].mxu0 }
 0x265   :  { %v12754_v47 = vadd.f32 %v12753_v4, %v12752_v27 }
 0x267   :  { %v12755_v0 = vpop.f32.mrb[20].mxu0 }
 0x268   :  { %v12693_v43 = vpop.f32.mrb[22].mxu1  ;;  %v12756_v15 = vpop.f32.mrb[21].mxu0 }
 0x269   :  { %v12694_v51 = vpop.f32.mrb[23].mxu1  ;;  %v12757_v46 = vadd.f32 %v12756_v15, %v12755_v0 }
 0x26a   :  { %v12695_v26 = vadd.f32 %v12694_v51, %v12693_v43 }
 0x26c   :  { %v3267_v32 = vadd.f32 %v12751_v24, %v12695_v26  ;;  %v12696_v30 = vpop.f32.mrb[24].mxu1  ;;  %v12758_v14 = vpop.f32.mrb[22].mxu0 }
 0x26d   :  { %v12697_v42 = vpop.f32.mrb[25].mxu1  ;;  %v12759_v58 = vpop.f32.mrb[23].mxu0 }
 0x26e   :  { %v12698_v22 = vadd.f32 %v12697_v42, %v12696_v30  ;;  %v12760_v11 = vadd.f32 %v12759_v58, %v12758_v14 }
 0x270   :  { %v3274_v34 = vadd.f32 %v12754_v47, %v12698_v22  ;;  %v12699_v52 = vpop.f32.mrb[26].mxu1  ;;  %v12761_v44 = vpop.f32.mrb[24].mxu0 }
 0x271   :  { %v12700_v38 = vpop.f32.mrb[27].mxu1  ;;  %v12762_v62 = vpop.f32.mrb[25].mxu0 }
 0x272   :  { %v12701_v57 = vadd.f32 %v12700_v38, %v12699_v52  ;;  %v12763_v55 = vadd.f32 %v12762_v62, %v12761_v44 }
 0x274   :  { %v3281_v9 = vadd.f32 %v12757_v46, %v12701_v57  ;;  %v12702_v35 = vpop.f32.mrb[28].mxu1  ;;  %v12764_v39 = vpop.f32.mrb[26].mxu0 }
 0x275   :  { %v12703_v33 = vpop.f32.mrb[29].mxu1  ;;  %v12765_v3 = vpop.f32.mrb[27].mxu0 }
 0x276   :  { %v12704_v6 = vadd.f32 %v12703_v33, %v12702_v35  ;;  %v12766_v10 = vadd.f32 %v12765_v3, %v12764_v39 }
 0x278   :  { %v3288_v37 = vadd.f32 %v12760_v11, %v12704_v6  ;;  %v12705_v12 = vpop.f32.mrb[30].mxu1  ;;  %v12767_v13 = vpop.f32.mrb[28].mxu0 }
 0x279   :  { %v12706_v21 = vpop.f32.mrb[31].mxu1  ;;  %v12768_v56 = vpop.f32.mrb[29].mxu0 }
 0x27a   :  { %v12707_v5 = vadd.f32 %v12706_v21, %v12705_v12  ;;  %v12769_v16 = vadd.f32 %v12768_v56, %v12767_v13 }
 0x27c   :  { %v3295_v23 = vadd.f32 %v12763_v55, %v12707_v5  ;;  %v12708_v48 = vpop.f32.mrb[32].mxu1  ;;  %v12770_v61 = vpop.f32.mrb[30].mxu0 }
 0x27d   :  { %v12709_v2 = vpop.f32.mrb[33].mxu1  ;;  %v12771_v41 = vpop.f32.mrb[31].mxu0 }
 0x27e   :  { %v12710_v49 = vadd.f32 %v12709_v2, %v12708_v48  ;;  %v12772_v36 = vadd.f32 %v12771_v41, %v12770_v61 }
 0x280   :  { %v3302_v53 = vadd.f32 %v12766_v10, %v12710_v49  ;;  %v12711_v29 = vpop.f32.mrb[34].mxu1  ;;  %v12861_v45 = vpop.f32.mrb[32].mxu0 }
 0x281   :  { %v12712_v54 = vpop.f32.mrb[35].mxu1  ;;  %v12862_v60 = vpop.f32.mrb[33].mxu0 }
 0x282   :  { %v12713_v50 = vadd.f32 %v12712_v54, %v12711_v29  ;;  %v12863_v18 = vadd.f32 %v12862_v60, %v12861_v45 }
 0x284   :  { %v3309_v8 = vadd.f32 %v12769_v16, %v12713_v50  ;;  %v12714_v63 = vpop.f32.mrb[36].mxu1  ;;  %v12864_v24 = vpop.f32.mrb[34].mxu0 }
 0x285   :  { %v12715_v27 = vpop.f32.mrb[37].mxu1  ;;  %v12865_v4 = vpop.f32.mrb[35].mxu0 }
 0x286   :  { %v12716_v47 = vadd.f32 %v12715_v27, %v12714_v63  ;;  %v12866_v43 = vadd.f32 %v12865_v4, %v12864_v24 }
 0x288   :  { %v17440_v0 = vadd.f32 %v12772_v36, %v12716_v47  ;;  %v12805_v51 = vpop.f32.mrb[38].mxu1  ;;  %v12867_v15 = vpop.f32.mrb[36].mxu0 }
 0x289   :  { %v12806_v26 = vpop.f32.mrb[39].mxu1  ;;  %v12868_v46 = vpop.f32.mrb[37].mxu0 }
 0x28a   :  { %v12807_v30 = vadd.f32 %v12806_v26, %v12805_v51  ;;  %v12869_v14 = vadd.f32 %v12868_v46, %v12867_v15 }
 0x28c   :  { %v3454_v42 = vadd.f32 %v12807_v30, %v3267_v32  ;;  %v12808_v58 = vpop.f32.mrb[40].mxu1  ;;  %v12870_v22 = vpop.f32.mrb[38].mxu0 }
 0x28d   :  { %v12809_v11 = vpop.f32.mrb[41].mxu1  ;;  %v12871_v52 = vpop.f32.mrb[39].mxu0 }
 0x28e   :  { %v12810_v44 = vadd.f32 %v12809_v11, %v12808_v58  ;;  %v12872_v38 = vadd.f32 %v12871_v52, %v12870_v22  ;;  %v3625_v62 = vadd.f32 %v12863_v18, %v3454_v42 }
 0x290   :  { %v3463_v57 = vadd.f32 %v12810_v44, %v3274_v34  ;;  %v12811_v55 = vpop.f32.mrb[42].mxu1  ;;  %v12873_v35 = vpop.f32.mrb[40].mxu0 }
 0x291   :  { %v12812_v39 = vpop.f32.mrb[43].mxu1  ;;  %v12874_v33 = vpop.f32.mrb[41].mxu0 }
 0x292   :  { %v12813_v3 = vadd.f32 %v12812_v39, %v12811_v55  ;;  %v12875_v6 = vadd.f32 %v12874_v33, %v12873_v35  ;;  %v3636_v10 = vadd.f32 %v12866_v43, %v3463_v57 }
 0x294   :  { %v3472_v12 = vadd.f32 %v12813_v3, %v3281_v9  ;;  %v12814_v13 = vpop.f32.mrb[44].mxu1  ;;  %v12876_v21 = vpop.f32.mrb[42].mxu0 }
 0x295   :  { %v12815_v56 = vpop.f32.mrb[45].mxu1  ;;  %v12877_v32 = vpop.f32.mrb[43].mxu0 }
 0x296   :  { %v12816_v5 = vadd.f32 %v12815_v56, %v12814_v13  ;;  %v12878_v16 = vadd.f32 %v12877_v32, %v12876_v21  ;;  %v3647_v48 = vadd.f32 %v12869_v14, %v3472_v12 }
 0x298   :  { %v3481_v61 = vadd.f32 %v12816_v5, %v3288_v37  ;;  %v12817_v2 = vpop.f32.mrb[46].mxu1  ;;  %v12879_v41 = vpop.f32.mrb[44].mxu0 }
 0x299   :  { %v12818_v49 = vpop.f32.mrb[47].mxu1  ;;  %v12880_v34 = vpop.f32.mrb[45].mxu0 }
 0x29a   :  { %v12819_v36 = vadd.f32 %v12818_v49, %v12817_v2  ;;  %v12881_v29 = vadd.f32 %v12880_v34, %v12879_v41  ;;  %v3658_v45 = vadd.f32 %v12872_v38, %v3481_v61 }
 0x29c   :  { %v3490_v54 = vadd.f32 %v12819_v36, %v3295_v23  ;;  %v12820_v60 = vpop.f32.mrb[48].mxu1  ;;  %v12882_v50 = vpop.f32.mrb[46].mxu0 }
 0x29d   :  { %v12821_v18 = vpop.f32.mrb[49].mxu1  ;;  %v12883_v9 = vpop.f32.mrb[47].mxu0 }
 0x29e   :  { %v12822_v63 = vadd.f32 %v12821_v18, %v12820_v60  ;;  %v12884_v24 = vadd.f32 %v12883_v9, %v12882_v50  ;;  %v3669_v27 = vadd.f32 %v12875_v6, %v3490_v54 }
 0x2a0   :  { %v3499_v4 = vadd.f32 %v12822_v63, %v3302_v53  ;;  %v12823_v47 = vpop.f32.mrb[50].mxu1 }
 0x2a1   :  { %v12973_v43 = vpop.f32.mrb[48].mxu0  ;;  %v12824_v51 = vpop.f32.mrb[51].mxu1 }
 0x2a2   :  { %v12825_v37 = vadd.f32 %v12824_v51, %v12823_v47  ;;  %v12974_v15 = vpop.f32.mrb[49].mxu0  ;;  %v17442_v26 = vadd.f32 %v12878_v16, %v3499_v4 }
 0x2a3   :  { %v12975_v46 = vadd.f32 %v12974_v15, %v12973_v43 }
 0x2a4   :  { %v3508_v30 = vadd.f32 %v12825_v37, %v3309_v8  ;;  %v12826_v14 = vpop.f32.mrb[52].mxu1 }
 0x2a5   :  { %v12976_v42 = vpop.f32.mrb[50].mxu0  ;;  %v12827_v23 = vpop.f32.mrb[53].mxu1 }
 0x2a6   :  { %v12828_v58 = vadd.f32 %v12827_v23, %v12826_v14  ;;  %v12977_v22 = vpop.f32.mrb[51].mxu0  ;;  %v17444_v11 = vadd.f32 %v12881_v29, %v3508_v30 }
 0x2a7   :  { %v12978_v52 = vadd.f32 %v12977_v22, %v12976_v42 }
 0x2a8   :  { %v3517_v44 = vadd.f32 %v12828_v58, %v17440_v0 }
 0x2a9   :  { %v12917_v53 = vpop.f32.mrb[54].mxu1  ;;  %v12979_v38 = vpop.f32.mrb[52].mxu0 }
 0x2aa   :  { %v12918_v57 = vpop.f32.mrb[55].mxu1  ;;  %v12980_v55 = vpop.f32.mrb[53].mxu0  ;;  %v17447_v35 = vadd.f32 %v12884_v24, %v3517_v44 }
 0x2ab   :  { %v12919_v39 = vadd.f32 %v12918_v57, %v12917_v53  ;;  %v12981_v33 = vadd.f32 %v12980_v55, %v12979_v38  ;;  %v12537_v53 = vld [vmem:[%s18407_s0 + $0x68] sm:$0xff] }
 0x2ad   :  { %v3870_v3 = vadd.f32 %v12919_v39, %v3625_v62  ;;  %v12920_v8 = vpop.f32.mrb[56].mxu1  ;;  %v12982_v6 = vpop.f32.mrb[54].mxu0 }
 0x2ae   :  { %v12921_v12 = vpop.f32.mrb[57].mxu1  ;;  %v12983_v13 = vpop.f32.mrb[55].mxu0 }
 0x2af   :  { %v12922_v21 = vadd.f32 %v12921_v12, %v12920_v8  ;;  %v12984_v56 = vadd.f32 %v12983_v13, %v12982_v6  ;;  %v4023_v32 = vadd.f32 %v12975_v46, %v3870_v3  ;;  %v12539_v3 = vld [vmem:[%s18407_s0 + $0x78] sm:$0xff] }
 0x2b1   :  { %v3877_v5 = vadd.f32 %v12922_v21, %v3636_v10  ;;  %v12923_v16 = vpop.f32.mrb[58].mxu1  ;;  %v12985_v61 = vpop.f32.mrb[56].mxu0  ;;  %4083 = vrot.lane.b32.xlu0 %v4023_v32, %s15827_s11  ;;  %v21_v32 = vld [vmem:[%s18406_s1 + $0x152] ss:$0 sm:$0xff] }
 0x2b2   :  { %v12924_v0 = vpop.f32.mrb[59].mxu1  ;;  %v12986_v2 = vpop.f32.mrb[57].mxu0 }
 0x2b3   :  { %v12925_v41 = vadd.f32 %v12924_v0, %v12923_v16  ;;  %v12987_v49 = vadd.f32 %v12986_v2, %v12985_v61  ;;  %v4030_v34 = vadd.f32 %v12978_v52, %v3877_v5 }
 0x2b5   :  { %v3884_v36 = vadd.f32 %v12925_v41, %v3647_v48  ;;  %v12926_v29 = vpop.f32.mrb[60].mxu1  ;;  %v12988_v62 = vpop.f32.mrb[58].mxu0  ;;  %4085 = vrot.lane.b32.xlu0 %v4030_v34, %s15827_s11 }
 0x2b6   :  { %v12927_v54 = vpop.f32.mrb[61].mxu1  ;;  %v12989_v60 = vpop.f32.mrb[59].mxu0 }
 0x2b7   :  { %v12928_v50 = vadd.f32 %v12927_v54, %v12926_v29  ;;  %v12990_v18 = vadd.f32 %v12989_v60, %v12988_v62  ;;  %v4037_v9 = vadd.f32 %v12981_v33, %v3884_v36  ;;  %v4470_v29 = vld [vmem:[%s18406_s1 + $0xf0] sm:$0xff]  ;;  %v4471_v62 = vld [vmem:[%s18406_s1 + $0x108] sm:$0xff]  ;;  %v4472_v54 = vld [vmem:[%s18406_s1 + $0x120] sm:$0xff] }
 0x2b9   :  { %v3891_v10 = vadd.f32 %v12928_v50, %v3658_v45  ;;  %v12929_v63 = vpop.f32.mrb[62].mxu1  ;;  %v12991_v24 = vpop.f32.mrb[60].mxu0  ;;  %4087 = vrot.lane.b32.xlu1 %v4037_v9, %s15827_s11  ;;  %v12536_v45 = vld [vmem:[%s18407_s0 + $0x60] sm:$0xff]  ;;  %v4983_v9 = vand.u32 4294901760, %v4471_v62 }
 0x2ba   :  { %v12930_v4 = vpop.f32.mrb[63].mxu1  ;;  %v12992_v47 = vpop.f32.mrb[61].mxu0 }
 0x2bb   :  { %v12931_v43 = vadd.f32 %v12930_v4, %v12929_v63  ;;  %v12993_v51 = vadd.f32 %v12992_v47, %v12991_v24  ;;  %v4044_v37 = vadd.f32 %v12984_v56, %v3891_v10  ;;  %v4473_v10 = vld [vmem:[%s18406_s1 + $0x138] sm:$0xff]  ;;  %v4986_v63 = vand.u32 4294901760, %v4472_v54 }
 0x2bc   :  { %v4989_v24 = vand.u32 4294901760, %v4473_v10 }
 0x2bd   :  { %v3898_v48 = vadd.f32 %v12931_v43, %v3669_v27  ;;  %v12932_v15 = vpop.f32.mrb[64].mxu1  ;;  %v12994_v46 = vpop.f32.mrb[62].mxu0  ;;  %4089 = vrot.lane.b32.xlu0 %v4044_v37, %s15827_s11  ;;  %v4474_v37 = vld [vmem:[#allocation2] sm:$0xff] }
 0x2be   :  { %v12933_v30 = vpop.f32.mrb[65].mxu1  ;;  %v12995_v14 = vpop.f32.mrb[63].mxu0 }
 0x2bf   :  { %v12934_v42 = vadd.f32 %v12933_v30, %v12932_v15  ;;  %v12996_v23 = vadd.f32 %v12995_v14, %v12994_v46  ;;  %v4051_v58 = vadd.f32 %v12987_v49, %v3898_v48  ;;  %v5074_v48 = vsub.f32 %v4472_v54, %v4986_v63 }
 0x2c0   :  { %v5081_v15 = vsub.f32 %v4473_v10, %v4989_v24 }
 0x2c1   :  { %v3905_v22 = vadd.f32 %v12934_v42, %v17442_v26  ;;  %v12935_v52 = vpop.f32.mrb[66].mxu1  ;;  %4091 = vrot.lane.b32.xlu1 %v4051_v58, %s15827_s11  ;;  %4152 = vrot.lane.b32.xlu0 %v12536_v45, %s15827_s11  ;;  %v4801_v27 = vpop.f32.mrb[64].mxu0  ;;  %v17494_v45 = vpack.c.bf16 %v4989_v24, %v4986_v63  ;;  %v5075_v42 = vand.u32 4294901760, %v5074_v48 }
 0x2c2   :  { %v12936_v44 = vpop.f32.mrb[67].mxu1  ;;  %v13682_v38 = vpop.f32.mrb[65].mxu0 }
 0x2c3   :  { %v12937_v57 = vadd.f32 %v12936_v44, %v12935_v52  ;;  %v4058_v55 = vadd.f32 %v12990_v18, %v3905_v22  ;;  %v4980_v18 = vand.u32 4294901760, %v4470_v29 }
 0x2c5   :  { %v3912_v39 = vadd.f32 %v12937_v57, %v17444_v11  ;;  %v12938_v33 = vpop.f32.mrb[68].mxu1  ;;  %4093 = vrot.lane.b32.xlu1 %v4058_v55, %s15827_s11  ;;  %4154 = vrot.lane.b32.xlu0 %v12537_v53, %s15827_s11  ;;  %v17492_v47 = vpack.c.bf16 %v4983_v9, %v4980_v18  ;;  %v5060_v43 = vsub.f32 %v4470_v29, %v4980_v18  ;;  %v18691_v18 = vld [vmem:[#allocation20_spill] sm:$0xff] }
 0x2c6   :  { %v12939_v26 = vpop.f32.mrb[69].mxu1 }
 0x2c7   :  { %v12940_v8 = vadd.f32 %v12939_v26, %v12938_v33  ;;  %v4065_v6 = vadd.f32 %v12993_v51, %v3912_v39  ;;  %v5067_v51 = vsub.f32 %v4471_v62, %v4983_v9  ;;  %v5061_v30 = vand.u32 4294901760, %v5060_v43  ;;  %15063 = vmatpush3.bf16.msra.mxu1 %v17492_v47  ;;  %v18690_v62 = vld [vmem:[#allocation21_spill] sm:$0xff] }
 0x2c8   :  { %15064 = vmatprep.subr.bf16.mxu1 %v18671_v59 }
 0x2c9   :  { %v3919_v12 = vadd.f32 %v12940_v8, %v17447_v35  ;;  %4095 = vrot.lane.b32.xlu1 %v4065_v6, %s15827_s11  ;;  %4158 = vrot.lane.b32.xlu0 %v12539_v3, %s15827_s11  ;;  %v4553_v13 = vpop.f32.mrb[70].mxu1  ;;  %v4959_v11 = vpop.f32.mrb[66].mxu0  ;;  %v12538_v35 = vld [vmem:[%s18407_s0 + $0x70] sm:$0xff]  ;;  %v5068_v14 = vand.u32 4294901760, %v5067_v51  ;;  %v5062_v22 = vsub.f32 %v5060_v43, %v5061_v30 }
 0x2ca   :  { %v13649_v21 = vpop.f32.mrb[71].mxu1  ;;  %v13704_v56 = vpop.f32.mrb[67].mxu0 }
 0x2cb   :  { %v4072_v5 = vadd.f32 %v12996_v23, %v3919_v12  ;;  %v5082_v23 = vand.u32 4294901760, %v5081_v15  ;;  %v5069_v52 = vsub.f32 %v5067_v51, %v5068_v14  ;;  %v5063_v53 = vand.u32 4294901760, %v5062_v22  ;;  %15066 = vmatpush3.bf16.msra.mxu1 %v17494_v45 }
 0x2cc   :  { %15073 = vmatprep.subr.bf16.mxu1 %v18671_v59  ;;  %v17511_v12 = vpack.c.bf16 %v5067_v51, %v5060_v43  ;;  %v17520_v21 = vpack.c.bf16 %v5068_v14, %v5061_v30 }
 0x2cd   :  { %4097 = vrot.lane.b32.xlu1 %v4072_v5, %s15827_s11  ;;  %4315 = vrot.lane.b32.xlu0 %v21_v32, %s15827_s11  ;;  %v5083_v44 = vsub.f32 %v5081_v15, %v5082_v23  ;;  %v5070_v38 = vand.u32 4294901760, %v5069_v52  ;;  %v17522_v56 = vpack.c.bf16 %v5082_v23, %v5075_v42  ;;  %v4147_v32 = vpop.permute.xlu0 %4146  ;;  %v18693_v23 = vld [vmem:[#allocation22_spill] sm:$0xff] }
 0x2cf   :  { %v5084_v55 = vand.u32 4294901760, %v5083_v44  ;;  %v17500_v39 = vpack.c.bf16 %v5070_v38, %v5063_v53 }
 0x2d1   :  { %4156 = vrot.lane.b32.xlu1 %v12538_v35, %s15827_s11  ;;  %v4644_v16 = vpop.f32.mrb[72].mxu1  ;;  %15069 = vmatpush3.bf16.msra.mxu0 %v17500_v39  ;;  %v4149_v5 = vpop.permute.xlu0 %4148 }
 0x2d2   :  { %v4645_v61 = vadd.f32 %v4644_v16, %v4553_v13  ;;  %v13660_v0 = vpop.f32.mrb[73].mxu1  ;;  %15070 = vmatprep.subr.bf16.mxu0 %v18671_v59  ;;  %v17514_v13 = vpack.c.bf16 %v5081_v15, %v5074_v48  ;;  %v4145_v16 = vpop.permute.xlu1 %4144 }
 0x2d5   :  { %v4151_v35 = vpop.permute.xlu0 %4150 }
 0x2d6   :  { %v4117_v0 = vpop.permute.xlu1 %4116 }
 0x2d9   :  { %v4724_v2 = vpop.f32.mrb[74].mxu1 }
 0x2da   :  { %v4725_v41 = vadd.f32 %v4724_v2, %v4645_v61  ;;  %v13671_v49 = vpop.f32.mrb[75].mxu1 }
 0x2db   :  { %v18688_v49 = vld [vmem:[#allocation18_spill] sm:$0xff] }
 0x2dc   :  { %v4802_v34 = vadd.f32 %v4801_v27, %v4725_v41  ;;  %v5076_v27 = vsub.f32 %v5074_v48, %v5075_v42 }
 0x2de   :  { %v5077_v57 = vand.u32 4294901760, %v5076_v27 }
 0x2e0   :  { %v17503_v33 = vpack.c.bf16 %v5084_v55, %v5077_v57 }
 0x2e1   :  { %v4884_v36 = vpop.f32.mrb[76].mxu1 }
 0x2e2   :  { %v4885_v60 = vadd.f32 %v4884_v36, %v4802_v34  ;;  %v13693_v50 = vpop.f32.mrb[77].mxu1  ;;  %15072 = vmatpush3.bf16.msra.mxu0 %v17503_v33  ;;  %v18689_v36 = vld [vmem:[#allocation19_spill] sm:$0xff] }
 0x2e3   :  { %15079 = vmatprep.subr.bf16.mxu0 %v18671_v59 }
 0x2e4   :  { %v4960_v4 = vadd.f32 %v4959_v11, %v4885_v60  ;;  %v22_v11 = vld [vmem:[%s18406_s1 + $0x153] ss:$0 sm:$0xff] }
 0x2e6   :  { %v4963_v46 = vadd.f32 %v4960_v4, %v4474_v37  ;;  %v18692_v37 = vld [vmem:[#allocation23_spill] sm:$0xff] }
 0x2e8   :  { %v12548_v58 = vmul.f32 -1.442695, %v4963_v46 }
 0x2ea   :  { %15740 = vpow2.f32 %v12548_v58 }
 0x2f4   :  { %v15741_v26 = vpop.eup %15740 }
 0x2f5   :  { %v4967_v3 = vadd.f32 1.0, %v15741_v26 }
 0x2f7   :  { %15742 = vrcp.f32 %v4967_v3 }
 0x301   :  { %v17508_v8 = vpop.eup %15742 }
 0x302   :  { %v4973_v6 = vmul.f32 0.0, %v17508_v8 }
 0x304   :  { %4975 = vrot.lane.b32.xlu1 %v4973_v6, %s15827_s11 }
 0x308   :  { %4343 = vrot.lane.b32.xlu1 %v22_v11, %s15827_s11 }
 0x323   :  { %v4084_v61 = vpop.permute.xlu0 %4083 }
 0x324   :  { %v4107_v29 = vadd.f32 %v4084_v61, %v18689_v36 }
 0x326   :  { %v17530_v10 = vadd.f32 %v4117_v0, %v4107_v29 }
 0x327   :  { %v4086_v2 = vpop.permute.xlu0 %4085 }
 0x328   :  { %v4108_v34 = vadd.f32 %v18688_v49, %v4086_v2  ;;  %v4168_v15 = vmul.f32 %v4145_v16, %v17530_v10 }
 0x32a   :  { %v17527_v50 = vadd.f32 %v4117_v0, %v4108_v34  ;;  %v4198_v52 = vmul.f32 %v4168_v15, %v4168_v15  ;;  %v4177_v55 = vsel %vm4176_vm4, %v4168_v15, 0.0 }
 0x32b   :  { %v4088_v41 = vpop.permute.xlu1 %4087 }
 0x32c   :  { %v4109_v54 = vadd.f32 %v4088_v41, %v18690_v62  ;;  %v4169_v43 = vmul.f32 %v4147_v32, %v17527_v50  ;;  %v18694_v41 = vld [vmem:[#allocation25_spill] sm:$0xff] }
 0x32e   :  { %v17532_v63 = vadd.f32 %v4117_v0, %v4109_v54  ;;  %v4199_v42 = vmul.f32 %v4169_v43, %v4169_v43  ;;  %v4178_v53 = vsel %vm4176_vm4, %v4169_v43, 0.0  ;;  %v18695_v43 = vld [vmem:[#allocation24_spill] sm:$0xff] }
 0x32f   :  { %v4090_v60 = vpop.permute.xlu0 %4089 }
 0x330   :  { %v4110_v9 = vadd.f32 %v18691_v18, %v4090_v60  ;;  %v4170_v30 = vmul.f32 %v4149_v5, %v17532_v63  ;;  %v4207_v11 = vsel %vm4176_vm4, %v4199_v42, 0.0  ;;  %v4179_v5 = vadd.f32 %v4178_v53, %v4177_v55 }
 0x332   :  { %v17535_v51 = vadd.f32 %v4117_v0, %v4110_v9  ;;  %v4200_v38 = vmul.f32 %v4170_v30, %v4170_v30  ;;  %v4180_v3 = vsel %vm4176_vm4, %v4170_v30, 0.0 }
 0x333   :  { %v4092_v24 = vpop.permute.xlu1 %4091  ;;  %v4153_v4 = vpop.permute.xlu0 %4152  ;;  %v4181_v29 = vadd.f32 %v4180_v3, %v4179_v5 }
 0x334   :  { %v4111_v48 = vadd.f32 %v4092_v24, %v18692_v37  ;;  %v4171_v22 = vmul.f32 %v4151_v35, %v17535_v51  ;;  %v4206_v35 = vsel %vm4176_vm4, %v4198_v52, 0.0  ;;  %v4209_v61 = vsel %vm4176_vm4, %v4200_v38, 0.0 }
 0x335   :  { %v4208_v54 = vadd.f32 %v4207_v11, %v4206_v35 }
 0x336   :  { %v17539_v46 = vadd.f32 %v4117_v0, %v4111_v48  ;;  %v4201_v6 = vmul.f32 %v4171_v22, %v4171_v22  ;;  %v4182_v16 = vsel %vm4176_vm4, %v4171_v22, 0.0 }
 0x337   :  { %v4094_v14 = vpop.permute.xlu1 %4093  ;;  %v4155_v27 = vpop.permute.xlu0 %4154  ;;  %v4183_v15 = vadd.f32 %v4182_v16, %v4181_v29  ;;  %v4210_v30 = vadd.f32 %v4209_v61, %v4208_v54 }
 0x338   :  { %v4112_v58 = vadd.f32 %v18693_v23, %v4094_v14  ;;  %v4172_v57 = vmul.f32 %v4153_v4, %v17539_v46  ;;  %v4211_v9 = vsel %vm4176_vm4, %v4201_v6, 0.0 }
 0x33a   :  { %v17544_v44 = vadd.f32 %v4117_v0, %v4112_v58  ;;  %v4202_v2 = vmul.f32 %v4172_v57, %v4172_v57  ;;  %v4184_v24 = vsel %vm4176_vm4, %v4172_v57, 0.0 }
 0x33b   :  { %v4096_v26 = vpop.permute.xlu1 %4095  ;;  %v4159_v14 = vpop.permute.xlu0 %4158  ;;  %v4185_v53 = vadd.f32 %v4184_v24, %v4183_v15 }
 0x33c   :  { %v4173_v32 = vmul.f32 %v4155_v27, %v17544_v44  ;;  %v4113_v34 = vadd.f32 %v4096_v26, %v18694_v41  ;;  %v4213_v42 = vsel %vm4176_vm4, %v4202_v2, 0.0  ;;  %v4212_v27 = vadd.f32 %v4211_v9, %v4210_v30 }
 0x33e   :  { %v4203_v4 = vmul.f32 %v4173_v32, %v4173_v32  ;;  %v17560_v58 = vadd.f32 %v4117_v0, %v4113_v34  ;;  %v4186_v22 = vsel %vm4176_vm4, %v4173_v32, 0.0  ;;  %v4214_v3 = vadd.f32 %v4213_v42, %v4212_v27 }
 0x33f   :  { %v4098_v60 = vpop.permute.xlu1 %4097  ;;  %v4187_v6 = vadd.f32 %v4186_v22, %v4185_v53 }
 0x340   :  { %v4114_v48 = vadd.f32 %v18695_v43, %v4098_v60  ;;  %v4215_v55 = vsel %vm4176_vm4, %v4203_v4, 0.0 }
 0x341   :  { %v4216_v16 = vadd.f32 %v4215_v55, %v4214_v3 }
 0x342   :  { %v17563_v52 = vadd.f32 %v4117_v0, %v4114_v48 }
 0x343   :  { %v4157_v38 = vpop.permute.xlu1 %4156 }
 0x344   :  { %v4175_v57 = vmul.f32 %v4159_v14, %v17563_v52  ;;  %v4174_v26 = vmul.f32 %v4157_v38, %v17560_v58 }
 0x346   :  { %v4205_v11 = vmul.f32 %v4175_v57, %v4175_v57  ;;  %v4188_v5 = vsel %vm4176_vm4, %v4174_v26, 0.0  ;;  %v4204_v35 = vmul.f32 %v4174_v26, %v4174_v26  ;;  %v4190_v0 = vsel %vm4176_vm4, %v4175_v57, 0.0 }
 0x347   :  { %v4189_v61 = vadd.f32 %v4188_v5, %v4187_v6 }
 0x348   :  { %v4217_v32 = vsel %vm4176_vm4, %v4204_v35, 0.0  ;;  %v4219_v29 = vsel %vm4176_vm4, %v4205_v11, 0.0 }
 0x349   :  { %v4191_v2 = vadd.f32 %v4190_v0, %v4189_v61  ;;  %v4218_v34 = vadd.f32 %v4217_v32, %v4216_v16 }
 0x34b   :  { %v4192_v54 = vrot.slane %v4191_v2, 4  ;;  %v4220_v60 = vadd.f32 %v4219_v29, %v4218_v34 }
 0x34d   :  { %v4193_v9 = vadd.f32 %v4192_v54, %v4191_v2  ;;  %v4221_v24 = vrot.slane %v4220_v60, 4 }
 0x34f   :  { %v4194_v4 = vrot.slane %v4193_v9, 2  ;;  %v4222_v48 = vadd.f32 %v4221_v24, %v4220_v60 }
 0x351   :  { %v4195_v15 = vadd.f32 %v4194_v4, %v4193_v9  ;;  %v4223_v30 = vrot.slane %v4222_v48, 2 }
 0x353   :  { %v4196_v14 = vrot.slane %v4195_v15, 1  ;;  %v4224_v42 = vadd.f32 %v4223_v30, %v4222_v48 }
 0x355   :  { %v4197_v22 = vadd.f32 %v4196_v14, %v4195_v15  ;;  %v4225_v27 = vrot.slane %v4224_v42, 1 }
 0x357   :  { %v4226_v53 = vadd.f32 %v4225_v27, %v4224_v42  ;;  %v4227_v38 = vmul.f32 0.023255814, %v4197_v22 }
 0x359   :  { %v4228_v55 = vmul.f32 0.023255814, %v4226_v53  ;;  %v4229_v57 = vmul.f32 %v4227_v38, %v4227_v38  ;;  %v4232_v11 = vsub.f32 %v17530_v10, %v4227_v38  ;;  %v4233_v5 = vsub.f32 %v17527_v50, %v4227_v38 }
 0x35a   :  { %v4234_v35 = vsub.f32 %v17532_v63, %v4227_v38  ;;  %v4235_v16 = vsub.f32 %v17535_v51, %v4227_v38  ;;  %v4236_v0 = vsub.f32 %v17539_v46, %v4227_v38  ;;  %v4237_v32 = vsub.f32 %v17544_v44, %v4227_v38 }
 0x35b   :  { %v4230_v26 = vsub.f32 %v4228_v55, %v4229_v57  ;;  %v4238_v2 = vsub.f32 %v17560_v58, %v4227_v38  ;;  %v4239_v34 = vsub.f32 %v17563_v52, %v4227_v38 }
 0x35d   :  { %v4231_v3 = vmax.f32 %v4230_v26, 0.0 }
 0x35f   :  { %v4240_v6 = vadd.f32 1e-08, %v4231_v3 }
 0x361   :  { %15744 = vrsqrt.f32 %v4240_v6  ;;  %v17611_v6 = vpop.permute.xlu0 %4315 }
 0x36b   :  { %v15745_v61 = vpop.eup %15744 }
 0x36c   :  { %v4242_v29 = vmul.f32 %v15745_v61, %v4232_v11  ;;  %v17580_v54 = vmul.f32 %v15745_v61, %v4233_v5  ;;  %v17582_v60 = vmul.f32 %v15745_v61, %v4234_v35  ;;  %v17584_v9 = vmul.f32 %v15745_v61, %v4235_v16 }
 0x36d   :  { %v17586_v24 = vmul.f32 %v15745_v61, %v4236_v0  ;;  %v17588_v4 = vmul.f32 %v15745_v61, %v4237_v32  ;;  %v17590_v48 = vmul.f32 %v15745_v61, %v4238_v2  ;;  %v17592_v15 = vmul.f32 %v15745_v61, %v4239_v34 }
 0x36e   :  { %v12540_v30 = vmul.f32 -1.442695, %v4242_v29 }
 0x370   :  { %15746 = vpow2.f32 %v12540_v30 }
 0x376   :  { %v4976_v14 = vpop.permute.xlu1 %4975 }
 0x377   :  { %v4977_v42 = vsel %vm45_vm0, %v4976_v14, 0 }
 0x378   :  { %v5048_v22 = vand.u32 4294901760, %v4977_v42 }
 0x37a   :  { %v15747_v27 = vpop.eup %15746  ;;  %v5049_v53 = vsub.f32 %v4977_v42, %v5048_v22  ;;  %13725 = vmatmul.mubr.f32.vlgmr.msra.gmra.mrb[68].mxu0 %v5048_v22  ;;  %v17623_v61 = vpop.permute.xlu1 %4343  ;;  %v15830_v42 = vmov 0  }
 0x37b   :  { %15081 = vmatpush3.bf16.msra.mxu0 %v17492_v47  ;;  %13746 = vmatprep.mubr.msk.f32.mxu0 %vm15826_vm2, %v18687_v28  ;;  %v4274_v38 = vadd.f32 1.0, %v15747_v27 }
 0x37c   :  { %v5050_v55 = vand.u32 4294901760, %v5049_v53  ;;  %15082 = vmatprep.subr.bf16.mxu0 %v18671_v59  ;;  %15738 = vset.pattern.permute.xlu0 %v15830_v42 }
 0x37d   :  { %15748 = vrcp.f32 %v4274_v38  ;;  %15739 = vset.pattern.permute.xlu1 %v15830_v42 }
 0x37e   :  { %v5051_v57 = vsub.f32 %v5049_v53, %v5050_v55 }
 0x37f   :  { %15084 = vmatpush3.bf16.msra.mxu0 %v17494_v45 }
 0x380   :  { %v5052_v26 = vand.u32 4294901760, %v5051_v57  ;;  %15091 = vmatprep.subr.bf16.mxu0 %v18671_v59 }
 0x382   :  { %13747 = vmatmul.mubr.f32.vlgmr.msra.gmra.mrb[70].mxu0 %v5050_v55  ;;  %13714 = vmatmul.mubr.f32.vlgmr.msra.gmra.mrb[78].mxu1 %v5052_v26 }
 0x383   :  { %15075 = vmatpush3.bf16.msra.mxu1 %v17511_v12  ;;  %15093 = vmatpush3.bf16.msra.mxu0 %v17492_v47 }
 0x384   :  { %15076 = vmatprep.subr.bf16.mxu1 %v18671_v59  ;;  %15094 = vmatprep.subr.bf16.mxu0 %v18671_v59 }
 0x385   :  { %13735 = vmatprep.mubr.msk.f32.mxu1 %vm15826_vm2, %v18687_v28  ;;  %13768 = vmatprep.mubr.msk.f32.mxu0 %vm15826_vm2, %v18687_v28 }
 0x387   :  { %v15749_v3 = vpop.eup %15748  ;;  %15078 = vmatpush3.bf16.msra.mxu1 %v17514_v13  ;;  %15096 = vmatpush3.bf16.msra.mxu0 %v17494_v45 }
 0x388   :  { %15085 = vmatprep.subr.bf16.mxu1 %v18671_v59  ;;  %v4306_v11 = vsub.f32 1.0, %v15749_v3  ;;  %15103 = vmatprep.subr.bf16.mxu0 %v18671_v59  ;;  %v4298_v35 = vmul.f32 %v15749_v3, %v17530_v10 }
 0x38a   :  { %13736 = vmatmul.mubr.f32.vlgmr.msra.gmra.mrb[80].mxu1 %v5049_v53  ;;  %13769 = vmatmul.mubr.f32.vlgmr.msra.gmra.mrb[72].mxu0 %v5048_v22  ;;  %v4318_v5 = vmul.f32 %v17611_v6, %v4306_v11 }
 0x38b   :  { %15087 = vmatpush3.bf16.msra.mxu1 %v17520_v21  ;;  %13757 = vmatprep.mubr.msk.f32.mxu1 %vm15826_vm2, %v18687_v28 }
 0x38c   :  { %15088 = vmatprep.subr.bf16.mxu1 %v18671_v59  ;;  %v4326_v16 = vmul.f32 %v4318_v5, %v17530_v10  ;;  %15105 = vmatpush3.bf16.msra.mxu0 %v17387_v19  ;;  %v23_v10 = vld [vmem:[%s18406_s1 + $0x154] ss:$0 sm:$0xff] }
 0x38d   :  { %15106 = vmatprep.subr.bf16.mxu0 %v18671_v59  ;;  %13790 = vmatprep.mubr.msk.f32.mxu0 %vm15826_vm2, %v18687_v28 }
 0x38e   :  { %v4334_v0 = vadd.f32 %v4326_v16, %v4298_v35 }
 0x38f   :  { %15090 = vmatpush3.bf16.msra.mxu1 %v17522_v56 }
 0x390   :  { %v4346_v32 = vmul.f32 %v17623_v61, %v4334_v0  ;;  %15108 = vmatpush3.bf16.msra.mxu0 %v17394_v17  ;;  %15097 = vmatprep.subr.bf16.mxu1 %v18671_v59 }
 0x391   :  { %15115 = vmatprep.subr.bf16.mxu0 %v18671_v59 }
 0x392   :  { %13758 = vmatmul.mubr.f32.vlgmr.msra.gmra.mrb[82].mxu1 %v5048_v22  ;;  %4362 = vrot.lane.b32.xlu0 %v4346_v32, %s15828_s21 }
 0x393   :  { %15099 = vmatpush3.bf16.msra.mxu1 %v17331_v1  ;;  %13779 = vmatprep.mubr.msk.f32.mxu1 %vm15826_vm2, %v18687_v28 }
 0x394   :  { %15100 = vmatprep.subr.bf16.mxu1 %v18671_v59 }
 0x396   :  { %1760 = vrot.lane.b32.xlu0 %v23_v10, %s15829_s24 }
 0x397   :  { %15102 = vmatpush3.bf16.msra.mxu1 %v17341_v25 }
 0x398   :  { %15109 = vmatprep.subr.bf16.mxu1 %v18671_v59 }
 0x404   :  { %v4363_v2 = vpop.permute.xlu0 %4362 }
 0x405   :  { %v4386_v34 = vsel %vm1818_vm1, %v4363_v2, 0.0 }
 0x406   :  { %4387 = vadd.xlane.f32.xlu1 %v4386_v34  ;;  %v17657_v34 = vld [vmem:[%s18406_s1 + $0x155] ss:$0 sm:$0xff] }
 0x408   :  { %v17645_v29 = vpop.permute.xlu0 %1760 }
 0x409   :  { %v1763_v30 = vadd.f32 %v17645_v29, %v18689_v36  ;;  %v1764_v14 = vadd.f32 %v18688_v49, %v17645_v29 }
 0x40b   :  { %1779 = vrot.lane.b32.xlu0 %v1763_v30, %s15829_s24 }
 0x417   :  { %1781 = vrot.lane.b32.xlu1 %v1764_v14, %s15829_s24 }
 0x44d   :  { %v5145_v22 = vpop.f32.mrb[68].mxu0 }
 0x44e   :  { %v13726_v27 = vpop.f32.mrb[69].mxu0 }
 0x455   :  { %v5302_v53 = vpop.f32.mrb[70].mxu0  ;;  %v5054_v38 = vpop.f32.mrb[78].mxu1 }
 0x456   :  { %v5146_v55 = vadd.f32 %v5145_v22, %v5054_v38  ;;  %v13748_v57 = vpop.f32.mrb[71].mxu0  ;;  %v13715_v26 = vpop.f32.mrb[79].mxu1 }
 0x457   :  { %v15822_v57 = vld [vmem:[%s18407_s0 + $0x40] sm:$0xff] }
 0x45d   :  { %v5225_v3 = vpop.f32.mrb[80].mxu1  ;;  %v5460_v11 = vpop.f32.mrb[72].mxu0 }
 0x45e   :  { %v5226_v36 = vadd.f32 %v5225_v3, %v5146_v55  ;;  %v13737_v5 = vpop.f32.mrb[81].mxu1  ;;  %v13770_v35 = vpop.f32.mrb[73].mxu0 }
 0x460   :  { %v5303_v16 = vadd.f32 %v5302_v53, %v5226_v36 }
 0x465   :  { %v5385_v0 = vpop.f32.mrb[82].mxu1 }
 0x466   :  { %v5386_v49 = vadd.f32 %v5385_v0, %v5303_v16  ;;  %v13759_v32 = vpop.f32.mrb[83].mxu1 }
 0x468   :  { %v5461_v10 = vadd.f32 %v5460_v11, %v5386_v49 }
 0x47d   :  { %v1780_v2 = vpop.permute.xlu0 %1779 }
 0x47e   :  { %1803 = vst.msk [vmem:[#allocation3] sm:$0xff] %vm45_vm0, %v1780_v2 }
 0x485   :  { %v4972_v22 = vld [vmem:[#allocation3] sm:$0xff] }
 0x486   :  { %v5464_v27 = vadd.f32 %v5461_v10, %v4972_v22  ;;  %v12541_v22 = vmul.f32 -1.442695, %v17580_v54 }
 0x488   :  { %15750 = vtanh.f32 %v5464_v27 }
 0x489   :  { %15752 = vpow2.f32 %v12541_v22 }
 0x492   :  { %v15751_v3 = vpop.eup %15750 }
 0x493   :  { %v4388_v30 = vpop.xlane.xlu1 %4387 }
 0x494   :  { %v4410_v14 = vadd.f32 %v4388_v30, %v17657_v34 }
 0x496   :  { %4420 = vperm.xlu0 %15738, %v4410_v14  }
 0x497   :  { %v1782_v42 = vpop.permute.xlu1 %1781 }
 0x498   :  { %1804 = vst.msk [vmem:[#allocation3 + $0x8] sm:$0xff] %vm45_vm0, %v1782_v42 }
 0x515   :  { %v4421_v53 = vpop.permute.xlu0 %4420 }
 0x516   :  { %4458 = vst.msk [vmem:[#allocation4] sm:$0xff] %vm45_vm0, %v4421_v53 }
 0x51d   :  { %v4970_v38 = vld [vmem:[#allocation4] sm:$0xff] }
 0x51e   :  { %v4971_v55 = vmul.f32 %v17508_v8, %v4970_v38 }
 0x520   :  { %v5469_v26 = vmul.f32 %v15822_v57, %v4971_v55 }
 0x522   :  { %v17666_v11 = vmul.f32 %v15751_v3, %v5469_v26  ;;  %v15753_v3 = vpop.eup %15752 }
 0x524   :  { %5472 = vst.msk [vmem:[%s18410_s4] sm:$0xff] %vm45_vm0, %v17666_v11  ;;  %v5476_v36 = vsel %vm45_vm0, %v17666_v11, 0 }
 0x525   :  { %v5547_v5 = vand.u32 4294901760, %v5476_v36 }
 0x527   :  { %v5548_v35 = vsub.f32 %v5476_v36, %v5547_v5  ;;  %13791 = vmatmul.mubr.f32.vlgmr.msra.gmra.mrb[74].mxu0 %v5547_v5 }
 0x528   :  { %15117 = vmatpush3.bf16.msra.mxu0 %v17331_v1  ;;  %13812 = vmatprep.mubr.msk.f32.mxu0 %vm15826_vm2, %v18687_v28 }
 0x529   :  { %15118 = vmatprep.subr.bf16.mxu0 %v18671_v59  ;;  %v5549_v8 = vand.u32 4294901760, %v5548_v35 }
 0x52b   :  { %v5550_v16 = vsub.f32 %v5548_v35, %v5549_v8 }
 0x52c   :  { %15120 = vmatpush3.bf16.msra.mxu0 %v17341_v25 }
 0x52d   :  { %15127 = vmatprep.subr.bf16.mxu0 %v18671_v59  ;;  %v5551_v0 = vand.u32 4294901760, %v5550_v16 }
 0x52f   :  { %13813 = vmatmul.mubr.f32.vlgmr.msra.gmra.mrb[76].mxu0 %v5549_v8  ;;  %13780 = vmatmul.mubr.f32.vlgmr.msra.gmra.mrb[84].mxu1 %v5551_v0  ;;  %v4275_v8 = vadd.f32 1.0, %v15753_v3  ;;  %v5474_v0 = vld [vmem:[#allocation2 + $0x8] sm:$0xff] }
 0x530   :  { %15111 = vmatpush3.bf16.msra.mxu1 %v17402_v31  ;;  %15129 = vmatpush3.bf16.msra.mxu0 %v17331_v1 }
 0x531   :  { %15112 = vmatprep.subr.bf16.mxu1 %v18671_v59  ;;  %15130 = vmatprep.subr.bf16.mxu0 %v18671_v59  ;;  %15754 = vrcp.f32 %v4275_v8 }
 0x532   :  { %13801 = vmatprep.mubr.msk.f32.mxu1 %vm15826_vm2, %v18687_v28  ;;  %13834 = vmatprep.mubr.msk.f32.mxu0 %vm15826_vm2, %v18687_v28 }
 0x534   :  { %15114 = vmatpush3.bf16.msra.mxu1 %v17407_v7  ;;  %15132 = vmatpush3.bf16.msra.mxu0 %v17341_v25 }
 0x535   :  { %15121 = vmatprep.subr.bf16.mxu1 %v18671_v59  ;;  %15139 = vmatprep.subr.bf16.mxu0 %v18671_v59 }
 0x537   :  { %13802 = vmatmul.mubr.f32.vlgmr.msra.gmra.mrb[86].mxu1 %v5548_v35  ;;  %13835 = vmatmul.mubr.f32.vlgmr.msra.gmra.mrb[78].mxu0 %v5547_v5 }
 0x538   :  { %15123 = vmatpush3.bf16.msra.mxu1 %v17413_v20  ;;  %13823 = vmatprep.mubr.msk.f32.mxu1 %vm15826_vm2, %v18687_v28 }
 0x539   :  { %15124 = vmatprep.subr.bf16.mxu1 %v18671_v59  ;;  %15141 = vmatpush3.bf16.msra.mxu0 %v17500_v39 }
 0x53a   :  { %15142 = vmatprep.subr.bf16.mxu0 %v18671_v59  ;;  %13856 = vmatprep.mubr.msk.f32.mxu0 %vm15826_vm2, %v18687_v28 }
 0x53c   :  { %15126 = vmatpush3.bf16.msra.mxu1 %v17418_v40 }
 0x53d   :  { %15144 = vmatpush3.bf16.msra.mxu0 %v17503_v33  ;;  %15133 = vmatprep.subr.bf16.mxu1 %v18671_v59 }
 0x53e   :  { %15151 = vmatprep.subr.bf16.mxu0 %v18671_v59 }
 0x53f   :  { %13824 = vmatmul.mubr.f32.vlgmr.msra.gmra.mrb[88].mxu1 %v5547_v5 }
 0x540   :  { %15135 = vmatpush3.bf16.msra.mxu1 %v17492_v47  ;;  %13845 = vmatprep.mubr.msk.f32.mxu1 %vm15826_vm2, %v18687_v28 }
 0x541   :  { %15136 = vmatprep.subr.bf16.mxu1 %v18671_v59 }
 0x544   :  { %15138 = vmatpush3.bf16.msra.mxu1 %v17494_v45 }
 0x545   :  { %15145 = vmatprep.subr.bf16.mxu1 %v18671_v59 }
 0x5fa   :  { %v5644_v49 = vpop.f32.mrb[74].mxu0 }
 0x5fb   :  { %v13792_v32 = vpop.f32.mrb[75].mxu0 }
 0x602   :  { %v5801_v10 = vpop.f32.mrb[76].mxu0  ;;  %v5553_v2 = vpop.f32.mrb[84].mxu1 }
 0x603   :  { %v5645_v30 = vadd.f32 %v5644_v49, %v5553_v2  ;;  %v13814_v14 = vpop.f32.mrb[77].mxu0  ;;  %v13781_v42 = vpop.f32.mrb[85].mxu1 }
 0x604   :  { %v15755_v2 = vpop.eup %15754 }
 0x605   :  { %v4307_v14 = vsub.f32 1.0, %v15755_v2  ;;  %v4299_v22 = vmul.f32 %v15755_v2, %v17527_v50 }
 0x60a   :  { %v5724_v27 = vpop.f32.mrb[86].mxu1  ;;  %v5959_v53 = vpop.f32.mrb[78].mxu0 }
 0x60b   :  { %v5725_v38 = vadd.f32 %v5724_v27, %v5645_v30  ;;  %v13803_v55 = vpop.f32.mrb[87].mxu1  ;;  %v13836_v57 = vpop.f32.mrb[79].mxu0  ;;  %v4319_v30 = vmul.f32 %v17611_v6, %v4307_v14 }
 0x60c   :  { %v12542_v55 = vmul.f32 -1.442695, %v17582_v60 }
 0x60d   :  { %v5802_v26 = vadd.f32 %v5801_v10, %v5725_v38  ;;  %v4327_v10 = vmul.f32 %v4319_v30, %v17527_v50 }
 0x60f   :  { %v4335_v27 = vadd.f32 %v4327_v10, %v4299_v22  ;;  %v1765_v10 = vadd.f32 %v17645_v29, %v18690_v62 }
 0x612   :  { %v5884_v36 = vpop.f32.mrb[88].mxu1 }
 0x613   :  { %v5885_v5 = vadd.f32 %v5884_v36, %v5802_v26  ;;  %v13825_v35 = vpop.f32.mrb[89].mxu1 }
 0x615   :  { %v5960_v16 = vadd.f32 %v5959_v53, %v5885_v5  ;;  %v4347_v53 = vmul.f32 %v17623_v61, %v4335_v27 }
 0x617   :  { %v5963_v32 = vadd.f32 %v5960_v16, %v5474_v0 }
 0x619   :  { %v12550_v49 = vmul.f32 -1.442695, %v5963_v32 }
 0x61b   :  { %15756 = vpow2.f32 %v12550_v49 }
 0x625   :  { %v15757_v54 = vpop.eup %15756 }
 0x626   :  { %v5967_v42 = vadd.f32 1.0, %v15757_v54 }
 0x628   :  { %15758 = vrcp.f32 %v5967_v42 }
 0x629   :  { %15760 = vpow2.f32 %v12542_v55 }
 0x632   :  { %v17715_v38 = vpop.eup %15758 }
 0x633   :  { %5976 = vrot.lane.b32.xlu0 %v17715_v38, %s15827_s11  ;;  %v15761_v57 = vpop.eup %15760 }
 0x634   :  { %v4276_v26 = vadd.f32 1.0, %v15761_v57 }
 0x636   :  { %15762 = vrcp.f32 %v4276_v26 }
 0x637   :  { %4364 = vrot.lane.b32.xlu0 %v4347_v53, %s15828_s21 }
 0x640   :  { %v15763_v0 = vpop.eup %15762 }
 0x641   :  { %v4308_v49 = vsub.f32 1.0, %v15763_v0  ;;  %v4300_v42 = vmul.f32 %v15763_v0, %v17532_v63 }
 0x643   :  { %v4320_v54 = vmul.f32 %v17611_v6, %v4308_v49 }
 0x645   :  { %v4328_v14 = vmul.f32 %v4320_v54, %v17532_v63 }
 0x647   :  { %v4336_v30 = vadd.f32 %v4328_v14, %v4300_v42  ;;  %v5974_v42 = vld [vmem:[#allocation3 + $0x8] sm:$0xff] }
 0x649   :  { %v4348_v63 = vmul.f32 %v17623_v61, %v4336_v30 }
 0x6a5   :  { %v5977_v3 = vpop.permute.xlu0 %5976 }
 0x6a6   :  { %v5979_v36 = vmul.f32 %v5977_v3, %v17666_v11 }
 0x6a8   :  { %v5981_v50 = vsel %vm45_vm0, %v5979_v36, 0 }
 0x6a9   :  { %v6052_v5 = vand.u32 4294901760, %v5981_v50  ;;  %v4365_v35 = vpop.permute.xlu0 %4364 }
 0x6aa   :  { %v4389_v8 = vsel %vm1818_vm1, %v4365_v35, 0.0 }
 0x6ab   :  { %v6053_v16 = vsub.f32 %v5981_v50, %v6052_v5  ;;  %13857 = vmatmul.mubr.f32.vlgmr.msra.gmra.mrb[80].mxu0 %v6052_v5  ;;  %4390 = vadd.xlane.f32.xlu0 %v4389_v8 }
 0x6ac   :  { %15153 = vmatpush3.bf16.msra.mxu0 %v17492_v47  ;;  %13878 = vmatprep.mubr.msk.f32.mxu0 %vm15826_vm2, %v18687_v28 }
 0x6ad   :  { %15154 = vmatprep.subr.bf16.mxu0 %v18671_v59  ;;  %v6054_v60 = vand.u32 4294901760, %v6053_v16 }
 0x6af   :  { %v6055_v32 = vsub.f32 %v6053_v16, %v6054_v60 }
 0x6b0   :  { %15156 = vmatpush3.bf16.msra.mxu0 %v17494_v45 }
 0x6b1   :  { %15163 = vmatprep.subr.bf16.mxu0 %v18671_v59  ;;  %v6056_v2 = vand.u32 4294901760, %v6055_v32 }
 0x6b3   :  { %13879 = vmatmul.mubr.f32.vlgmr.msra.gmra.mrb[82].mxu0 %v6054_v60  ;;  %13846 = vmatmul.mubr.f32.vlgmr.msra.gmra.mrb[90].mxu1 %v6056_v2 }
 0x6b4   :  { %15147 = vmatpush3.bf16.msra.mxu1 %v17511_v12  ;;  %15165 = vmatpush3.bf16.msra.mxu0 %v17492_v47 }
 0x6b5   :  { %15148 = vmatprep.subr.bf16.mxu1 %v18671_v59  ;;  %15166 = vmatprep.subr.bf16.mxu0 %v18671_v59 }
 0x6b6   :  { %13867 = vmatprep.mubr.msk.f32.mxu1 %vm15826_vm2, %v18687_v28  ;;  %13900 = vmatprep.mubr.msk.f32.mxu0 %vm15826_vm2, %v18687_v28 }
 0x6b8   :  { %15150 = vmatpush3.bf16.msra.mxu1 %v17514_v13  ;;  %15168 = vmatpush3.bf16.msra.mxu0 %v17494_v45 }
 0x6b9   :  { %15157 = vmatprep.subr.bf16.mxu1 %v18671_v59  ;;  %15175 = vmatprep.subr.bf16.mxu0 %v18671_v59 }
 0x6bb   :  { %13868 = vmatmul.mubr.f32.vlgmr.msra.gmra.mrb[92].mxu1 %v6053_v16  ;;  %13901 = vmatmul.mubr.f32.vlgmr.msra.gmra.mrb[84].mxu0 %v6052_v5 }
 0x6bc   :  { %15159 = vmatpush3.bf16.msra.mxu1 %v17520_v21  ;;  %13889 = vmatprep.mubr.msk.f32.mxu1 %vm15826_vm2, %v18687_v28 }
 0x6bd   :  { %15160 = vmatprep.subr.bf16.mxu1 %v18671_v59  ;;  %15177 = vmatpush3.bf16.msra.mxu0 %v17387_v19 }
 0x6be   :  { %15178 = vmatprep.subr.bf16.mxu0 %v18671_v59  ;;  %13922 = vmatprep.mubr.msk.f32.mxu0 %vm15826_vm2, %v18687_v28 }
 0x6c0   :  { %15162 = vmatpush3.bf16.msra.mxu1 %v17522_v56 }
 0x6c1   :  { %4366 = vrot.lane.b32.xlu0 %v4348_v63, %s15828_s21  ;;  %15180 = vmatpush3.bf16.msra.mxu0 %v17394_v17 }
 0x6c2   :  { %15169 = vmatprep.subr.bf16.mxu1 %v18671_v59  ;;  %15187 = vmatprep.subr.bf16.mxu0 %v18671_v59 }
 0x6c3   :  { %13890 = vmatmul.mubr.f32.vlgmr.msra.gmra.mrb[94].mxu1 %v6052_v5 }
 0x6c4   :  { %15171 = vmatpush3.bf16.msra.mxu1 %v17331_v1  ;;  %13911 = vmatprep.mubr.msk.f32.mxu1 %vm15826_vm2, %v18687_v28 }
 0x6c5   :  { %1783 = vrot.lane.b32.xlu0 %v1765_v10, %s15829_s24  ;;  %15172 = vmatprep.subr.bf16.mxu1 %v18671_v59 }
 0x6c8   :  { %15174 = vmatpush3.bf16.msra.mxu1 %v17341_v25 }
 0x6c9   :  { %15181 = vmatprep.subr.bf16.mxu1 %v18671_v59 }
 0x738   :  { %v4391_v22 = vpop.xlane.xlu0 %4390 }
 0x739   :  { %v4411_v27 = vadd.f32 %v4391_v22, %v17657_v34 }
 0x73b   :  { %4425 = vperm.xlu1 %15739, %v4411_v27   ;;  %v12551_v27 = vld [vmem:[%s18407_s0 + $0x48] sm:$0xff] }
 0x73c   :  { %v17770_v53 = vpop.permute.xlu0 %4366 }
 0x740   :  { %v1784_v62 = vpop.permute.xlu0 %1783 }
 0x741   :  { %1805 = vst.msk [vmem:[#allocation3 + $0x10] sm:$0xff] %vm45_vm0, %v1784_v62 }
 0x77e   :  { %v6149_v55 = vpop.f32.mrb[80].mxu0 }
 0x77f   :  { %v13858_v57 = vpop.f32.mrb[81].mxu0 }
 0x786   :  { %v6306_v26 = vpop.f32.mrb[82].mxu0  ;;  %v6058_v3 = vpop.f32.mrb[90].mxu1 }
 0x787   :  { %v6150_v36 = vadd.f32 %v6149_v55, %v6058_v3  ;;  %v13880_v50 = vpop.f32.mrb[83].mxu0  ;;  %v13847_v5 = vpop.f32.mrb[91].mxu1 }
 0x78e   :  { %v6229_v35 = vpop.f32.mrb[92].mxu1  ;;  %v6464_v8 = vpop.f32.mrb[84].mxu0 }
 0x78f   :  { %v6230_v16 = vadd.f32 %v6229_v35, %v6150_v36  ;;  %v13869_v0 = vpop.f32.mrb[93].mxu1  ;;  %v13902_v60 = vpop.f32.mrb[85].mxu0 }
 0x791   :  { %v6307_v32 = vadd.f32 %v6306_v26, %v6230_v16 }
 0x796   :  { %v6389_v49 = vpop.f32.mrb[94].mxu1 }
 0x797   :  { %v6390_v2 = vadd.f32 %v6389_v49, %v6307_v32  ;;  %v13891_v54 = vpop.f32.mrb[95].mxu1 }
 0x799   :  { %v6465_v14 = vadd.f32 %v6464_v8, %v6390_v2 }
 0x79b   :  { %v6468_v30 = vadd.f32 %v6465_v14, %v5974_v42 }
 0x79d   :  { %15764 = vtanh.f32 %v6468_v30 }
 0x7a7   :  { %v15765_v10 = vpop.eup %15764 }
 0x7a8   :  { %v6474_v55 = vsub.f32 %v15765_v10, %v17666_v11 }
 0x7ba   :  { %v4426_v63 = vpop.permute.xlu1 %4425 }
 0x7bb   :  { %4459 = vst.msk [vmem:[#allocation4 + $0x8] sm:$0xff] %vm45_vm0, %v4426_v63 }
 0x7c2   :  { %v5971_v22 = vld [vmem:[#allocation4 + $0x8] sm:$0xff] }
 0x7c3   :  { %v5972_v62 = vmul.f32 %v17715_v38, %v5971_v22 }
 0x7c5   :  { %v6473_v57 = vmul.f32 %v12551_v27, %v5972_v62 }
 0x7c7   :  { %v6475_v26 = vmul.f32 %v6474_v55, %v6473_v57  ;;  %v6480_v57 = vld [vmem:[#allocation2 + $0x10] sm:$0xff] }
 0x7c9   :  { %v17780_v3 = vadd.f32 %v6475_v26, %v17666_v11 }
 0x7cb   :  { %12552 = vst.msk [vmem:[%s18410_s4 + $0x8] sm:$0xff] %vm45_vm0, %v17780_v3  ;;  %v6482_v36 = vsel %vm45_vm0, %v17780_v3, 0 }
 0x7cc   :  { %v6553_v50 = vand.u32 4294901760, %v6482_v36 }
 0x7ce   :  { %v6554_v5 = vsub.f32 %v6482_v36, %v6553_v50  ;;  %13923 = vmatmul.mubr.f32.vlgmr.msra.gmra.mrb[86].mxu0 %v6553_v50 }
 0x7cf   :  { %15189 = vmatpush3.bf16.msra.mxu0 %v17331_v1  ;;  %13944 = vmatprep.mubr.msk.f32.mxu0 %vm15826_vm2, %v18687_v28 }
 0x7d0   :  { %15190 = vmatprep.subr.bf16.mxu0 %v18671_v59  ;;  %v6555_v11 = vand.u32 4294901760, %v6554_v5 }
 0x7d2   :  { %v6556_v38 = vsub.f32 %v6554_v5, %v6555_v11 }
 0x7d3   :  { %15192 = vmatpush3.bf16.msra.mxu0 %v17341_v25 }
 0x7d4   :  { %15199 = vmatprep.subr.bf16.mxu0 %v18671_v59  ;;  %v6557_v35 = vand.u32 4294901760, %v6556_v38  ;;  %v4392_v38 = vsel %vm1818_vm1, %v17770_v53, 0.0 }
 0x7d6   :  { %13945 = vmatmul.mubr.f32.vlgmr.msra.gmra.mrb[88].mxu0 %v6555_v11  ;;  %13912 = vmatmul.mubr.f32.vlgmr.msra.gmra.mrb[96].mxu1 %v6557_v35  ;;  %v1766_v35 = vadd.f32 %v18691_v18, %v17645_v29 }
 0x7d7   :  { %15183 = vmatpush3.bf16.msra.mxu1 %v17402_v31  ;;  %15201 = vmatpush3.bf16.msra.mxu0 %v17331_v1 }
 0x7d8   :  { %15184 = vmatprep.subr.bf16.mxu1 %v18671_v59  ;;  %15202 = vmatprep.subr.bf16.mxu0 %v18671_v59 }
 0x7d9   :  { %13933 = vmatprep.mubr.msk.f32.mxu1 %vm15826_vm2, %v18687_v28  ;;  %13966 = vmatprep.mubr.msk.f32.mxu0 %vm15826_vm2, %v18687_v28 }
 0x7db   :  { %15186 = vmatpush3.bf16.msra.mxu1 %v17407_v7  ;;  %15204 = vmatpush3.bf16.msra.mxu0 %v17341_v25 }
 0x7dc   :  { %15193 = vmatprep.subr.bf16.mxu1 %v18671_v59  ;;  %15211 = vmatprep.subr.bf16.mxu0 %v18671_v59 }
 0x7de   :  { %13934 = vmatmul.mubr.f32.vlgmr.msra.gmra.mrb[98].mxu1 %v6554_v5  ;;  %13967 = vmatmul.mubr.f32.vlgmr.msra.gmra.mrb[90].mxu0 %v6553_v50 }
 0x7df   :  { %15195 = vmatpush3.bf16.msra.mxu1 %v17413_v20  ;;  %13955 = vmatprep.mubr.msk.f32.mxu1 %vm15826_vm2, %v18687_v28 }
 0x7e0   :  { %15196 = vmatprep.subr.bf16.mxu1 %v18671_v59  ;;  %15213 = vmatpush3.bf16.msra.mxu0 %v17500_v39 }
 0x7e1   :  { %15214 = vmatprep.subr.bf16.mxu0 %v18671_v59  ;;  %13988 = vmatprep.mubr.msk.f32.mxu0 %vm15826_vm2, %v18687_v28 }
 0x7e3   :  { %15198 = vmatpush3.bf16.msra.mxu1 %v17418_v40 }
 0x7e4   :  { %15216 = vmatpush3.bf16.msra.mxu0 %v17503_v33  ;;  %15205 = vmatprep.subr.bf16.mxu1 %v18671_v59 }
 0x7e5   :  { %15223 = vmatprep.subr.bf16.mxu0 %v18671_v59 }
 0x7e6   :  { %13956 = vmatmul.mubr.f32.vlgmr.msra.gmra.mrb[100].mxu1 %v6553_v50 }
 0x7e7   :  { %15207 = vmatpush3.bf16.msra.mxu1 %v17492_v47  ;;  %13977 = vmatprep.mubr.msk.f32.mxu1 %vm15826_vm2, %v18687_v28 }
 0x7e8   :  { %15208 = vmatprep.subr.bf16.mxu1 %v18671_v59 }
 0x7eb   :  { %15210 = vmatpush3.bf16.msra.mxu1 %v17494_v45 }
 0x7ec   :  { %15217 = vmatprep.subr.bf16.mxu1 %v18671_v59 }
 0x8a1   :  { %v6650_v8 = vpop.f32.mrb[86].mxu0 }
 0x8a2   :  { %v13924_v16 = vpop.f32.mrb[87].mxu0 }
 0x8a9   :  { %v6807_v0 = vpop.f32.mrb[88].mxu0  ;;  %v6559_v60 = vpop.f32.mrb[96].mxu1 }
 0x8aa   :  { %v6651_v32 = vadd.f32 %v6650_v8, %v6559_v60  ;;  %v13946_v49 = vpop.f32.mrb[89].mxu0  ;;  %v13913_v2 = vpop.f32.mrb[97].mxu1 }
 0x8b1   :  { %v6730_v54 = vpop.f32.mrb[98].mxu1  ;;  %v6965_v14 = vpop.f32.mrb[90].mxu0 }
 0x8b2   :  { %v6731_v42 = vadd.f32 %v6730_v54, %v6651_v32  ;;  %v13935_v30 = vpop.f32.mrb[99].mxu1  ;;  %v13968_v63 = vpop.f32.mrb[91].mxu0 }
 0x8b4   :  { %v6808_v10 = vadd.f32 %v6807_v0, %v6731_v42 }
 0x8b9   :  { %v6890_v22 = vpop.f32.mrb[100].mxu1 }
 0x8ba   :  { %v6891_v27 = vadd.f32 %v6890_v22, %v6808_v10  ;;  %v13957_v62 = vpop.f32.mrb[101].mxu1 }
 0x8bc   :  { %v6966_v55 = vadd.f32 %v6965_v14, %v6891_v27 }
 0x8be   :  { %v6969_v26 = vadd.f32 %v6966_v55, %v6480_v57 }
 0x8c0   :  { %v12553_v36 = vmul.f32 -1.442695, %v6969_v26 }
 0x8c2   :  { %15766 = vpow2.f32 %v12553_v36 }
 0x8cc   :  { %v15767_v50 = vpop.eup %15766 }
 0x8cd   :  { %v6973_v5 = vadd.f32 1.0, %v15767_v50 }
 0x8cf   :  { %15768 = vrcp.f32 %v6973_v5 }
 0x8d9   :  { %v17825_v11 = vpop.eup %15768 }
 0x8da   :  { %6982 = vrot.lane.b32.xlu1 %v17825_v11, %s15827_s11 }
 0x8fe   :  { %4393 = vadd.xlane.f32.xlu1 %v4392_v38 }
 0x90f   :  { %1785 = vrot.lane.b32.xlu1 %v1766_v35, %s15829_s24 }
 0x94c   :  { %v6983_v8 = vpop.permute.xlu1 %6982 }
 0x94d   :  { %v6985_v16 = vmul.f32 %v6983_v8, %v17780_v3 }
 0x94f   :  { %v6987_v0 = vsel %vm45_vm0, %v6985_v16, 0 }
 0x950   :  { %v7058_v60 = vand.u32 4294901760, %v6987_v0 }
 0x952   :  { %v7059_v32 = vsub.f32 %v6987_v0, %v7058_v60  ;;  %13989 = vmatmul.mubr.f32.vlgmr.msra.gmra.mrb[92].mxu0 %v7058_v60 }
 0x953   :  { %15225 = vmatpush3.bf16.msra.mxu0 %v17492_v47  ;;  %14010 = vmatprep.mubr.msk.f32.mxu0 %vm15826_vm2, %v18687_v28 }
 0x954   :  { %15226 = vmatprep.subr.bf16.mxu0 %v18671_v59  ;;  %v7060_v53 = vand.u32 4294901760, %v7059_v32 }
 0x956   :  { %v7061_v49 = vsub.f32 %v7059_v32, %v7060_v53 }
 0x957   :  { %15228 = vmatpush3.bf16.msra.mxu0 %v17494_v45 }
 0x958   :  { %15235 = vmatprep.subr.bf16.mxu0 %v18671_v59  ;;  %v7062_v18 = vand.u32 4294901760, %v7061_v49 }
 0x95a   :  { %14011 = vmatmul.mubr.f32.vlgmr.msra.gmra.mrb[94].mxu0 %v7060_v53  ;;  %13978 = vmatmul.mubr.f32.vlgmr.msra.gmra.mrb[102].mxu1 %v7062_v18  ;;  %v12554_v18 = vld [vmem:[%s18407_s0 + $0x50] sm:$0xff] }
 0x95b   :  { %15219 = vmatpush3.bf16.msra.mxu1 %v17511_v12  ;;  %15237 = vmatpush3.bf16.msra.mxu0 %v17492_v47 }
 0x95c   :  { %15220 = vmatprep.subr.bf16.mxu1 %v18671_v59  ;;  %15238 = vmatprep.subr.bf16.mxu0 %v18671_v59 }
 0x95d   :  { %13999 = vmatprep.mubr.msk.f32.mxu1 %vm15826_vm2, %v18687_v28  ;;  %14032 = vmatprep.mubr.msk.f32.mxu0 %vm15826_vm2, %v18687_v28 }
 0x95f   :  { %15222 = vmatpush3.bf16.msra.mxu1 %v17514_v13  ;;  %15240 = vmatpush3.bf16.msra.mxu0 %v17494_v45 }
 0x960   :  { %15229 = vmatprep.subr.bf16.mxu1 %v18671_v59  ;;  %15247 = vmatprep.subr.bf16.mxu0 %v18671_v59 }
 0x962   :  { %14000 = vmatmul.mubr.f32.vlgmr.msra.gmra.mrb[104].mxu1 %v7059_v32  ;;  %14033 = vmatmul.mubr.f32.vlgmr.msra.gmra.mrb[96].mxu0 %v7058_v60 }
 0x963   :  { %15231 = vmatpush3.bf16.msra.mxu1 %v17520_v21  ;;  %14021 = vmatprep.mubr.msk.f32.mxu1 %vm15826_vm2, %v18687_v28 }
 0x964   :  { %15232 = vmatprep.subr.bf16.mxu1 %v18671_v59  ;;  %15249 = vmatpush3.bf16.msra.mxu0 %v17387_v19 }
 0x965   :  { %15250 = vmatprep.subr.bf16.mxu0 %v18671_v59  ;;  %14054 = vmatprep.mubr.msk.f32.mxu0 %vm15826_vm2, %v18687_v28 }
 0x967   :  { %15234 = vmatpush3.bf16.msra.mxu1 %v17522_v56 }
 0x968   :  { %15252 = vmatpush3.bf16.msra.mxu0 %v17394_v17  ;;  %15241 = vmatprep.subr.bf16.mxu1 %v18671_v59 }
 0x969   :  { %15259 = vmatprep.subr.bf16.mxu0 %v18671_v59 }
 0x96a   :  { %14022 = vmatmul.mubr.f32.vlgmr.msra.gmra.mrb[106].mxu1 %v7058_v60  ;;  %v6980_v60 = vld [vmem:[#allocation3 + $0x10] sm:$0xff] }
 0x96b   :  { %15243 = vmatpush3.bf16.msra.mxu1 %v17331_v1  ;;  %14043 = vmatprep.mubr.msk.f32.mxu1 %vm15826_vm2, %v18687_v28 }
 0x96c   :  { %15244 = vmatprep.subr.bf16.mxu1 %v18671_v59 }
 0x96f   :  { %15246 = vmatpush3.bf16.msra.mxu1 %v17341_v25 }
 0x970   :  { %15253 = vmatprep.subr.bf16.mxu1 %v18671_v59 }
 0x98b   :  { %v4394_v2 = vpop.xlane.xlu1 %4393 }
 0x98c   :  { %v4412_v54 = vadd.f32 %v4394_v2, %v17657_v34 }
 0x98e   :  { %4430 = vperm.xlu0 %15738, %v4412_v54  }
 0x98f   :  { %v1786_v14 = vpop.permute.xlu1 %1785 }
 0x990   :  { %1806 = vst.msk [vmem:[#allocation3 + $0x18] sm:$0xff] %vm45_vm0, %v1786_v14 }
 0xa0d   :  { %v4431_v42 = vpop.permute.xlu0 %4430 }
 0xa0e   :  { %4460 = vst.msk [vmem:[#allocation4 + $0x10] sm:$0xff] %vm45_vm0, %v4431_v42 }
 0xa15   :  { %v6977_v53 = vld [vmem:[#allocation4 + $0x10] sm:$0xff] }
 0xa16   :  { %v6978_v49 = vmul.f32 %v17825_v11, %v6977_v53 }
 0xa18   :  { %v7479_v54 = vmul.f32 %v12554_v18, %v6978_v49 }
 0xa25   :  { %v7155_v30 = vpop.f32.mrb[92].mxu0 }
 0xa26   :  { %v13990_v63 = vpop.f32.mrb[93].mxu0 }
 0xa2d   :  { %v7312_v10 = vpop.f32.mrb[94].mxu0  ;;  %v7064_v22 = vpop.f32.mrb[102].mxu1 }
 0xa2e   :  { %v7156_v27 = vadd.f32 %v7155_v30, %v7064_v22  ;;  %v14012_v62 = vpop.f32.mrb[95].mxu0  ;;  %v13979_v55 = vpop.f32.mrb[103].mxu1 }
 0xa35   :  { %v7235_v57 = vpop.f32.mrb[104].mxu1  ;;  %v7470_v26 = vpop.f32.mrb[96].mxu0 }
 0xa36   :  { %v7236_v36 = vadd.f32 %v7235_v57, %v7156_v27  ;;  %v14001_v50 = vpop.f32.mrb[105].mxu1  ;;  %v14034_v5 = vpop.f32.mrb[97].mxu0 }
 0xa38   :  { %v7313_v38 = vadd.f32 %v7312_v10, %v7236_v36 }
 0xa3d   :  { %v7395_v35 = vpop.f32.mrb[106].mxu1 }
 0xa3e   :  { %v7396_v8 = vadd.f32 %v7395_v35, %v7313_v38  ;;  %v14023_v16 = vpop.f32.mrb[107].mxu1  ;;  %v12543_v38 = vmul.f32 -1.442695, %v17584_v9 }
 0xa40   :  { %v7471_v0 = vadd.f32 %v7470_v26, %v7396_v8 }
 0xa42   :  { %v7474_v32 = vadd.f32 %v7471_v0, %v6980_v60 }
 0xa44   :  { %15770 = vtanh.f32 %v7474_v32 }
 0xa45   :  { %15772 = vpow2.f32 %v12543_v38 }
 0xa4e   :  { %v15771_v2 = vpop.eup %15770 }
 0xa4f   :  { %v7480_v14 = vsub.f32 %v15771_v2, %v17780_v3  ;;  %v15773_v53 = vpop.eup %15772 }
 0xa51   :  { %v7481_v42 = vmul.f32 %v7480_v14, %v7479_v54  ;;  %v4277_v54 = vadd.f32 1.0, %v15773_v53  ;;  %v1767_v53 = vadd.f32 %v17645_v29, %v18692_v37 }
 0xa53   :  { %v17881_v30 = vadd.f32 %v7481_v42, %v17780_v3  ;;  %v7486_v42 = vld [vmem:[#allocation2 + $0x18] sm:$0xff]  ;;  %15774 = vrcp.f32 %v4277_v54 }
 0xa55   :  { %12555 = vst.msk [vmem:[%s18410_s4 + $0x10] sm:$0xff] %vm45_vm0, %v17881_v30  ;;  %v7488_v11 = vsel %vm45_vm0, %v17881_v30, 0 }
 0xa56   :  { %v7559_v63 = vand.u32 4294901760, %v7488_v11 }
 0xa58   :  { %v7560_v10 = vsub.f32 %v7488_v11, %v7559_v63  ;;  %14055 = vmatmul.mubr.f32.vlgmr.msra.gmra.mrb[98].mxu0 %v7559_v63 }
 0xa59   :  { %15261 = vmatpush3.bf16.msra.mxu0 %v17331_v1  ;;  %14076 = vmatprep.mubr.msk.f32.mxu0 %vm15826_vm2, %v18687_v28 }
 0xa5a   :  { %15262 = vmatprep.subr.bf16.mxu0 %v18671_v59  ;;  %v7561_v3 = vand.u32 4294901760, %v7560_v10 }
 0xa5c   :  { %v7562_v22 = vsub.f32 %v7560_v10, %v7561_v3 }
 0xa5d   :  { %15264 = vmatpush3.bf16.msra.mxu0 %v17341_v25 }
 0xa5e   :  { %15271 = vmatprep.subr.bf16.mxu0 %v18671_v59  ;;  %v7563_v27 = vand.u32 4294901760, %v7562_v22 }
 0xa60   :  { %14077 = vmatmul.mubr.f32.vlgmr.msra.gmra.mrb[100].mxu0 %v7561_v3  ;;  %14044 = vmatmul.mubr.f32.vlgmr.msra.gmra.mrb[108].mxu1 %v7563_v27 }
 0xa61   :  { %15255 = vmatpush3.bf16.msra.mxu1 %v17402_v31  ;;  %15273 = vmatpush3.bf16.msra.mxu0 %v17331_v1 }
 0xa62   :  { %15256 = vmatprep.subr.bf16.mxu1 %v18671_v59  ;;  %15274 = vmatprep.subr.bf16.mxu0 %v18671_v59 }
 0xa63   :  { %14065 = vmatprep.mubr.msk.f32.mxu1 %vm15826_vm2, %v18687_v28  ;;  %14098 = vmatprep.mubr.msk.f32.mxu0 %vm15826_vm2, %v18687_v28 }
 0xa65   :  { %15258 = vmatpush3.bf16.msra.mxu1 %v17407_v7  ;;  %15276 = vmatpush3.bf16.msra.mxu0 %v17341_v25 }
 0xa66   :  { %15265 = vmatprep.subr.bf16.mxu1 %v18671_v59  ;;  %15283 = vmatprep.subr.bf16.mxu0 %v18671_v59 }
 0xa68   :  { %14066 = vmatmul.mubr.f32.vlgmr.msra.gmra.mrb[110].mxu1 %v7560_v10  ;;  %14099 = vmatmul.mubr.f32.vlgmr.msra.gmra.mrb[102].mxu0 %v7559_v63  ;;  %v15775_v10 = vpop.eup %15774 }
 0xa69   :  { %15267 = vmatpush3.bf16.msra.mxu1 %v17413_v20  ;;  %14087 = vmatprep.mubr.msk.f32.mxu1 %vm15826_vm2, %v18687_v28  ;;  %v4309_v3 = vsub.f32 1.0, %v15775_v10 }
 0xa6a   :  { %15268 = vmatprep.subr.bf16.mxu1 %v18671_v59  ;;  %15285 = vmatpush3.bf16.msra.mxu0 %v17500_v39 }
 0xa6b   :  { %15286 = vmatprep.subr.bf16.mxu0 %v18671_v59  ;;  %14120 = vmatprep.mubr.msk.f32.mxu0 %vm15826_vm2, %v18687_v28  ;;  %v4321_v27 = vmul.f32 %v17611_v6, %v4309_v3 }
 0xa6d   :  { %15270 = vmatpush3.bf16.msra.mxu1 %v17418_v40 }
 0xa6e   :  { %15288 = vmatpush3.bf16.msra.mxu0 %v17503_v33  ;;  %15277 = vmatprep.subr.bf16.mxu1 %v18671_v59 }
 0xa6f   :  { %15295 = vmatprep.subr.bf16.mxu0 %v18671_v59 }
 0xa70   :  { %14088 = vmatmul.mubr.f32.vlgmr.msra.gmra.mrb[112].mxu1 %v7559_v63 }
 0xa71   :  { %15279 = vmatpush3.bf16.msra.mxu1 %v17492_v47  ;;  %14109 = vmatprep.mubr.msk.f32.mxu1 %vm15826_vm2, %v18687_v28 }
 0xa72   :  { %15280 = vmatprep.subr.bf16.mxu1 %v18671_v59 }
 0xa75   :  { %15282 = vmatpush3.bf16.msra.mxu1 %v17494_v45 }
 0xa76   :  { %15289 = vmatprep.subr.bf16.mxu1 %v18671_v59 }
 0xb2b   :  { %v7656_v62 = vpop.f32.mrb[98].mxu0 }
 0xb2c   :  { %v14056_v55 = vpop.f32.mrb[99].mxu0 }
 0xb2d   :  { %v4301_v55 = vmul.f32 %v15775_v10, %v17535_v51 }
 0xb33   :  { %v7813_v57 = vpop.f32.mrb[100].mxu0  ;;  %v7565_v26 = vpop.f32.mrb[108].mxu1 }
 0xb34   :  { %v7657_v36 = vadd.f32 %v7656_v62, %v7565_v26  ;;  %v14078_v50 = vpop.f32.mrb[101].mxu0  ;;  %v14045_v5 = vpop.f32.mrb[109].mxu1  ;;  %v4329_v62 = vmul.f32 %v4321_v27, %v17535_v51 }
 0xb3b   :  { %v7736_v35 = vpop.f32.mrb[110].mxu1  ;;  %v7971_v8 = vpop.f32.mrb[102].mxu0 }
 0xb3c   :  { %v7737_v16 = vadd.f32 %v7736_v35, %v7657_v36  ;;  %v14067_v0 = vpop.f32.mrb[111].mxu1  ;;  %v14100_v60 = vpop.f32.mrb[103].mxu0 }
 0xb3e   :  { %v7814_v32 = vadd.f32 %v7813_v57, %v7737_v16  ;;  %v4337_v57 = vadd.f32 %v4329_v62, %v4301_v55 }
 0xb40   :  { %v4349_v36 = vmul.f32 %v17623_v61, %v4337_v57 }
 0xb43   :  { %v7896_v49 = vpop.f32.mrb[112].mxu1 }
 0xb44   :  { %v7897_v18 = vadd.f32 %v7896_v49, %v7814_v32  ;;  %v14089_v2 = vpop.f32.mrb[113].mxu1 }
 0xb46   :  { %v7972_v14 = vadd.f32 %v7971_v8, %v7897_v18 }
 0xb48   :  { %v7975_v11 = vadd.f32 %v7972_v14, %v7486_v42 }
 0xb4a   :  { %v12556_v63 = vmul.f32 -1.442695, %v7975_v11 }
 0xb4c   :  { %15776 = vpow2.f32 %v12556_v63 }
 0xb56   :  { %v15777_v9 = vpop.eup %15776 }
 0xb57   :  { %v7979_v22 = vadd.f32 1.0, %v15777_v9 }
 0xb59   :  { %15778 = vrcp.f32 %v7979_v22 }
 0xb63   :  { %v17930_v26 = vpop.eup %15778 }
 0xb64   :  { %7988 = vrot.lane.b32.xlu0 %v17930_v26, %s15827_s11 }
 0xb68   :  { %4368 = vrot.lane.b32.xlu0 %v4349_v36, %s15828_s21 }
 0xbd6   :  { %v7989_v50 = vpop.permute.xlu0 %7988 }
 0xbd7   :  { %v7991_v5 = vmul.f32 %v7989_v50, %v17881_v30 }
 0xbd9   :  { %v7993_v38 = vsel %vm45_vm0, %v7991_v5, 0  ;;  %v7986_v5 = vld [vmem:[#allocation3 + $0x18] sm:$0xff] }
 0xbda   :  { %v8064_v35 = vand.u32 4294901760, %v7993_v38  ;;  %v4369_v8 = vpop.permute.xlu0 %4368 }
 0xbdb   :  { %v4395_v16 = vsel %vm1818_vm1, %v4369_v8, 0.0 }
 0xbdc   :  { %v8065_v51 = vsub.f32 %v7993_v38, %v8064_v35  ;;  %14121 = vmatmul.mubr.f32.vlgmr.msra.gmra.mrb[104].mxu0 %v8064_v35  ;;  %4396 = vadd.xlane.f32.xlu0 %v4395_v16 }
 0xbdd   :  { %15297 = vmatpush3.bf16.msra.mxu0 %v17492_v47  ;;  %14142 = vmatprep.mubr.msk.f32.mxu0 %vm15826_vm2, %v18687_v28 }
 0xbde   :  { %15298 = vmatprep.subr.bf16.mxu0 %v18671_v59  ;;  %v8066_v0 = vand.u32 4294901760, %v8065_v51 }
 0xbe0   :  { %v8067_v60 = vsub.f32 %v8065_v51, %v8066_v0 }
 0xbe1   :  { %15300 = vmatpush3.bf16.msra.mxu0 %v17494_v45 }
 0xbe2   :  { %15307 = vmatprep.subr.bf16.mxu0 %v18671_v59  ;;  %v8068_v32 = vand.u32 4294901760, %v8067_v60 }
 0xbe4   :  { %14143 = vmatmul.mubr.f32.vlgmr.msra.gmra.mrb[106].mxu0 %v8066_v0  ;;  %14110 = vmatmul.mubr.f32.vlgmr.msra.gmra.mrb[114].mxu1 %v8068_v32 }
 0xbe5   :  { %15291 = vmatpush3.bf16.msra.mxu1 %v17511_v12  ;;  %15309 = vmatpush3.bf16.msra.mxu0 %v17492_v47 }
 0xbe6   :  { %15292 = vmatprep.subr.bf16.mxu1 %v18671_v59  ;;  %15310 = vmatprep.subr.bf16.mxu0 %v18671_v59 }
 0xbe7   :  { %14131 = vmatprep.mubr.msk.f32.mxu1 %vm15826_vm2, %v18687_v28  ;;  %14164 = vmatprep.mubr.msk.f32.mxu0 %vm15826_vm2, %v18687_v28 }
 0xbe9   :  { %15294 = vmatpush3.bf16.msra.mxu1 %v17514_v13  ;;  %15312 = vmatpush3.bf16.msra.mxu0 %v17494_v45 }
 0xbea   :  { %15301 = vmatprep.subr.bf16.mxu1 %v18671_v59  ;;  %15319 = vmatprep.subr.bf16.mxu0 %v18671_v59 }
 0xbec   :  { %14132 = vmatmul.mubr.f32.vlgmr.msra.gmra.mrb[116].mxu1 %v8065_v51  ;;  %14165 = vmatmul.mubr.f32.vlgmr.msra.gmra.mrb[108].mxu0 %v8064_v35  ;;  %v12557_v51 = vld [vmem:[%s18407_s0 + $0x58] sm:$0xff] }
 0xbed   :  { %15303 = vmatpush3.bf16.msra.mxu1 %v17520_v21  ;;  %14153 = vmatprep.mubr.msk.f32.mxu1 %vm15826_vm2, %v18687_v28 }
 0xbee   :  { %15304 = vmatprep.subr.bf16.mxu1 %v18671_v59  ;;  %15321 = vmatpush3.bf16.msra.mxu0 %v17387_v19 }
 0xbef   :  { %15322 = vmatprep.subr.bf16.mxu0 %v18671_v59  ;;  %14186 = vmatprep.mubr.msk.f32.mxu0 %vm15826_vm2, %v18687_v28 }
 0xbf1   :  { %15306 = vmatpush3.bf16.msra.mxu1 %v17522_v56 }
 0xbf2   :  { %1787 = vrot.lane.b32.xlu0 %v1767_v53, %s15829_s24  ;;  %15324 = vmatpush3.bf16.msra.mxu0 %v17394_v17 }
 0xbf3   :  { %15313 = vmatprep.subr.bf16.mxu1 %v18671_v59  ;;  %15331 = vmatprep.subr.bf16.mxu0 %v18671_v59 }
 0xbf4   :  { %14154 = vmatmul.mubr.f32.vlgmr.msra.gmra.mrb[118].mxu1 %v8064_v35 }
 0xbf5   :  { %15315 = vmatpush3.bf16.msra.mxu1 %v17331_v1  ;;  %14175 = vmatprep.mubr.msk.f32.mxu1 %vm15826_vm2, %v18687_v28 }
 0xbf6   :  { %15316 = vmatprep.subr.bf16.mxu1 %v18671_v59 }
 0xbf9   :  { %15318 = vmatpush3.bf16.msra.mxu1 %v17341_v25 }
 0xbfa   :  { %15325 = vmatprep.subr.bf16.mxu1 %v18671_v59 }
 0xc69   :  { %v4397_v37 = vpop.xlane.xlu0 %4396 }
 0xc6a   :  { %v4413_v49 = vadd.f32 %v4397_v37, %v17657_v34 }
 0xc6c   :  { %4435 = vperm.xlu1 %15739, %v4413_v49  }
 0xc6d   :  { %v1788_v18 = vpop.permute.xlu0 %1787 }
 0xc6e   :  { %1807 = vst.msk [vmem:[#allocation3 + $0x20] sm:$0xff] %vm45_vm0, %v1788_v18 }
 0xcaf   :  { %v8161_v2 = vpop.f32.mrb[104].mxu0 }
 0xcb0   :  { %v14122_v54 = vpop.f32.mrb[105].mxu0 }
 0xcb7   :  { %v8318_v14 = vpop.f32.mrb[106].mxu0  ;;  %v8070_v42 = vpop.f32.mrb[114].mxu1 }
 0xcb8   :  { %v8162_v11 = vadd.f32 %v8161_v2, %v8070_v42  ;;  %v14144_v63 = vpop.f32.mrb[107].mxu0  ;;  %v14111_v10 = vpop.f32.mrb[115].mxu1 }
 0xcbf   :  { %v8241_v9 = vpop.f32.mrb[116].mxu1  ;;  %v8476_v3 = vpop.f32.mrb[108].mxu0 }
 0xcc0   :  { %v8242_v22 = vadd.f32 %v8241_v9, %v8162_v11  ;;  %v14133_v27 = vpop.f32.mrb[117].mxu1  ;;  %v14166_v62 = vpop.f32.mrb[109].mxu0 }
 0xcc2   :  { %v8319_v55 = vadd.f32 %v8318_v14, %v8242_v22  ;;  %v12544_v22 = vmul.f32 -1.442695, %v17586_v24 }
 0xcc7   :  { %v8401_v57 = vpop.f32.mrb[118].mxu1 }
 0xcc8   :  { %v8402_v36 = vadd.f32 %v8401_v57, %v8319_v55  ;;  %v14155_v34 = vpop.f32.mrb[119].mxu1 }
 0xcca   :  { %v8477_v50 = vadd.f32 %v8476_v3, %v8402_v36 }
 0xccc   :  { %v8480_v38 = vadd.f32 %v8477_v50, %v7986_v5 }
 0xcce   :  { %15780 = vtanh.f32 %v8480_v38 }
 0xccf   :  { %15782 = vpow2.f32 %v12544_v22 }
 0xcd8   :  { %v15781_v8 = vpop.eup %15780 }
 0xcd9   :  { %v8486_v60 = vsub.f32 %v15781_v8, %v17881_v30  ;;  %v15783_v50 = vpop.eup %15782 }
 0xcda   :  { %v4278_v8 = vadd.f32 1.0, %v15783_v50 }
 0xcdc   :  { %15784 = vrcp.f32 %v4278_v8 }
 0xceb   :  { %v4436_v35 = vpop.permute.xlu1 %4435 }
 0xcec   :  { %4461 = vst.msk [vmem:[#allocation4 + $0x18] sm:$0xff] %vm45_vm0, %v4436_v35 }
 0xcf3   :  { %v7983_v16 = vld [vmem:[#allocation4 + $0x18] sm:$0xff] }
 0xcf4   :  { %v7984_v0 = vmul.f32 %v17930_v26, %v7983_v16 }
 0xcf6   :  { %v8485_v32 = vmul.f32 %v12557_v51, %v7984_v0  ;;  %v8492_v51 = vld [vmem:[#allocation2 + $0x20] sm:$0xff] }
 0xcf8   :  { %v8487_v53 = vmul.f32 %v8486_v60, %v8485_v32  ;;  %v15785_v32 = vpop.eup %15784 }
 0xcfa   :  { %v17987_v37 = vadd.f32 %v8487_v53, %v17881_v30  ;;  %v4310_v53 = vsub.f32 1.0, %v15785_v32 }
 0xcfc   :  { %12558 = vst.msk [vmem:[%s18410_s4 + $0x18] sm:$0xff] %vm45_vm0, %v17987_v37  ;;  %v8494_v49 = vsel %vm45_vm0, %v17987_v37, 0 }
 0xcfd   :  { %v8565_v18 = vand.u32 4294901760, %v8494_v49 }
 0xcff   :  { %v8566_v2 = vsub.f32 %v8494_v49, %v8565_v18  ;;  %14187 = vmatmul.mubr.f32.vlgmr.msra.gmra.mrb[110].mxu0 %v8565_v18 }
 0xd00   :  { %15333 = vmatpush3.bf16.msra.mxu0 %v17331_v1  ;;  %14208 = vmatprep.mubr.msk.f32.mxu0 %vm15826_vm2, %v18687_v28 }
 0xd01   :  { %15334 = vmatprep.subr.bf16.mxu0 %v18671_v59  ;;  %v8567_v30 = vand.u32 4294901760, %v8566_v2 }
 0xd03   :  { %v8568_v26 = vsub.f32 %v8566_v2, %v8567_v30 }
 0xd04   :  { %15336 = vmatpush3.bf16.msra.mxu0 %v17341_v25 }
 0xd05   :  { %15343 = vmatprep.subr.bf16.mxu0 %v18671_v59  ;;  %v8569_v54 = vand.u32 4294901760, %v8568_v26 }
 0xd07   :  { %14209 = vmatmul.mubr.f32.vlgmr.msra.gmra.mrb[112].mxu0 %v8567_v30  ;;  %14176 = vmatmul.mubr.f32.vlgmr.msra.gmra.mrb[120].mxu1 %v8569_v54  ;;  %v4302_v30 = vmul.f32 %v15785_v32, %v17539_v46 }
 0xd08   :  { %15327 = vmatpush3.bf16.msra.mxu1 %v17402_v31  ;;  %15345 = vmatpush3.bf16.msra.mxu0 %v17331_v1 }
 0xd09   :  { %15328 = vmatprep.subr.bf16.mxu1 %v18671_v59  ;;  %15346 = vmatprep.subr.bf16.mxu0 %v18671_v59 }
 0xd0a   :  { %14197 = vmatprep.mubr.msk.f32.mxu1 %vm15826_vm2, %v18687_v28  ;;  %14230 = vmatprep.mubr.msk.f32.mxu0 %vm15826_vm2, %v18687_v28 }
 0xd0c   :  { %15330 = vmatpush3.bf16.msra.mxu1 %v17407_v7  ;;  %15348 = vmatpush3.bf16.msra.mxu0 %v17341_v25 }
 0xd0d   :  { %15337 = vmatprep.subr.bf16.mxu1 %v18671_v59  ;;  %15355 = vmatprep.subr.bf16.mxu0 %v18671_v59 }
 0xd0f   :  { %14198 = vmatmul.mubr.f32.vlgmr.msra.gmra.mrb[122].mxu1 %v8566_v2  ;;  %14231 = vmatmul.mubr.f32.vlgmr.msra.gmra.mrb[114].mxu0 %v8565_v18 }
 0xd10   :  { %15339 = vmatpush3.bf16.msra.mxu1 %v17413_v20  ;;  %14219 = vmatprep.mubr.msk.f32.mxu1 %vm15826_vm2, %v18687_v28 }
 0xd11   :  { %15340 = vmatprep.subr.bf16.mxu1 %v18671_v59  ;;  %15357 = vmatpush3.bf16.msra.mxu0 %v17500_v39 }
 0xd12   :  { %15358 = vmatprep.subr.bf16.mxu0 %v18671_v59  ;;  %14252 = vmatprep.mubr.msk.f32.mxu0 %vm15826_vm2, %v18687_v28 }
 0xd14   :  { %15342 = vmatpush3.bf16.msra.mxu1 %v17418_v40 }
 0xd15   :  { %15360 = vmatpush3.bf16.msra.mxu0 %v17503_v33  ;;  %15349 = vmatprep.subr.bf16.mxu1 %v18671_v59 }
 0xd16   :  { %15367 = vmatprep.subr.bf16.mxu0 %v18671_v59 }
 0xd17   :  { %14220 = vmatmul.mubr.f32.vlgmr.msra.gmra.mrb[124].mxu1 %v8565_v18  ;;  %v4322_v18 = vmul.f32 %v17611_v6, %v4310_v53 }
 0xd18   :  { %15351 = vmatpush3.bf16.msra.mxu1 %v17492_v47  ;;  %14241 = vmatprep.mubr.msk.f32.mxu1 %vm15826_vm2, %v18687_v28 }
 0xd19   :  { %15352 = vmatprep.subr.bf16.mxu1 %v18671_v59  ;;  %v4330_v2 = vmul.f32 %v4322_v18, %v17539_v46 }
 0xd1b   :  { %v4338_v26 = vadd.f32 %v4330_v2, %v4302_v30 }
 0xd1c   :  { %15354 = vmatpush3.bf16.msra.mxu1 %v17494_v45 }
 0xd1d   :  { %15361 = vmatprep.subr.bf16.mxu1 %v18671_v59 }
 0xdd2   :  { %v8662_v14 = vpop.f32.mrb[110].mxu0 }
 0xdd3   :  { %v14188_v42 = vpop.f32.mrb[111].mxu0 }
 0xdda   :  { %v8819_v11 = vpop.f32.mrb[112].mxu0  ;;  %v8571_v63 = vpop.f32.mrb[120].mxu1 }
 0xddb   :  { %v8663_v10 = vadd.f32 %v8662_v14, %v8571_v63  ;;  %v14210_v9 = vpop.f32.mrb[113].mxu0  ;;  %v14177_v3 = vpop.f32.mrb[121].mxu1  ;;  %v4350_v14 = vmul.f32 %v17623_v61, %v4338_v26 }
 0xde2   :  { %v8742_v27 = vpop.f32.mrb[122].mxu1  ;;  %v8977_v62 = vpop.f32.mrb[114].mxu0 }
 0xde3   :  { %v8743_v55 = vadd.f32 %v8742_v27, %v8663_v10  ;;  %v14199_v57 = vpop.f32.mrb[123].mxu1  ;;  %v14232_v36 = vpop.f32.mrb[115].mxu0 }
 0xde4   :  { %v18087_v57 = vld [vmem:[%s18406_s1 + $0x155] ss:$0 sm:$0xff] }
 0xde5   :  { %v8820_v34 = vadd.f32 %v8819_v11, %v8743_v55  ;;  %v1768_v55 = vadd.f32 %v18693_v23, %v17645_v29 }
 0xdea   :  { %v8902_v5 = vpop.f32.mrb[124].mxu1 }
 0xdeb   :  { %v8903_v38 = vadd.f32 %v8902_v5, %v8820_v34  ;;  %v14221_v35 = vpop.f32.mrb[125].mxu1 }
 0xded   :  { %v8978_v16 = vadd.f32 %v8977_v62, %v8903_v38 }
 0xdef   :  { %v8981_v0 = vadd.f32 %v8978_v16, %v8492_v51 }
 0xdf1   :  { %v12559_v60 = vmul.f32 -1.442695, %v8981_v0 }
 0xdf3   :  { %15786 = vpow2.f32 %v12559_v60 }
 0xdfd   :  { %v15787_v24 = vpop.eup %15786 }
 0xdfe   :  { %v8985_v49 = vadd.f32 1.0, %v15787_v24 }
 0xe00   :  { %15788 = vrcp.f32 %v8985_v49 }
 0xe0a   :  { %v18036_v54 = vpop.eup %15788 }
 0xe0b   :  { %8994 = vrot.lane.b32.xlu1 %v18036_v54, %s15827_s11 }
 0xe0f   :  { %4370 = vrot.lane.b32.xlu1 %v4350_v14, %s15828_s21  ;;  %v8992_v14 = vld [vmem:[#allocation3 + $0x20] sm:$0xff] }
 0xe7d   :  { %v8995_v42 = vpop.permute.xlu1 %8994 }
 0xe7e   :  { %v8997_v11 = vmul.f32 %v8995_v42, %v17987_v37 }
 0xe80   :  { %v8999_v63 = vsel %vm45_vm0, %v8997_v11, 0 }
 0xe81   :  { %v9070_v10 = vand.u32 4294901760, %v8999_v63  ;;  %v4371_v9 = vpop.permute.xlu1 %4370 }
 0xe82   :  { %v4398_v3 = vsel %vm1818_vm1, %v4371_v9, 0.0  ;;  %v12560_v9 = vld [vmem:[%s18407_s0 + $0x60] sm:$0xff] }
 0xe83   :  { %v9071_v46 = vsub.f32 %v8999_v63, %v9070_v10  ;;  %14253 = vmatmul.mubr.f32.vlgmr.msra.gmra.mrb[116].mxu0 %v9070_v10  ;;  %4399 = vadd.xlane.f32.xlu1 %v4398_v3 }
 0xe84   :  { %15369 = vmatpush3.bf16.msra.mxu0 %v17492_v47  ;;  %14274 = vmatprep.mubr.msk.f32.mxu0 %vm15826_vm2, %v18687_v28 }
 0xe85   :  { %15370 = vmatprep.subr.bf16.mxu0 %v18671_v59  ;;  %v9072_v22 = vand.u32 4294901760, %v9071_v46 }
 0xe87   :  { %v9073_v27 = vsub.f32 %v9071_v46, %v9072_v22 }
 0xe88   :  { %15372 = vmatpush3.bf16.msra.mxu0 %v17494_v45 }
 0xe89   :  { %15379 = vmatprep.subr.bf16.mxu0 %v18671_v59  ;;  %v9074_v62 = vand.u32 4294901760, %v9073_v27 }
 0xe8b   :  { %14275 = vmatmul.mubr.f32.vlgmr.msra.gmra.mrb[118].mxu0 %v9072_v22  ;;  %14242 = vmatmul.mubr.f32.vlgmr.msra.gmra.mrb[126].mxu1 %v9074_v62 }
 0xe8c   :  { %15363 = vmatpush3.bf16.msra.mxu1 %v17511_v12  ;;  %15381 = vmatpush3.bf16.msra.mxu0 %v17492_v47 }
 0xe8d   :  { %15364 = vmatprep.subr.bf16.mxu1 %v18671_v59  ;;  %15382 = vmatprep.subr.bf16.mxu0 %v18671_v59 }
 0xe8e   :  { %14263 = vmatprep.mubr.msk.f32.mxu1 %vm15826_vm2, %v18687_v28  ;;  %14296 = vmatprep.mubr.msk.f32.mxu0 %vm15826_vm2, %v18687_v28 }
 0xe90   :  { %15366 = vmatpush3.bf16.msra.mxu1 %v17514_v13  ;;  %15384 = vmatpush3.bf16.msra.mxu0 %v17494_v45 }
 0xe91   :  { %15373 = vmatprep.subr.bf16.mxu1 %v18671_v59  ;;  %15391 = vmatprep.subr.bf16.mxu0 %v18671_v59 }
 0xe93   :  { %14264 = vmatmul.mubr.f32.vlgmr.msra.gmra.mrb[128].mxu1 %v9071_v46  ;;  %14297 = vmatmul.mubr.f32.vlgmr.msra.gmra.mrb[120].mxu0 %v9070_v10 }
 0xe94   :  { %15375 = vmatpush3.bf16.msra.mxu1 %v17520_v21  ;;  %1789 = vrot.lane.b32.xlu1 %v1768_v55, %s15829_s24 }
 0xe95   :  { %15376 = vmatprep.subr.bf16.mxu1 %v18671_v59  ;;  %14285 = vmatprep.mubr.msk.f32.mxu1 %vm15826_vm2, %v18687_v28 }
 0xe96   :  { %15393 = vmatpush3.bf16.msra.mxu0 %v17387_v19  ;;  %14318 = vmatprep.mubr.msk.f32.mxu0 %vm15826_vm2, %v18687_v28 }
 0xe97   :  { %15394 = vmatprep.subr.bf16.mxu0 %v18671_v59 }
 0xe98   :  { %15378 = vmatpush3.bf16.msra.mxu1 %v17522_v56 }
 0xe99   :  { %15385 = vmatprep.subr.bf16.mxu1 %v18671_v59 }
 0xe9a   :  { %15396 = vmatpush3.bf16.msra.mxu0 %v17394_v17 }
 0xe9b   :  { %14286 = vmatmul.mubr.f32.vlgmr.msra.gmra.mrb[130].mxu1 %v9070_v10  ;;  %15403 = vmatprep.subr.bf16.mxu0 %v18671_v59 }
 0xe9c   :  { %15387 = vmatpush3.bf16.msra.mxu1 %v17331_v1  ;;  %14307 = vmatprep.mubr.msk.f32.mxu1 %vm15826_vm2, %v18687_v28 }
 0xe9d   :  { %15388 = vmatprep.subr.bf16.mxu1 %v18671_v59 }
 0xea0   :  { %15390 = vmatpush3.bf16.msra.mxu1 %v17341_v25 }
 0xea1   :  { %15397 = vmatprep.subr.bf16.mxu1 %v18671_v59 }
 0xf10   :  { %v4400_v23 = vpop.xlane.xlu1 %4399 }
 0xf11   :  { %v4414_v36 = vadd.f32 %v18087_v57, %v4400_v23 }
 0xf13   :  { %4440 = vperm.xlu0 %15738, %v4414_v36  }
 0xf14   :  { %v1790_v34 = vpop.permute.xlu1 %1789 }
 0xf15   :  { %1808 = vst.msk [vmem:[#allocation3 + $0x28] sm:$0xff] %vm45_vm0, %v1790_v34 }
 0xf56   :  { %v9167_v50 = vpop.f32.mrb[116].mxu0 }
 0xf57   :  { %v14254_v5 = vpop.f32.mrb[117].mxu0 }
 0xf5e   :  { %v9324_v38 = vpop.f32.mrb[118].mxu0  ;;  %v9076_v35 = vpop.f32.mrb[126].mxu1 }
 0xf5f   :  { %v9168_v8 = vadd.f32 %v9167_v50, %v9076_v35  ;;  %v14276_v16 = vpop.f32.mrb[119].mxu0  ;;  %v14243_v51 = vpop.f32.mrb[127].mxu1 }
 0xf66   :  { %v9247_v0 = vpop.f32.mrb[128].mxu1  ;;  %v9482_v60 = vpop.f32.mrb[120].mxu0 }
 0xf67   :  { %v9248_v32 = vadd.f32 %v9247_v0, %v9168_v8  ;;  %v14265_v24 = vpop.f32.mrb[129].mxu1  ;;  %v14298_v53 = vpop.f32.mrb[121].mxu0  ;;  %v12545_v0 = vmul.f32 -1.442695, %v17588_v4 }
 0xf69   :  { %v9325_v49 = vadd.f32 %v9324_v38, %v9248_v32 }
 0xf6e   :  { %v9407_v18 = vpop.f32.mrb[130].mxu1 }
 0xf6f   :  { %v9408_v2 = vadd.f32 %v9407_v18, %v9325_v49  ;;  %v14287_v30 = vpop.f32.mrb[131].mxu1 }
 0xf71   :  { %v9483_v26 = vadd.f32 %v9482_v60, %v9408_v2 }
 0xf73   :  { %v9486_v42 = vadd.f32 %v9483_v26, %v8992_v14 }
 0xf75   :  { %15790 = vtanh.f32 %v9486_v42 }
 0xf76   :  { %15792 = vpow2.f32 %v12545_v0 }
 0xf7f   :  { %v15791_v63 = vpop.eup %15790 }
 0xf80   :  { %v9492_v46 = vsub.f32 %v15791_v63, %v17987_v37  ;;  %v15793_v2 = vpop.eup %15792  ;;  %v9498_v63 = vld [vmem:[#allocation2 + $0x28] sm:$0xff] }
 0xf81   :  { %v4279_v42 = vadd.f32 1.0, %v15793_v2 }
 0xf83   :  { %15794 = vrcp.f32 %v4279_v42 }
 0xf92   :  { %v4441_v11 = vpop.permute.xlu0 %4440 }
 0xf93   :  { %4462 = vst.msk [vmem:[#allocation4 + $0x20] sm:$0xff] %vm45_vm0, %v4441_v11 }
 0xf9a   :  { %v8989_v10 = vld [vmem:[#allocation4 + $0x20] sm:$0xff] }
 0xf9b   :  { %v8990_v3 = vmul.f32 %v18036_v54, %v8989_v10 }
 0xf9d   :  { %v9491_v22 = vmul.f32 %v12560_v9, %v8990_v3  ;;  %v15795_v3 = vpop.eup %15794 }
 0xf9f   :  { %v9493_v27 = vmul.f32 %v9492_v46, %v9491_v22  ;;  %v4311_v46 = vsub.f32 1.0, %v15795_v3 }
 0xfa1   :  { %v18098_v62 = vadd.f32 %v9493_v27, %v17987_v37  ;;  %v4323_v27 = vmul.f32 %v17611_v6, %v4311_v46 }
 0xfa3   :  { %12561 = vst.msk [vmem:[%s18410_s4 + $0x20] sm:$0xff] %vm45_vm0, %v18098_v62  ;;  %v9500_v55 = vsel %vm45_vm0, %v18098_v62, 0 }
 0xfa4   :  { %v9571_v23 = vand.u32 4294901760, %v9500_v55 }
 0xfa6   :  { %v9572_v36 = vsub.f32 %v9500_v55, %v9571_v23  ;;  %14319 = vmatmul.mubr.f32.vlgmr.msra.gmra.mrb[122].mxu0 %v9571_v23  ;;  %v4331_v55 = vmul.f32 %v4323_v27, %v17544_v44 }
 0xfa7   :  { %15405 = vmatpush3.bf16.msra.mxu0 %v17331_v1  ;;  %14340 = vmatprep.mubr.msk.f32.mxu0 %vm15826_vm2, %v18687_v28 }
 0xfa8   :  { %15406 = vmatprep.subr.bf16.mxu0 %v18671_v59  ;;  %v9573_v37 = vand.u32 4294901760, %v9572_v36 }
 0xfaa   :  { %v9574_v54 = vsub.f32 %v9572_v36, %v9573_v37 }
 0xfab   :  { %15408 = vmatpush3.bf16.msra.mxu0 %v17341_v25 }
 0xfac   :  { %15415 = vmatprep.subr.bf16.mxu0 %v18671_v59  ;;  %v9575_v34 = vand.u32 4294901760, %v9574_v54 }
 0xfae   :  { %14341 = vmatmul.mubr.f32.vlgmr.msra.gmra.mrb[124].mxu0 %v9573_v37  ;;  %14308 = vmatmul.mubr.f32.vlgmr.msra.gmra.mrb[132].mxu1 %v9575_v34 }
 0xfaf   :  { %15399 = vmatpush3.bf16.msra.mxu1 %v17402_v31  ;;  %15417 = vmatpush3.bf16.msra.mxu0 %v17331_v1 }
 0xfb0   :  { %15400 = vmatprep.subr.bf16.mxu1 %v18671_v59  ;;  %15418 = vmatprep.subr.bf16.mxu0 %v18671_v59 }
 0xfb1   :  { %14329 = vmatprep.mubr.msk.f32.mxu1 %vm15826_vm2, %v18687_v28  ;;  %14362 = vmatprep.mubr.msk.f32.mxu0 %vm15826_vm2, %v18687_v28 }
 0xfb3   :  { %15402 = vmatpush3.bf16.msra.mxu1 %v17407_v7  ;;  %15420 = vmatpush3.bf16.msra.mxu0 %v17341_v25 }
 0xfb4   :  { %15409 = vmatprep.subr.bf16.mxu1 %v18671_v59  ;;  %15427 = vmatprep.subr.bf16.mxu0 %v18671_v59 }
 0xfb6   :  { %14330 = vmatmul.mubr.f32.vlgmr.msra.gmra.mrb[134].mxu1 %v9572_v36  ;;  %14363 = vmatmul.mubr.f32.vlgmr.msra.gmra.mrb[126].mxu0 %v9571_v23 }
 0xfb7   :  { %15411 = vmatpush3.bf16.msra.mxu1 %v17413_v20  ;;  %14351 = vmatprep.mubr.msk.f32.mxu1 %vm15826_vm2, %v18687_v28 }
 0xfb8   :  { %15412 = vmatprep.subr.bf16.mxu1 %v18671_v59  ;;  %15429 = vmatpush3.bf16.msra.mxu0 %v17500_v39 }
 0xfb9   :  { %15430 = vmatprep.subr.bf16.mxu0 %v18671_v59  ;;  %14384 = vmatprep.mubr.msk.f32.mxu0 %vm15826_vm2, %v18687_v28 }
 0xfbb   :  { %15414 = vmatpush3.bf16.msra.mxu1 %v17418_v40 }
 0xfbc   :  { %15432 = vmatpush3.bf16.msra.mxu0 %v17503_v33  ;;  %15421 = vmatprep.subr.bf16.mxu1 %v18671_v59 }
 0xfbd   :  { %15439 = vmatprep.subr.bf16.mxu0 %v18671_v59 }
 0xfbe   :  { %14352 = vmatmul.mubr.f32.vlgmr.msra.gmra.mrb[136].mxu1 %v9571_v23  ;;  %v4303_v23 = vmul.f32 %v15795_v3, %v17544_v44 }
 0xfbf   :  { %15423 = vmatpush3.bf16.msra.mxu1 %v17492_v47  ;;  %14373 = vmatprep.mubr.msk.f32.mxu1 %vm15826_vm2, %v18687_v28 }
 0xfc0   :  { %15424 = vmatprep.subr.bf16.mxu1 %v18671_v59  ;;  %v4339_v36 = vadd.f32 %v4331_v55, %v4303_v23  ;;  %v9998_v55 = vld [vmem:[#allocation3 + $0x28] sm:$0xff] }
 0xfc2   :  { %v4351_v54 = vmul.f32 %v17623_v61, %v4339_v36 }
 0xfc3   :  { %15426 = vmatpush3.bf16.msra.mxu1 %v17494_v45 }
 0xfc4   :  { %15433 = vmatprep.subr.bf16.mxu1 %v18671_v59 }
0x1079   :  { %v9668_v50 = vpop.f32.mrb[122].mxu0 }
0x107a   :  { %v14320_v5 = vpop.f32.mrb[123].mxu0 }
0x1081   :  { %v9825_v38 = vpop.f32.mrb[124].mxu0  ;;  %v9577_v35 = vpop.f32.mrb[132].mxu1 }
0x1082   :  { %v9669_v8 = vadd.f32 %v9668_v50, %v9577_v35  ;;  %v14342_v16 = vpop.f32.mrb[125].mxu0  ;;  %v14309_v51 = vpop.f32.mrb[133].mxu1 }
0x1089   :  { %v9748_v60 = vpop.f32.mrb[134].mxu1  ;;  %v9983_v32 = vpop.f32.mrb[126].mxu0 }
0x108a   :  { %v9749_v24 = vadd.f32 %v9748_v60, %v9669_v8  ;;  %v14331_v53 = vpop.f32.mrb[135].mxu1  ;;  %v14364_v49 = vpop.f32.mrb[127].mxu0  ;;  %v1769_v60 = vadd.f32 %v17645_v29, %v18694_v41 }
0x108c   :  { %v9826_v18 = vadd.f32 %v9825_v38, %v9749_v24 }
0x1091   :  { %v9908_v30 = vpop.f32.mrb[136].mxu1 }
0x1092   :  { %v9909_v26 = vadd.f32 %v9908_v30, %v9826_v18  ;;  %v14353_v14 = vpop.f32.mrb[137].mxu1 }
0x1094   :  { %v9984_v11 = vadd.f32 %v9983_v32, %v9909_v26 }
0x1096   :  { %v9987_v10 = vadd.f32 %v9984_v11, %v9498_v63 }
0x1098   :  { %v12562_v9 = vmul.f32 -1.442695, %v9987_v10 }
0x109a   :  { %15796 = vpow2.f32 %v12562_v9 }
0x10a4   :  { %v15797_v4 = vpop.eup %15796 }
0x10a5   :  { %v9991_v22 = vadd.f32 1.0, %v15797_v4 }
0x10a7   :  { %15798 = vrcp.f32 %v9991_v22 }
0x10b1   :  { %v18147_v37 = vpop.eup %15798 }
0x10b2   :  { %10000 = vrot.lane.b32.xlu0 %v18147_v37, %s15827_s11 }
0x10b6   :  { %4372 = vrot.lane.b32.xlu0 %v4351_v54, %s15828_s21 }
0x1124   :  { %v10001_v34 = vpop.permute.xlu0 %10000 }
0x1125   :  { %v10003_v50 = vmul.f32 %v10001_v34, %v18098_v62 }
0x1127   :  { %v10005_v5 = vsel %vm45_vm0, %v10003_v50, 0  ;;  %v12563_v50 = vld [vmem:[%s18407_s0 + $0x68] sm:$0xff] }
0x1128   :  { %v10076_v38 = vand.u32 4294901760, %v10005_v5  ;;  %v4373_v35 = vpop.permute.xlu0 %4372 }
0x1129   :  { %v4401_v8 = vsel %vm1818_vm1, %v4373_v35, 0.0 }
0x112a   :  { %v10077_v44 = vsub.f32 %v10005_v5, %v10076_v38  ;;  %14385 = vmatmul.mubr.f32.vlgmr.msra.gmra.mrb[128].mxu0 %v10076_v38  ;;  %4402 = vadd.xlane.f32.xlu0 %v4401_v8 }
0x112b   :  { %15441 = vmatpush3.bf16.msra.mxu0 %v17492_v47  ;;  %14406 = vmatprep.mubr.msk.f32.mxu0 %vm15826_vm2, %v18687_v28 }
0x112c   :  { %15442 = vmatprep.subr.bf16.mxu0 %v18671_v59  ;;  %v10078_v16 = vand.u32 4294901760, %v10077_v44 }
0x112e   :  { %v10079_v51 = vsub.f32 %v10077_v44, %v10078_v16 }
0x112f   :  { %15444 = vmatpush3.bf16.msra.mxu0 %v17494_v45 }
0x1130   :  { %15451 = vmatprep.subr.bf16.mxu0 %v18671_v59  ;;  %v10080_v0 = vand.u32 4294901760, %v10079_v51 }
0x1132   :  { %14407 = vmatmul.mubr.f32.vlgmr.msra.gmra.mrb[130].mxu0 %v10078_v16  ;;  %14374 = vmatmul.mubr.f32.vlgmr.msra.gmra.mrb[138].mxu1 %v10080_v0 }
0x1133   :  { %15435 = vmatpush3.bf16.msra.mxu1 %v17511_v12  ;;  %15453 = vmatpush3.bf16.msra.mxu0 %v17492_v47 }
0x1134   :  { %15436 = vmatprep.subr.bf16.mxu1 %v18671_v59  ;;  %15454 = vmatprep.subr.bf16.mxu0 %v18671_v59 }
0x1135   :  { %14395 = vmatprep.mubr.msk.f32.mxu1 %vm15826_vm2, %v18687_v28  ;;  %14428 = vmatprep.mubr.msk.f32.mxu0 %vm15826_vm2, %v18687_v28 }
0x1137   :  { %15438 = vmatpush3.bf16.msra.mxu1 %v17514_v13  ;;  %15456 = vmatpush3.bf16.msra.mxu0 %v17494_v45 }
0x1138   :  { %15445 = vmatprep.subr.bf16.mxu1 %v18671_v59  ;;  %15463 = vmatprep.subr.bf16.mxu0 %v18671_v59 }
0x113a   :  { %14396 = vmatmul.mubr.f32.vlgmr.msra.gmra.mrb[140].mxu1 %v10077_v44  ;;  %14429 = vmatmul.mubr.f32.vlgmr.msra.gmra.mrb[132].mxu0 %v10076_v38 }
0x113b   :  { %15447 = vmatpush3.bf16.msra.mxu1 %v17520_v21  ;;  %14417 = vmatprep.mubr.msk.f32.mxu1 %vm15826_vm2, %v18687_v28 }
0x113c   :  { %15448 = vmatprep.subr.bf16.mxu1 %v18671_v59  ;;  %15465 = vmatpush3.bf16.msra.mxu0 %v17387_v19 }
0x113d   :  { %15466 = vmatprep.subr.bf16.mxu0 %v18671_v59  ;;  %14450 = vmatprep.mubr.msk.f32.mxu0 %vm15826_vm2, %v18687_v28 }
0x113f   :  { %15450 = vmatpush3.bf16.msra.mxu1 %v17522_v56 }
0x1140   :  { %1791 = vrot.lane.b32.xlu0 %v1769_v60, %s15829_s24  ;;  %15468 = vmatpush3.bf16.msra.mxu0 %v17394_v17 }
0x1141   :  { %15457 = vmatprep.subr.bf16.mxu1 %v18671_v59  ;;  %15475 = vmatprep.subr.bf16.mxu0 %v18671_v59 }
0x1142   :  { %14418 = vmatmul.mubr.f32.vlgmr.msra.gmra.mrb[142].mxu1 %v10076_v38 }
0x1143   :  { %15459 = vmatpush3.bf16.msra.mxu1 %v17331_v1  ;;  %14439 = vmatprep.mubr.msk.f32.mxu1 %vm15826_vm2, %v18687_v28 }
0x1144   :  { %15460 = vmatprep.subr.bf16.mxu1 %v18671_v59 }
0x1147   :  { %15462 = vmatpush3.bf16.msra.mxu1 %v17341_v25 }
0x1148   :  { %15469 = vmatprep.subr.bf16.mxu1 %v18671_v59 }
0x11b7   :  { %v4403_v41 = vpop.xlane.xlu0 %4402 }
0x11b8   :  { %v4415_v32 = vadd.f32 %v18087_v57, %v4403_v41 }
0x11ba   :  { %4445 = vperm.xlu1 %15739, %v4415_v32  }
0x11bb   :  { %v1792_v24 = vpop.permute.xlu0 %1791 }
0x11bc   :  { %1809 = vst.msk [vmem:[#allocation3 + $0x30] sm:$0xff] %vm45_vm0, %v1792_v24 }
0x11fd   :  { %v10173_v53 = vpop.f32.mrb[128].mxu0 }
0x11fe   :  { %v14386_v49 = vpop.f32.mrb[129].mxu0 }
0x1205   :  { %v10330_v18 = vpop.f32.mrb[130].mxu0  ;;  %v10082_v2 = vpop.f32.mrb[138].mxu1 }
0x1206   :  { %v10174_v30 = vadd.f32 %v10173_v53, %v10082_v2  ;;  %v14408_v26 = vpop.f32.mrb[131].mxu0  ;;  %v14375_v14 = vpop.f32.mrb[139].mxu1 }
0x120d   :  { %v10253_v42 = vpop.f32.mrb[140].mxu1  ;;  %v10488_v11 = vpop.f32.mrb[132].mxu0 }
0x120e   :  { %v10254_v63 = vadd.f32 %v10253_v42, %v10174_v30  ;;  %v14397_v10 = vpop.f32.mrb[141].mxu1  ;;  %v14430_v9 = vpop.f32.mrb[133].mxu0  ;;  %v12546_v30 = vmul.f32 -1.442695, %v17590_v48 }
0x1210   :  { %v10331_v3 = vadd.f32 %v10330_v18, %v10254_v63 }
0x1215   :  { %v10413_v4 = vpop.f32.mrb[142].mxu1 }
0x1216   :  { %v10414_v46 = vadd.f32 %v10413_v4, %v10331_v3  ;;  %v14419_v22 = vpop.f32.mrb[143].mxu1 }
0x1218   :  { %v10489_v27 = vadd.f32 %v10488_v11, %v10414_v46 }
0x121a   :  { %v10492_v23 = vadd.f32 %v10489_v27, %v9998_v55  ;;  %v10504_v55 = vld [vmem:[#allocation2 + $0x30] sm:$0xff] }
0x121c   :  { %15800 = vtanh.f32 %v10492_v23 }
0x121d   :  { %15802 = vpow2.f32 %v12546_v30 }
0x1226   :  { %v15801_v54 = vpop.eup %15800 }
0x1227   :  { %v10498_v38 = vsub.f32 %v15801_v54, %v18098_v62  ;;  %v15803_v9 = vpop.eup %15802 }
0x1228   :  { %v4280_v22 = vadd.f32 1.0, %v15803_v9 }
0x122a   :  { %15804 = vrcp.f32 %v4280_v22 }
0x1234   :  { %v15805_v54 = vpop.eup %15804 }
0x1239   :  { %v4446_v36 = vpop.permute.xlu1 %4445 }
0x123a   :  { %4463 = vst.msk [vmem:[#allocation4 + $0x28] sm:$0xff] %vm45_vm0, %v4446_v36 }
0x1241   :  { %v9995_v34 = vld [vmem:[#allocation4 + $0x28] sm:$0xff] }
0x1242   :  { %v9996_v5 = vmul.f32 %v18147_v37, %v9995_v34  ;;  %v4312_v34 = vsub.f32 1.0, %v15805_v54 }
0x1244   :  { %v10497_v35 = vmul.f32 %v12563_v50, %v9996_v5  ;;  %v4324_v5 = vmul.f32 %v17611_v6, %v4312_v34 }
0x1246   :  { %v10499_v8 = vmul.f32 %v10498_v38, %v10497_v35  ;;  %v4332_v38 = vmul.f32 %v4324_v5, %v17560_v58  ;;  %v4304_v35 = vmul.f32 %v15805_v54, %v17560_v58  ;;  %v12566_v5 = vld [vmem:[%s18407_s0 + $0x70] sm:$0xff] }
0x1248   :  { %v18204_v44 = vadd.f32 %v10499_v8, %v18098_v62  ;;  %v4340_v8 = vadd.f32 %v4332_v38, %v4304_v35 }
0x124a   :  { %12564 = vst.msk [vmem:[%s18410_s4 + $0x28] sm:$0xff] %vm45_vm0, %v18204_v44  ;;  %v10506_v16 = vsel %vm45_vm0, %v18204_v44, 0 }
0x124b   :  { %v10577_v51 = vand.u32 4294901760, %v10506_v16 }
0x124d   :  { %v10578_v0 = vsub.f32 %v10506_v16, %v10577_v51  ;;  %14451 = vmatmul.mubr.f32.vlgmr.msra.gmra.mrb[134].mxu0 %v10577_v51 }
0x124e   :  { %15477 = vmatpush3.bf16.msra.mxu0 %v17331_v1  ;;  %14472 = vmatprep.mubr.msk.f32.mxu0 %vm15826_vm2, %v18687_v28 }
0x124f   :  { %15478 = vmatprep.subr.bf16.mxu0 %v18671_v59  ;;  %v10579_v62 = vand.u32 4294901760, %v10578_v0 }
0x1251   :  { %v10580_v37 = vsub.f32 %v10578_v0, %v10579_v62 }
0x1252   :  { %15480 = vmatpush3.bf16.msra.mxu0 %v17341_v25 }
0x1253   :  { %15487 = vmatprep.subr.bf16.mxu0 %v18671_v59  ;;  %v10581_v60 = vand.u32 4294901760, %v10580_v37 }
0x1255   :  { %14473 = vmatmul.mubr.f32.vlgmr.msra.gmra.mrb[136].mxu0 %v10579_v62  ;;  %14440 = vmatmul.mubr.f32.vlgmr.msra.gmra.mrb[144].mxu1 %v10581_v60 }
0x1256   :  { %15471 = vmatpush3.bf16.msra.mxu1 %v17402_v31  ;;  %15489 = vmatpush3.bf16.msra.mxu0 %v17331_v1 }
0x1257   :  { %15472 = vmatprep.subr.bf16.mxu1 %v18671_v59  ;;  %15490 = vmatprep.subr.bf16.mxu0 %v18671_v59 }
0x1258   :  { %14461 = vmatprep.mubr.msk.f32.mxu1 %vm15826_vm2, %v18687_v28  ;;  %14494 = vmatprep.mubr.msk.f32.mxu0 %vm15826_vm2, %v18687_v28 }
0x125a   :  { %15474 = vmatpush3.bf16.msra.mxu1 %v17407_v7  ;;  %15492 = vmatpush3.bf16.msra.mxu0 %v17341_v25 }
0x125b   :  { %15481 = vmatprep.subr.bf16.mxu1 %v18671_v59  ;;  %15499 = vmatprep.subr.bf16.mxu0 %v18671_v59 }
0x125d   :  { %14462 = vmatmul.mubr.f32.vlgmr.msra.gmra.mrb[146].mxu1 %v10578_v0  ;;  %14495 = vmatmul.mubr.f32.vlgmr.msra.gmra.mrb[138].mxu0 %v10577_v51 }
0x125e   :  { %15483 = vmatpush3.bf16.msra.mxu1 %v17413_v20  ;;  %14483 = vmatprep.mubr.msk.f32.mxu1 %vm15826_vm2, %v18687_v28 }
0x125f   :  { %15484 = vmatprep.subr.bf16.mxu1 %v18671_v59  ;;  %15501 = vmatpush3.bf16.msra.mxu0 %v17500_v39 }
0x1260   :  { %15502 = vmatprep.subr.bf16.mxu0 %v18671_v59  ;;  %14516 = vmatprep.mubr.msk.f32.mxu0 %vm15826_vm2, %v18687_v28 }
0x1262   :  { %15486 = vmatpush3.bf16.msra.mxu1 %v17418_v40 }
0x1263   :  { %15504 = vmatpush3.bf16.msra.mxu0 %v17503_v33  ;;  %15493 = vmatprep.subr.bf16.mxu1 %v18671_v59 }
0x1264   :  { %15511 = vmatprep.subr.bf16.mxu0 %v18671_v59 }
0x1265   :  { %14484 = vmatmul.mubr.f32.vlgmr.msra.gmra.mrb[148].mxu1 %v10577_v51  ;;  %v4352_v51 = vmul.f32 %v17623_v61, %v4340_v8 }
0x1266   :  { %15495 = vmatpush3.bf16.msra.mxu1 %v17492_v47  ;;  %14505 = vmatprep.mubr.msk.f32.mxu1 %vm15826_vm2, %v18687_v28 }
0x1267   :  { %15496 = vmatprep.subr.bf16.mxu1 %v18671_v59 }
0x126a   :  { %15498 = vmatpush3.bf16.msra.mxu1 %v17494_v45 }
0x126b   :  { %15505 = vmatprep.subr.bf16.mxu1 %v18671_v59 }
0x1320   :  { %v10674_v41 = vpop.f32.mrb[134].mxu0 }
0x1321   :  { %v14452_v32 = vpop.f32.mrb[135].mxu0 }
0x1328   :  { %v10831_v24 = vpop.f32.mrb[136].mxu0  ;;  %v10583_v53 = vpop.f32.mrb[144].mxu1 }
0x1329   :  { %v10675_v49 = vadd.f32 %v10674_v41, %v10583_v53  ;;  %v14474_v18 = vpop.f32.mrb[137].mxu0  ;;  %v14441_v2 = vpop.f32.mrb[145].mxu1 }
0x132a   :  { %v1770_v18 = vadd.f32 %v18695_v43, %v17645_v29 }
0x1330   :  { %v10754_v26 = vpop.f32.mrb[146].mxu1  ;;  %v10989_v14 = vpop.f32.mrb[138].mxu0 }
0x1331   :  { %v10755_v42 = vadd.f32 %v10754_v26, %v10675_v49  ;;  %v14463_v11 = vpop.f32.mrb[147].mxu1  ;;  %v14496_v63 = vpop.f32.mrb[139].mxu0 }
0x1333   :  { %v10832_v10 = vadd.f32 %v10831_v24, %v10755_v42 }
0x1338   :  { %v10914_v3 = vpop.f32.mrb[148].mxu1 }
0x1339   :  { %v10915_v4 = vadd.f32 %v10914_v3, %v10832_v10  ;;  %v14485_v46 = vpop.f32.mrb[149].mxu1 }
0x133b   :  { %v10990_v27 = vadd.f32 %v10989_v14, %v10915_v4 }
0x133d   :  { %v10993_v23 = vadd.f32 %v10990_v27, %v10504_v55 }
0x133f   :  { %v12565_v36 = vmul.f32 -1.442695, %v10993_v23 }
0x1341   :  { %15806 = vpow2.f32 %v12565_v36  ;;  %v11004_v36 = vld [vmem:[#allocation3 + $0x30] sm:$0xff] }
0x134b   :  { %v15807_v48 = vpop.eup %15806 }
0x134c   :  { %v10997_v50 = vadd.f32 1.0, %v15807_v48 }
0x134e   :  { %15808 = vrcp.f32 %v10997_v50 }
0x1358   :  { %v18253_v16 = vpop.eup %15808 }
0x1359   :  { %11006 = vrot.lane.b32.xlu1 %v18253_v16, %s15827_s11 }
0x135d   :  { %4374 = vrot.lane.b32.xlu1 %v4352_v51, %s15828_s21 }
0x13cb   :  { %v11007_v0 = vpop.permute.xlu1 %11006 }
0x13cc   :  { %v11009_v62 = vmul.f32 %v11007_v0, %v18204_v44 }
0x13ce   :  { %v11011_v37 = vsel %vm45_vm0, %v11009_v62, 0 }
0x13cf   :  { %v11082_v60 = vand.u32 4294901760, %v11011_v37  ;;  %v4375_v41 = vpop.permute.xlu1 %4374 }
0x13d0   :  { %v4404_v32 = vsel %vm1818_vm1, %v4375_v41, 0.0 }
0x13d1   :  { %v11083_v58 = vsub.f32 %v11011_v37, %v11082_v60  ;;  %14517 = vmatmul.mubr.f32.vlgmr.msra.gmra.mrb[140].mxu0 %v11082_v60  ;;  %4405 = vadd.xlane.f32.xlu1 %v4404_v32 }
0x13d2   :  { %15513 = vmatpush3.bf16.msra.mxu0 %v17492_v47  ;;  %14538 = vmatprep.mubr.msk.f32.mxu0 %vm15826_vm2, %v18687_v28 }
0x13d3   :  { %15514 = vmatprep.subr.bf16.mxu0 %v18671_v59  ;;  %v11084_v24 = vand.u32 4294901760, %v11083_v58 }
0x13d5   :  { %v11085_v53 = vsub.f32 %v11083_v58, %v11084_v24 }
0x13d6   :  { %15516 = vmatpush3.bf16.msra.mxu0 %v17494_v45 }
0x13d7   :  { %15523 = vmatprep.subr.bf16.mxu0 %v18671_v59  ;;  %v11086_v49 = vand.u32 4294901760, %v11085_v53 }
0x13d9   :  { %14539 = vmatmul.mubr.f32.vlgmr.msra.gmra.mrb[142].mxu0 %v11084_v24  ;;  %14506 = vmatmul.mubr.f32.vlgmr.msra.gmra.mrb[150].mxu1 %v11086_v49 }
0x13da   :  { %15507 = vmatpush3.bf16.msra.mxu1 %v17511_v12  ;;  %15525 = vmatpush3.bf16.msra.mxu0 %v17492_v47 }
0x13db   :  { %15508 = vmatprep.subr.bf16.mxu1 %v18671_v59  ;;  %15526 = vmatprep.subr.bf16.mxu0 %v18671_v59 }
0x13dc   :  { %14527 = vmatprep.mubr.msk.f32.mxu1 %vm15826_vm2, %v18687_v28  ;;  %14560 = vmatprep.mubr.msk.f32.mxu0 %vm15826_vm2, %v18687_v28 }
0x13de   :  { %15510 = vmatpush3.bf16.msra.mxu1 %v17514_v13  ;;  %15528 = vmatpush3.bf16.msra.mxu0 %v17494_v45 }
0x13df   :  { %15517 = vmatprep.subr.bf16.mxu1 %v18671_v59  ;;  %15535 = vmatprep.subr.bf16.mxu0 %v18671_v59 }
0x13e1   :  { %14528 = vmatmul.mubr.f32.vlgmr.msra.gmra.mrb[152].mxu1 %v11083_v58  ;;  %14561 = vmatmul.mubr.f32.vlgmr.msra.gmra.mrb[144].mxu0 %v11082_v60 }
0x13e2   :  { %15519 = vmatpush3.bf16.msra.mxu1 %v17520_v21  ;;  %1793 = vrot.lane.b32.xlu1 %v1770_v18, %s15829_s24 }
0x13e3   :  { %15520 = vmatprep.subr.bf16.mxu1 %v18671_v59  ;;  %14549 = vmatprep.mubr.msk.f32.mxu1 %vm15826_vm2, %v18687_v28 }
0x13e4   :  { %15537 = vmatpush3.bf16.msra.mxu0 %v17387_v19  ;;  %14582 = vmatprep.mubr.msk.f32.mxu0 %vm15826_vm2, %v18687_v28 }
0x13e5   :  { %15538 = vmatprep.subr.bf16.mxu0 %v18671_v59 }
0x13e6   :  { %15522 = vmatpush3.bf16.msra.mxu1 %v17522_v56 }
0x13e7   :  { %15529 = vmatprep.subr.bf16.mxu1 %v18671_v59 }
0x13e8   :  { %15540 = vmatpush3.bf16.msra.mxu0 %v17394_v17 }
0x13e9   :  { %14550 = vmatmul.mubr.f32.vlgmr.msra.gmra.mrb[154].mxu1 %v11082_v60  ;;  %15547 = vmatprep.subr.bf16.mxu0 %v18671_v59 }
0x13ea   :  { %15531 = vmatpush3.bf16.msra.mxu1 %v17331_v1  ;;  %14571 = vmatprep.mubr.msk.f32.mxu1 %vm15826_vm2, %v18687_v28 }
0x13eb   :  { %15532 = vmatprep.subr.bf16.mxu1 %v18671_v59 }
0x13ee   :  { %15534 = vmatpush3.bf16.msra.mxu1 %v17341_v25 }
0x13ef   :  { %15541 = vmatprep.subr.bf16.mxu1 %v18671_v59 }
0x145e   :  { %v4406_v19 = vpop.xlane.xlu1 %4405 }
0x145f   :  { %v4416_v43 = vadd.f32 %v18087_v57, %v4406_v19 }
0x1461   :  { %4450 = vperm.xlu0 %15738, %v4416_v43  }
0x1462   :  { %v1794_v29 = vpop.permute.xlu1 %1793 }
0x1463   :  { %1810 = vst.msk [vmem:[#allocation3 + $0x38] sm:$0xff] %vm45_vm0, %v1794_v29 }
0x14a4   :  { %v11179_v17 = vpop.f32.mrb[140].mxu0 }
0x14a5   :  { %v14518_v2 = vpop.f32.mrb[141].mxu0 }
0x14ac   :  { %v11336_v30 = vpop.f32.mrb[142].mxu0  ;;  %v11088_v26 = vpop.f32.mrb[150].mxu1 }
0x14ad   :  { %v11180_v14 = vadd.f32 %v11179_v17, %v11088_v26  ;;  %v14540_v42 = vpop.f32.mrb[143].mxu0  ;;  %v14507_v11 = vpop.f32.mrb[151].mxu1  ;;  %v11510_v26 = vld [vmem:[#allocation2 + $0x38] sm:$0xff] }
0x14b4   :  { %v11259_v63 = vpop.f32.mrb[152].mxu1  ;;  %v11494_v10 = vpop.f32.mrb[144].mxu0 }
0x14b5   :  { %v11260_v9 = vadd.f32 %v11259_v63, %v11180_v14  ;;  %v14529_v3 = vpop.f32.mrb[153].mxu1  ;;  %v14562_v4 = vpop.f32.mrb[145].mxu0 }
0x14b7   :  { %v11337_v46 = vadd.f32 %v11336_v30, %v11260_v9 }
0x14bc   :  { %v11419_v22 = vpop.f32.mrb[154].mxu1 }
0x14bd   :  { %v11420_v27 = vadd.f32 %v11419_v22, %v11337_v46  ;;  %v14551_v55 = vpop.f32.mrb[155].mxu1 }
0x14bf   :  { %v11495_v23 = vadd.f32 %v11494_v10, %v11420_v27 }
0x14c1   :  { %v11498_v54 = vadd.f32 %v11495_v23, %v11004_v36 }
0x14c3   :  { %15810 = vtanh.f32 %v11498_v54 }
0x14cd   :  { %v15811_v34 = vpop.eup %15810 }
0x14ce   :  { %v11504_v35 = vsub.f32 %v15811_v34, %v18204_v44 }
0x14e0   :  { %v4451_v48 = vpop.permute.xlu0 %4450 }
0x14e1   :  { %4464 = vst.msk [vmem:[#allocation4 + $0x30] sm:$0xff] %vm45_vm0, %v4451_v48 }
0x14e8   :  { %v11001_v50 = vld [vmem:[#allocation4 + $0x30] sm:$0xff] }
0x14e9   :  { %v11002_v38 = vmul.f32 %v18253_v16, %v11001_v50 }
0x14eb   :  { %v11503_v8 = vmul.f32 %v12566_v5, %v11002_v38 }
0x14ed   :  { %v11505_v51 = vmul.f32 %v11504_v35, %v11503_v8 }
0x14ef   :  { %v18310_v0 = vadd.f32 %v11505_v51, %v18204_v44 }
0x14f1   :  { %12567 = vst.msk [vmem:[%s18410_s4 + $0x30] sm:$0xff] %vm45_vm0, %v18310_v0  ;;  %v11512_v62 = vsel %vm45_vm0, %v18310_v0, 0 }
0x14f2   :  { %v11583_v37 = vand.u32 4294901760, %v11512_v62 }
0x14f4   :  { %v11584_v60 = vsub.f32 %v11512_v62, %v11583_v37  ;;  %14583 = vmatmul.mubr.f32.vlgmr.msra.gmra.mrb[146].mxu0 %v11583_v37 }
0x14f5   :  { %15549 = vmatpush3.bf16.msra.mxu0 %v17331_v1  ;;  %14604 = vmatprep.mubr.msk.f32.mxu0 %vm15826_vm2, %v18687_v28 }
0x14f6   :  { %15550 = vmatprep.subr.bf16.mxu0 %v18671_v59  ;;  %v11585_v44 = vand.u32 4294901760, %v11584_v60 }
0x14f8   :  { %v11586_v16 = vsub.f32 %v11584_v60, %v11585_v44 }
0x14f9   :  { %15552 = vmatpush3.bf16.msra.mxu0 %v17341_v25 }
0x14fa   :  { %15559 = vmatprep.subr.bf16.mxu0 %v18671_v59  ;;  %v11587_v41 = vand.u32 4294901760, %v11586_v16 }
0x14fc   :  { %14605 = vmatmul.mubr.f32.vlgmr.msra.gmra.mrb[148].mxu0 %v11585_v44  ;;  %14572 = vmatmul.mubr.f32.vlgmr.msra.gmra.mrb[156].mxu1 %v11587_v41 }
0x14fd   :  { %15543 = vmatpush3.bf16.msra.mxu1 %v17402_v31  ;;  %15561 = vmatpush3.bf16.msra.mxu0 %v17331_v1 }
0x14fe   :  { %15544 = vmatprep.subr.bf16.mxu1 %v18671_v59  ;;  %15562 = vmatprep.subr.bf16.mxu0 %v18671_v59 }
0x14ff   :  { %14593 = vmatprep.mubr.msk.f32.mxu1 %vm15826_vm2, %v18687_v28  ;;  %14626 = vmatprep.mubr.msk.f32.mxu0 %vm15826_vm2, %v18687_v28 }
0x1501   :  { %15546 = vmatpush3.bf16.msra.mxu1 %v17407_v7  ;;  %15564 = vmatpush3.bf16.msra.mxu0 %v17341_v25 }
0x1502   :  { %15553 = vmatprep.subr.bf16.mxu1 %v18671_v59  ;;  %15571 = vmatprep.subr.bf16.mxu0 %v18671_v59 }
0x1504   :  { %14594 = vmatmul.mubr.f32.vlgmr.msra.gmra.mrb[158].mxu1 %v11584_v60  ;;  %14627 = vmatmul.mubr.f32.vlgmr.msra.gmra.mrb[150].mxu0 %v11583_v37 }
0x1505   :  { %15555 = vmatpush3.bf16.msra.mxu1 %v17413_v20  ;;  %14615 = vmatprep.mubr.msk.f32.mxu1 %vm15826_vm2, %v18687_v28 }
0x1506   :  { %15556 = vmatprep.subr.bf16.mxu1 %v18671_v59  ;;  %15573 = vmatpush3.bf16.msra.mxu0 %v17500_v39 }
0x1507   :  { %15574 = vmatprep.subr.bf16.mxu0 %v18671_v59  ;;  %14648 = vmatprep.mubr.msk.f32.mxu0 %vm15826_vm2, %v18687_v28 }
0x1509   :  { %15558 = vmatpush3.bf16.msra.mxu1 %v17418_v40 }
0x150a   :  { %15576 = vmatpush3.bf16.msra.mxu0 %v17503_v33  ;;  %15565 = vmatprep.subr.bf16.mxu1 %v18671_v59  ;;  %v12547_v33 = vmul.f32 -1.442695, %v17592_v15 }
0x150b   :  { %15583 = vmatprep.subr.bf16.mxu0 %v18671_v59 }
0x150c   :  { %14616 = vmatmul.mubr.f32.vlgmr.msra.gmra.mrb[160].mxu1 %v11583_v37  ;;  %15812 = vpow2.f32 %v12547_v33 }
0x150d   :  { %15567 = vmatpush3.bf16.msra.mxu1 %v17492_v47  ;;  %14637 = vmatprep.mubr.msk.f32.mxu1 %vm15826_vm2, %v18687_v28 }
0x150e   :  { %15568 = vmatprep.subr.bf16.mxu1 %v18671_v59 }
0x1511   :  { %15570 = vmatpush3.bf16.msra.mxu1 %v17494_v45 }
0x1512   :  { %15577 = vmatprep.subr.bf16.mxu1 %v18671_v59 }
0x1516   :  { %v15813_v19 = vpop.eup %15812 }
0x1517   :  { %v4281_v2 = vadd.f32 1.0, %v15813_v19 }
0x1519   :  { %15814 = vrcp.f32 %v4281_v2 }
0x1523   :  { %v15815_v11 = vpop.eup %15814 }
0x1524   :  { %v4313_v63 = vsub.f32 1.0, %v15815_v11  ;;  %v4305_v4 = vmul.f32 %v15815_v11, %v17563_v52 }
0x1526   :  { %v4325_v9 = vmul.f32 %v17611_v6, %v4313_v63 }
0x1528   :  { %v4333_v3 = vmul.f32 %v4325_v9, %v17563_v52 }
0x152a   :  { %v4341_v46 = vadd.f32 %v4333_v3, %v4305_v4 }
0x152c   :  { %v4353_v27 = vmul.f32 %v17623_v61, %v4341_v46 }
0x15c7   :  { %v11680_v1 = vpop.f32.mrb[146].mxu0 }
0x15c8   :  { %v14584_v25 = vpop.f32.mrb[147].mxu0 }
0x15cf   :  { %v11837_v31 = vpop.f32.mrb[148].mxu0  ;;  %v11589_v7 = vpop.f32.mrb[156].mxu1 }
0x15d0   :  { %v11681_v20 = vadd.f32 %v11680_v1, %v11589_v7  ;;  %v14606_v40 = vpop.f32.mrb[149].mxu0  ;;  %v14573_v39 = vpop.f32.mrb[157].mxu1  ;;  %v12010_v1 = vld [vmem:[#allocation3 + $0x38] sm:$0xff] }
0x15d1   :  { %v12569_v7 = vld [vmem:[%s18407_s0 + $0x78] sm:$0xff] }
0x15d7   :  { %v11760_v32 = vpop.f32.mrb[158].mxu1  ;;  %v11995_v58 = vpop.f32.mrb[150].mxu0 }
0x15d8   :  { %v11761_v24 = vadd.f32 %v11760_v32, %v11681_v20  ;;  %v14595_v53 = vpop.f32.mrb[159].mxu1  ;;  %v14628_v49 = vpop.f32.mrb[151].mxu0 }
0x15da   :  { %v11838_v18 = vadd.f32 %v11837_v31, %v11761_v24 }
0x15df   :  { %v11920_v43 = vpop.f32.mrb[160].mxu1 }
0x15e0   :  { %v11921_v29 = vadd.f32 %v11920_v43, %v11838_v18  ;;  %v14617_v17 = vpop.f32.mrb[161].mxu1 }
0x15e2   :  { %v11996_v30 = vadd.f32 %v11995_v58, %v11921_v29 }
0x15e4   :  { %v11999_v14 = vadd.f32 %v11996_v30, %v11510_v26 }
0x15e6   :  { %v12568_v42 = vmul.f32 -1.442695, %v11999_v14 }
0x15e8   :  { %15816 = vpow2.f32 %v12568_v42 }
0x15f2   :  { %v15817_v15 = vpop.eup %15816 }
0x15f3   :  { %v12003_v10 = vadd.f32 1.0, %v15817_v15 }
0x15f5   :  { %15818 = vrcp.f32 %v12003_v10 }
0x15ff   :  { %v18359_v22 = vpop.eup %15818 }
0x1600   :  { %12012 = vrot.lane.b32.xlu0 %v18359_v22, %s15827_s11 }
0x1604   :  { %4376 = vrot.lane.b32.xlu0 %v4353_v27, %s15828_s21 }
0x1672   :  { %v12013_v55 = vpop.permute.xlu0 %12012 }
0x1673   :  { %v12015_v23 = vmul.f32 %v12013_v55, %v18310_v0 }
0x1675   :  { %v12017_v36 = vsel %vm45_vm0, %v12015_v23, 0 }
0x1676   :  { %v12088_v6 = vand.u32 4294901760, %v12017_v36  ;;  %v4377_v54 = vpop.permute.xlu0 %4376 }
0x1677   :  { %v4407_v48 = vsel %vm1818_vm1, %v4377_v54, 0.0 }
0x1678   :  { %v12089_v52 = vsub.f32 %v12017_v36, %v12088_v6  ;;  %14649 = vmatmul.mubr.f32.vlgmr.msra.gmra.mrb[152].mxu0 %v12088_v6  ;;  %4408 = vadd.xlane.f32.xlu0 %v4407_v48 }
0x1679   :  { %15585 = vmatpush3.bf16.msra.mxu0 %v17492_v47  ;;  %14670 = vmatprep.mubr.msk.f32.mxu0 %vm15826_vm2, %v18687_v28 }
0x167a   :  { %15586 = vmatprep.subr.bf16.mxu0 %v18671_v59  ;;  %v12090_v61 = vand.u32 4294901760, %v12089_v52 }
0x167c   :  { %v12091_v34 = vsub.f32 %v12089_v52, %v12090_v61 }
0x167d   :  { %15588 = vmatpush3.bf16.msra.mxu0 %v17494_v45 }
0x167e   :  { %15595 = vmatprep.subr.bf16.mxu0 %v18671_v59  ;;  %v12092_v50 = vand.u32 4294901760, %v12091_v34 }
0x1680   :  { %14671 = vmatmul.mubr.f32.vlgmr.msra.gmra.mrb[154].mxu0 %v12090_v61  ;;  %14638 = vmatmul.mubr.f32.vlgmr.msra.gmra.mrb[162].mxu1 %v12092_v50 }
0x1681   :  { %15579 = vmatpush3.bf16.msra.mxu1 %v17511_v12  ;;  %15597 = vmatpush3.bf16.msra.mxu0 %v17492_v47 }
0x1682   :  { %15580 = vmatprep.subr.bf16.mxu1 %v18671_v59  ;;  %15598 = vmatprep.subr.bf16.mxu0 %v18671_v59 }
0x1683   :  { %14659 = vmatprep.mubr.msk.f32.mxu1 %vm15826_vm2, %v18687_v28  ;;  %14692 = vmatprep.mubr.msk.f32.mxu0 %vm15826_vm2, %v18687_v28 }
0x1685   :  { %15582 = vmatpush3.bf16.msra.mxu1 %v17514_v13  ;;  %15600 = vmatpush3.bf16.msra.mxu0 %v17494_v45 }
0x1686   :  { %15589 = vmatprep.subr.bf16.mxu1 %v18671_v59 }
0x1688   :  { %14660 = vmatmul.mubr.f32.vlgmr.msra.gmra.mrb[164].mxu1 %v12089_v52  ;;  %14693 = vmatmul.mubr.f32.vlgmr.msra.gmra.mrb[156].mxu0 %v12088_v6 }
0x1689   :  { %15591 = vmatpush3.bf16.msra.mxu1 %v17520_v21  ;;  %14681 = vmatprep.mubr.msk.f32.mxu1 %vm15826_vm2, %v18687_v28 }
0x168a   :  { %15592 = vmatprep.subr.bf16.mxu1 %v18671_v59 }
0x168d   :  { %15594 = vmatpush3.bf16.msra.mxu1 %v17522_v56 }
0x1690   :  { %14682 = vmatmul.mubr.f32.vlgmr.msra.gmra.mrb[166].mxu1 %v12088_v6 }
0x1705   :  { %v4409_v47 = vpop.xlane.xlu0 %4408 }
0x1706   :  { %v4417_v12 = vadd.f32 %v18087_v57, %v4409_v47 }
0x1708   :  { %4455 = vperm.xlu1 %15739, %v4417_v12  }
0x174b   :  { %v12185_v13 = vpop.f32.mrb[152].mxu0 }
0x174c   :  { %v14650_v45 = vpop.f32.mrb[153].mxu0 }
0x1753   :  { %v12342_v5 = vpop.f32.mrb[154].mxu0  ;;  %v12094_v38 = vpop.f32.mrb[162].mxu1 }
0x1754   :  { %v12186_v35 = vadd.f32 %v12185_v13, %v12094_v38  ;;  %v14672_v8 = vpop.f32.mrb[155].mxu0  ;;  %v14639_v51 = vpop.f32.mrb[163].mxu1 }
0x175b   :  { %v12265_v21 = vpop.f32.mrb[164].mxu1  ;;  %v12500_v62 = vpop.f32.mrb[156].mxu0 }
0x175c   :  { %v12266_v37 = vadd.f32 %v12265_v21, %v12186_v35  ;;  %v14661_v28 = vpop.f32.mrb[165].mxu1  ;;  %v14694_v60 = vpop.f32.mrb[157].mxu0 }
0x175e   :  { %v12343_v59 = vadd.f32 %v12342_v5, %v12266_v37 }
0x1763   :  { %v12425_v44 = vpop.f32.mrb[166].mxu1 }
0x1764   :  { %v12426_v56 = vadd.f32 %v12425_v44, %v12343_v59  ;;  %v14683_v16 = vpop.f32.mrb[167].mxu1 }
0x1766   :  { %v12501_v41 = vadd.f32 %v12500_v62, %v12426_v56 }
0x1768   :  { %v12504_v57 = vadd.f32 %v12501_v41, %v12010_v1 }
0x176a   :  { %15820 = vtanh.f32 %v12504_v57 }
0x1774   :  { %v15821_v31 = vpop.eup %15820 }
0x1775   :  { %v12510_v39 = vsub.f32 %v15821_v31, %v18310_v0 }
0x1787   :  { %v4456_v25 = vpop.permute.xlu1 %4455 }
0x1788   :  { %4465 = vst.msk [vmem:[#allocation4 + $0x38] sm:$0xff] %vm45_vm0, %v4456_v25 }
0x178f   :  { %v12007_v20 = vld [vmem:[#allocation4 + $0x38] sm:$0xff] }
0x1790   :  { %v12008_v40 = vmul.f32 %v18359_v22, %v12007_v20 }
0x1792   :  { %v12509_v33 = vmul.f32 %v12569_v7, %v12008_v40 }
0x1794   :  { %v12511_v32 = vmul.f32 %v12510_v39, %v12509_v33 }
0x1796   :  { %v12512_v58 = vadd.f32 %v12511_v32, %v18310_v0 }
0x1798   :  { %12570 = vst.msk [vmem:[%s18410_s4 + $0x38] sm:$0xff] %vm45_vm0, %v12512_v58  ;;  %12515 = vst.msk [vmem:[%s18411_s5] sm:$0xff] %vm45_vm0, %v12512_v58 }

</bundles_post_ra>
